<compile_context>
chip_gen: v7x
topology: tpu7x:2x2x1
jax: 0.10.0
libtpu: 0.0.40
codegen_flags: <defaults>
</compile_context>

<pallas_src>
import functools
import math

import jax
import jax.numpy as jnp
from jax import lax
from jax.experimental import pallas as pl
from jax.experimental.pallas import tpu as pltpu


# ---------------------------------------------------------------------------
# Fused kernel: QKV projection + multi-head attention + output projection
# ---------------------------------------------------------------------------

def _fused_attention_layer_kernel(*refs, n_heads, d_k, d_v, block_b, scale,
                                  shared_qkv_input, approx_recip):
    if shared_qkv_input:
        (x_ref, wq_ref, wk_ref, wv_ref, wo_ref,
         bq_ref, bk_ref, bv_ref, bo_ref, o_ref) = refs
        q_in_ref = k_in_ref = v_in_ref = x_ref
    else:
        (q_in_ref, k_in_ref, v_in_ref, wq_ref, wk_ref, wv_ref, wo_ref,
         bq_ref, bk_ref, bv_ref, bo_ref, o_ref) = refs

    cdtype = q_in_ref.dtype            # compute dtype: bf16 stays bf16 on MXU
    d_model_out = o_ref.shape[-1]

    # Weights loaded once per grid step (constant index_map -> no re-DMA).
    wq = wq_ref[...]
    wk = wk_ref[...]
    wv = wv_ref[...]
    bq = bq_ref[...].astype(jnp.float32)
    bk = bk_ref[...].astype(jnp.float32)
    bv = bv_ref[...].astype(jnp.float32)
    bo = bo_ref[...].astype(jnp.float32)

    # Static unroll over the batch elements of this block (block_b is small).
    for b in range(block_b):
        if shared_qkv_input:
            xq = xk = xv = q_in_ref[b]             # (L, d_model), loaded once
        else:
            xq = q_in_ref[b]                       # (L, d_model)
            xk = k_in_ref[b]                       # (S, d_model)
            xv = v_in_ref[b]                       # (S, d_model)

        # Full-width projections: one MXU matmul each, f32 accumulation, bias
        # (and the 1/sqrt(dk) scale folded into Q) applied in the f32 epilogue,
        # then cast back to the compute dtype so the attention matmuls run at
        # native (bf16) MXU throughput -- no full-tile f32 copies of q/k/v.
        q = ((jnp.dot(xq, wq, preferred_element_type=jnp.float32) + bq)
             * scale).astype(cdtype)               # (L, H*dk)
        k = (jnp.dot(xk, wk, preferred_element_type=jnp.float32)
             + bk).astype(cdtype)                  # (S, H*dk)
        v = (jnp.dot(xv, wv, preferred_element_type=jnp.float32)
             + bv).astype(cdtype)                  # (S, H*dv)

        L = q.shape[0]
        acc = jnp.zeros((L, d_model_out), jnp.float32)

        # TODO(synk): KV-tiled online softmax for long sequences (see header).
        for h in range(n_heads):                   # static unroll over heads
            qh = q[:, h * d_k:(h + 1) * d_k]       # (L, dk) static lane slice
            kh = k[:, h * d_k:(h + 1) * d_k]       # (S, dk)
            vh = v[:, h * d_v:(h + 1) * d_v]       # (S, dv)

            # Q K^T without materializing a transposed K tile; f32 accumulate.
            s = lax.dot_general(qh, kh,
                                dimension_numbers=(((1,), (1,)), ((), ())),
                                preferred_element_type=jnp.float32)  # (L, S)

            m = jnp.max(s, axis=-1, keepdims=True)
            p = jnp.exp(s - m)                     # softmax stats stay in f32
            denom = jnp.sum(p, axis=-1, keepdims=True)
            if approx_recip:
                inv = pl.reciprocal(denom, approx=True)   # EUP slot, ~free
            else:
                inv = 1.0 / denom
            a = (p * inv).astype(cdtype)           # cast P (small), not V

            oh = jnp.dot(a, vh,
                         preferred_element_type=jnp.float32).astype(cdtype)

            # Output projection folded per head: acc += O_h @ Wo_h.
            # Replaces the H-way lane concatenate + separate out-proj kernel.
            acc = acc + jnp.dot(oh, wo_ref[h],
                                preferred_element_type=jnp.float32)

        o_ref[b] = (acc + bo).astype(o_ref.dtype)


# ---------------------------------------------------------------------------
# Wrapper
# ---------------------------------------------------------------------------

def _largest_divisor_at_most(n, cap):
    cap = max(1, min(n, cap))
    for d in range(cap, 0, -1):
        if n % d == 0:
            return d
    return 1


def attention_layer_forward(params, queries, keys, values, attn_mask, n_heads,
                            *, block_b=None, approx_recip=True,
                            vmem_limit_bytes=32 * 1024 * 1024):
    """Fused AttentionLayer forward: (B, L, d_model) -> (B, L, d_model)."""
    if attn_mask is not None:
        # TODO(synk): attn_mask handling not implemented (mask is None here).
        raise NotImplementedError("attn_mask is not supported")

    B, L, d_model_in = queries.shape
    _, S, _ = keys.shape
    H = n_heads
    hdk = params["wq"].shape[1]
    hdv = params["wv"].shape[1]
    d_model_out = params["wo"].shape[1]
    d_k = hdk // H
    d_v = hdv // H
    scale = 1.0 / math.sqrt(d_k)

    # Head-major out-projection weight + 2D biases. These are metadata-only
    # reshapes (no weight concatenation / HBM copies per call).
    wo3 = params["wo"].reshape(H, d_v, d_model_out)
    bq2 = params["bq"].reshape(1, hdk)
    bk2 = params["bk"].reshape(1, hdk)
    bv2 = params["bv"].reshape(1, hdv)
    bo2 = params["bo"].reshape(1, d_model_out)

    # Batch-block size: pack several batch elements per grid step to amortize
    # the ~0.35us/step pipeline overhead, capped so each activation block stays
    # <= ~2 MiB (keeps double-buffered blocks comfortably inside v7x VMEM).
    if block_b is None:
        bytes_per_b = max(L, S) * d_model_in * queries.dtype.itemsize
        cap = max(1, (2 * 1024 * 1024) // max(1, bytes_per_b))
        block_b = _largest_divisor_at_most(B, cap)
    else:
        block_b = _largest_divisor_at_most(B, block_b)

    # Self-attention dedup: read the shared activation from HBM once.
    shared = (queries is keys) and (keys is values)

    def act_spec(seq, feat):
        return pl.BlockSpec((block_b, seq, feat), lambda i: (i, 0, 0))

    def resident_spec(shape, single_buffered):
        ndim = len(shape)
        index_map = lambda i, _n=ndim: (0,) * _n
        if single_buffered:
            # Constant index_map -> single buffer is enough; halves weight VMEM.
            return pl.BlockSpec(shape, index_map, pipeline_mode=pl.Buffered(1))
        return pl.BlockSpec(shape, index_map)

    def build(single_buffered_weights):
        kernel = functools.partial(
            _fused_attention_layer_kernel, n_heads=H, d_k=d_k, d_v=d_v,
            block_b=block_b, scale=scale, shared_qkv_input=shared,
            approx_recip=approx_recip)
        weight_specs = [
            resident_spec((d_model_in, hdk), single_buffered_weights),   # wq
            resident_spec((d_model_in, hdk), single_buffered_weights),   # wk
            resident_spec((d_model_in, hdv), single_buffered_weights),   # wv
            resident_spec((H, d_v, d_model_out), single_buffered_weights),  # wo3
            resident_spec((1, hdk), single_buffered_weights),            # bq
            resident_spec((1, hdk), single_buffered_weights),            # bk
            resident_spec((1, hdv), single_buffered_weights),            # bv
            resident_spec((1, d_model_out), single_buffered_weights),    # bo
        ]
        if shared:
            in_specs = [act_spec(L, d_model_in)] + weight_specs
            operands = (queries, params["wq"], params["wk"], params["wv"],
                        wo3, bq2, bk2, bv2, bo2)
        else:
            in_specs = [act_spec(L, d_model_in), act_spec(S, d_model_in),
                        act_spec(S, d_model_in)] + weight_specs
            operands = (queries, keys, values, params["wq"], params["wk"],
                        params["wv"], wo3, bq2, bk2, bv2, bo2)
        return pl.pallas_call(
            kernel,
            out_shape=jax.ShapeDtypeStruct((B, L, d_model_out), queries.dtype),
            grid=(B // block_b,),
            in_specs=in_specs,
            out_specs=pl.BlockSpec((block_b, L, d_model_out),
                                   lambda i: (i, 0, 0)),
            compiler_params=pltpu.CompilerParams(
                dimension_semantics=("parallel",),
                vmem_limit_bytes=vmem_limit_bytes),
        )(*operands)

    try:
        return build(single_buffered_weights=True)
    except Exception:
        # Fallback if this jax/Mosaic version rejects pipeline_mode=Buffered(1).
        return build(single_buffered_weights=False)


# ---------------------------------------------------------------------------
# Pure-JAX reference (for validation)
# ---------------------------------------------------------------------------

def attention_layer_reference(params, queries, keys, values, n_heads):
    B, L, _ = queries.shape
    _, S, _ = keys.shape
    H = n_heads
    q = queries @ params["wq"] + params["bq"]
    k = keys @ params["wk"] + params["bk"]
    v = values @ params["wv"] + params["bv"]
    dk = q.shape[-1] // H
    dv = v.shape[-1] // H
    q = q.reshape(B, L, H, dk)
    k = k.reshape(B, S, H, dk)
    v = v.reshape(B, S, H, dv)
    scores = jnp.einsum("blhe,bshe->bhls", q, k) / jnp.sqrt(jnp.float32(dk))
    a = jax.nn.softmax(scores, axis=-1)
    o = jnp.einsum("bhls,bshd->blhd", a, v).reshape(B, L, H * dv)
    return o @ params["wo"] + params["bo"]


# ---------------------------------------------------------------------------
# Deterministic parameter init (PyTorch nn.Linear-style uniform)
# ---------------------------------------------------------------------------

def init_params(key, d_model, n_heads):
    d_keys = d_model // n_heads
    d_values = d_model // n_heads

    def linear_init(k, d_in, d_out):
        bound = 1.0 / math.sqrt(d_in)
        kw, kb = jax.random.split(k)
        # stored already transposed: (d_in, d_out), so y = x @ w + b
        w = jax.random.uniform(kw, (d_in, d_out), jnp.float32, -bound, bound)
        b = jax.random.uniform(kb, (d_out,), jnp.float32, -bound, bound)
        return w, b

    kq, kk, kv, ko = jax.random.split(key, 4)
    wq, bq = linear_init(kq, d_model, d_keys * n_heads)
    wk, bk = linear_init(kk, d_model, d_keys * n_heads)
    wv, bv = linear_init(kv, d_model, d_values * n_heads)
    wo, bo = linear_init(ko, d_values * n_heads, d_model)   # LazyLinear resolved
    return dict(wq=wq, bq=bq, wk=wk, bk=bk, wv=wv, bv=bv, wo=wo, bo=bo)


# ---------------------------------------------------------------------------
# Main
# ---------------------------------------------------------------------------

if __name__ == "__main__":
    B, L, S = 2, 8, 8
    d_model, n_heads = 32, 4

    key = jax.random.PRNGKey(0)
    kp, kq, kk, kv = jax.random.split(key, 4)

    params = init_params(kp, d_model, n_heads)
    queries = jax.random.normal(kq, (B, L, d_model), jnp.float32)
    keys = jax.random.normal(kk, (B, S, d_model), jnp.float32)
    values = jax.random.normal(kv, (B, S, d_model), jnp.float32)
    attn_mask = None

    # Cross-attention path (distinct q/k/v tensors), f32.
    out = attention_layer_forward(params, queries, keys, values, attn_mask,
                                  n_heads)
    out = jax.block_until_ready(out)
    assert out.shape == (B, L, d_model), out.shape
    ref = attention_layer_reference(params, queries, keys, values, n_heads)
    assert jnp.allclose(out, ref, atol=2e-2, rtol=2e-2), \
        float(jnp.max(jnp.abs(out - ref)))

    # Self-attention path (shared q/k/v input, DMA'd from HBM once).
    out_self = attention_layer_forward(params, queries, queries, queries,
                                       attn_mask, n_heads)
    out_self = jax.block_until_ready(out_self)
    ref_self = attention_layer_reference(params, queries, queries, queries,
                                         n_heads)
    assert jnp.allclose(out_self, ref_self, atol=2e-2, rtol=2e-2)

    # bf16 end-to-end (native-dtype MXU operands, f32 accumulation).
    params_bf16 = jax.tree_util.tree_map(lambda p: p.astype(jnp.bfloat16),
                                         params)
    out_bf16 = attention_layer_forward(
        params_bf16, queries.astype(jnp.bfloat16), keys.astype(jnp.bfloat16),
        values.astype(jnp.bfloat16), attn_mask, n_heads)
    out_bf16 = jax.block_until_ready(out_bf16)
    assert out_bf16.shape == (B, L, d_model)
    assert bool(jnp.all(jnp.isfinite(out_bf16.astype(jnp.float32))))

    print("KERNEL_OK")
</pallas_src>

<mosaic_0001>
module attributes {stable_mosaic.version = 11 : i64} {
  func.func @_fused_attention_layer_kernel(%arg0: i32, %arg1: memref<2x8x32xf32, #tpu.memory_space<vmem>>, %arg2: memref<2x8x32xf32, #tpu.memory_space<vmem>>, %arg3: memref<2x8x32xf32, #tpu.memory_space<vmem>>, %arg4: memref<32x32xf32, #tpu.memory_space<vmem>>, %arg5: memref<32x32xf32, #tpu.memory_space<vmem>>, %arg6: memref<32x32xf32, #tpu.memory_space<vmem>>, %arg7: memref<4x8x32xf32, #tpu.memory_space<vmem>>, %arg8: memref<1x32xf32, #tpu.memory_space<vmem>>, %arg9: memref<1x32xf32, #tpu.memory_space<vmem>>, %arg10: memref<1x32xf32, #tpu.memory_space<vmem>>, %arg11: memref<1x32xf32, #tpu.memory_space<vmem>>, %arg12: memref<2x8x32xf32, #tpu.memory_space<vmem>>) attributes {dimension_semantics = [#tpu.dimension_semantics<parallel>], iteration_bounds = array<i64: 1>, scalar_prefetch = 0 : i64, scratch_operands = 0 : i64, tpu.core_type = #tpu.core_type<tc>, window_params = [{transform_indices = @transform_0, window_bounds = array<i64: 2, 8, 32>}, {transform_indices = @transform_1, window_bounds = array<i64: 2, 8, 32>}, {transform_indices = @transform_2, window_bounds = array<i64: 2, 8, 32>}, {pipeline_mode = #tpu.pipeline_mode<synchronous>, transform_indices = @transform_3, window_bounds = array<i64: 32, 32>}, {pipeline_mode = #tpu.pipeline_mode<synchronous>, transform_indices = @transform_4, window_bounds = array<i64: 32, 32>}, {pipeline_mode = #tpu.pipeline_mode<synchronous>, transform_indices = @transform_5, window_bounds = array<i64: 32, 32>}, {pipeline_mode = #tpu.pipeline_mode<synchronous>, transform_indices = @transform_6, window_bounds = array<i64: 4, 8, 32>}, {pipeline_mode = #tpu.pipeline_mode<synchronous>, transform_indices = @transform_7, window_bounds = array<i64: 1, 32>}, {pipeline_mode = #tpu.pipeline_mode<synchronous>, transform_indices = @transform_8, window_bounds = array<i64: 1, 32>}, {pipeline_mode = #tpu.pipeline_mode<synchronous>, transform_indices = @transform_9, window_bounds = array<i64: 1, 32>}, {pipeline_mode = #tpu.pipeline_mode<synchronous>, transform_indices = @transform_10, window_bounds = array<i64: 1, 32>}, {transform_indices = @transform_11, window_bounds = array<i64: 2, 8, 32>}]} {
    %c0 = arith.constant 0 : index
    %c0_0 = arith.constant 0 : index
    %0 = vector.load %arg4[%c0, %c0_0] : memref<32x32xf32, #tpu.memory_space<vmem>>, vector<32x32xf32>
    %c0_1 = arith.constant 0 : index
    %c0_2 = arith.constant 0 : index
    %1 = vector.load %arg5[%c0_1, %c0_2] : memref<32x32xf32, #tpu.memory_space<vmem>>, vector<32x32xf32>
    %c0_3 = arith.constant 0 : index
    %c0_4 = arith.constant 0 : index
    %2 = vector.load %arg6[%c0_3, %c0_4] : memref<32x32xf32, #tpu.memory_space<vmem>>, vector<32x32xf32>
    %c0_5 = arith.constant 0 : index
    %c0_6 = arith.constant 0 : index
    %3 = vector.load %arg8[%c0_5, %c0_6] : memref<1x32xf32, #tpu.memory_space<vmem>>, vector<1x32xf32>
    %c0_7 = arith.constant 0 : index
    %c0_8 = arith.constant 0 : index
    %4 = vector.load %arg9[%c0_7, %c0_8] : memref<1x32xf32, #tpu.memory_space<vmem>>, vector<1x32xf32>
    %c0_9 = arith.constant 0 : index
    %c0_10 = arith.constant 0 : index
    %5 = vector.load %arg10[%c0_9, %c0_10] : memref<1x32xf32, #tpu.memory_space<vmem>>, vector<1x32xf32>
    %c0_11 = arith.constant 0 : index
    %c0_12 = arith.constant 0 : index
    %6 = vector.load %arg11[%c0_11, %c0_12] : memref<1x32xf32, #tpu.memory_space<vmem>>, vector<1x32xf32>
    %c0_13 = arith.constant 0 : index
    %c0_14 = arith.constant 0 : index
    %c0_15 = arith.constant 0 : index
    %7 = vector.load %arg1[%c0_13, %c0_14, %c0_15] : memref<2x8x32xf32, #tpu.memory_space<vmem>>, vector<1x8x32xf32>
    %8 = vector.shape_cast %7 : vector<1x8x32xf32> to vector<8x32xf32>
    %c0_16 = arith.constant 0 : index
    %c0_17 = arith.constant 0 : index
    %c0_18 = arith.constant 0 : index
    %9 = vector.load %arg2[%c0_16, %c0_17, %c0_18] : memref<2x8x32xf32, #tpu.memory_space<vmem>>, vector<1x8x32xf32>
    %10 = vector.shape_cast %9 : vector<1x8x32xf32> to vector<8x32xf32>
    %c0_19 = arith.constant 0 : index
    %c0_20 = arith.constant 0 : index
    %c0_21 = arith.constant 0 : index
    %11 = vector.load %arg3[%c0_19, %c0_20, %c0_21] : memref<2x8x32xf32, #tpu.memory_space<vmem>>, vector<1x8x32xf32>
    %12 = vector.shape_cast %11 : vector<1x8x32xf32> to vector<8x32xf32>
    %cst = arith.constant dense<0.000000e+00> : vector<8x32xf32>
    %13 = tpu.matmul %8, %0, %cst {dimension_numbers = #tpu.dot_dimension_numbers<[1], [0], [0], [1], [0, 0, 1, 1], [], []>} : vector<8x32xf32>, vector<32x32xf32>, vector<8x32xf32> -> vector<8x32xf32>
    %14 = vector.broadcast %3 : vector<1x32xf32> to vector<8x32xf32>
    %15 = arith.addf %13, %14 : vector<8x32xf32>
    %cst_22 = arith.constant 0.353553385 : f32
    %16 = vector.broadcast %cst_22 : f32 to vector<8x32xf32>
    %17 = arith.mulf %15, %16 : vector<8x32xf32>
    %cst_23 = arith.constant dense<0.000000e+00> : vector<8x32xf32>
    %18 = tpu.matmul %10, %1, %cst_23 {dimension_numbers = #tpu.dot_dimension_numbers<[1], [0], [0], [1], [0, 0, 1, 1], [], []>} : vector<8x32xf32>, vector<32x32xf32>, vector<8x32xf32> -> vector<8x32xf32>
    %19 = vector.broadcast %4 : vector<1x32xf32> to vector<8x32xf32>
    %20 = arith.addf %18, %19 : vector<8x32xf32>
    %cst_24 = arith.constant dense<0.000000e+00> : vector<8x32xf32>
    %21 = tpu.matmul %12, %2, %cst_24 {dimension_numbers = #tpu.dot_dimension_numbers<[1], [0], [0], [1], [0, 0, 1, 1], [], []>} : vector<8x32xf32>, vector<32x32xf32>, vector<8x32xf32> -> vector<8x32xf32>
    %22 = vector.broadcast %5 : vector<1x32xf32> to vector<8x32xf32>
    %23 = arith.addf %21, %22 : vector<8x32xf32>
    %cst_25 = arith.constant 0.000000e+00 : f32
    %24 = vector.broadcast %cst_25 : f32 to vector<8x32xf32>
    %25 = vector.extract_strided_slice %17 {offsets = [0, 0], sizes = [8, 8], strides = [1, 1]} : vector<8x32xf32> to vector<8x8xf32>
    %26 = vector.extract_strided_slice %20 {offsets = [0, 0], sizes = [8, 8], strides = [1, 1]} : vector<8x32xf32> to vector<8x8xf32>
    %27 = vector.extract_strided_slice %23 {offsets = [0, 0], sizes = [8, 8], strides = [1, 1]} : vector<8x32xf32> to vector<8x8xf32>
    %cst_26 = arith.constant dense<0.000000e+00> : vector<8x8xf32>
    %28 = tpu.matmul %25, %26, %cst_26 {dimension_numbers = #tpu.dot_dimension_numbers<[1], [1], [0], [0], [0, 0, 1, 0], [], []>} : vector<8x8xf32>, vector<8x8xf32>, vector<8x8xf32> -> vector<8x8xf32>
    %cst_27 = arith.constant dense<0xFF800000> : vector<8xf32>
    %29 = vector.multi_reduction <maximumf>, %28, %cst_27 [1] : vector<8x8xf32> to vector<8xf32>
    %30 = vector.shape_cast %29 : vector<8xf32> to vector<8x1xf32>
    %31 = vector.broadcast %30 : vector<8x1xf32> to vector<8x8xf32>
    %32 = arith.subf %28, %31 : vector<8x8xf32>
    %33 = math.exp %32 : vector<8x8xf32>
    %cst_28 = arith.constant dense<0.000000e+00> : vector<8xf32>
    %34 = vector.multi_reduction <add>, %33, %cst_28 [1] : vector<8x8xf32> to vector<8xf32>
    %35 = vector.shape_cast %34 : vector<8xf32> to vector<8x1xf32>
    %36 = tpu.reciprocal %35 {approx = true} : vector<8x1xf32> -> vector<8x1xf32>
    %37 = vector.broadcast %36 : vector<8x1xf32> to vector<8x8xf32>
    %38 = arith.mulf %33, %37 : vector<8x8xf32>
    %cst_29 = arith.constant dense<0.000000e+00> : vector<8x8xf32>
    %39 = tpu.matmul %38, %27, %cst_29 {dimension_numbers = #tpu.dot_dimension_numbers<[1], [0], [0], [1], [0, 0, 1, 1], [], []>} : vector<8x8xf32>, vector<8x8xf32>, vector<8x8xf32> -> vector<8x8xf32>
    %c0_30 = arith.constant 0 : index
    %c0_31 = arith.constant 0 : index
    %c0_32 = arith.constant 0 : index
    %40 = vector.load %arg7[%c0_30, %c0_31, %c0_32] : memref<4x8x32xf32, #tpu.memory_space<vmem>>, vector<1x8x32xf32>
    %41 = vector.shape_cast %40 : vector<1x8x32xf32> to vector<8x32xf32>
    %cst_33 = arith.constant dense<0.000000e+00> : vector<8x32xf32>
    %42 = tpu.matmul %39, %41, %cst_33 {dimension_numbers = #tpu.dot_dimension_numbers<[1], [0], [0], [1], [0, 0, 1, 1], [], []>} : vector<8x8xf32>, vector<8x32xf32>, vector<8x32xf32> -> vector<8x32xf32>
    %43 = arith.addf %24, %42 : vector<8x32xf32>
    %44 = vector.extract_strided_slice %17 {offsets = [0, 8], sizes = [8, 8], strides = [1, 1]} : vector<8x32xf32> to vector<8x8xf32>
    %45 = vector.extract_strided_slice %20 {offsets = [0, 8], sizes = [8, 8], strides = [1, 1]} : vector<8x32xf32> to vector<8x8xf32>
    %46 = vector.extract_strided_slice %23 {offsets = [0, 8], sizes = [8, 8], strides = [1, 1]} : vector<8x32xf32> to vector<8x8xf32>
    %cst_34 = arith.constant dense<0.000000e+00> : vector<8x8xf32>
    %47 = tpu.matmul %44, %45, %cst_34 {dimension_numbers = #tpu.dot_dimension_numbers<[1], [1], [0], [0], [0, 0, 1, 0], [], []>} : vector<8x8xf32>, vector<8x8xf32>, vector<8x8xf32> -> vector<8x8xf32>
    %cst_35 = arith.constant dense<0xFF800000> : vector<8xf32>
    %48 = vector.multi_reduction <maximumf>, %47, %cst_35 [1] : vector<8x8xf32> to vector<8xf32>
    %49 = vector.shape_cast %48 : vector<8xf32> to vector<8x1xf32>
    %50 = vector.broadcast %49 : vector<8x1xf32> to vector<8x8xf32>
    %51 = arith.subf %47, %50 : vector<8x8xf32>
    %52 = math.exp %51 : vector<8x8xf32>
    %cst_36 = arith.constant dense<0.000000e+00> : vector<8xf32>
    %53 = vector.multi_reduction <add>, %52, %cst_36 [1] : vector<8x8xf32> to vector<8xf32>
    %54 = vector.shape_cast %53 : vector<8xf32> to vector<8x1xf32>
    %55 = tpu.reciprocal %54 {approx = true} : vector<8x1xf32> -> vector<8x1xf32>
    %56 = vector.broadcast %55 : vector<8x1xf32> to vector<8x8xf32>
    %57 = arith.mulf %52, %56 : vector<8x8xf32>
    %cst_37 = arith.constant dense<0.000000e+00> : vector<8x8xf32>
    %58 = tpu.matmul %57, %46, %cst_37 {dimension_numbers = #tpu.dot_dimension_numbers<[1], [0], [0], [1], [0, 0, 1, 1], [], []>} : vector<8x8xf32>, vector<8x8xf32>, vector<8x8xf32> -> vector<8x8xf32>
    %c1 = arith.constant 1 : index
    %c0_38 = arith.constant 0 : index
    %c0_39 = arith.constant 0 : index
    %59 = vector.load %arg7[%c1, %c0_38, %c0_39] : memref<4x8x32xf32, #tpu.memory_space<vmem>>, vector<1x8x32xf32>
    %60 = vector.shape_cast %59 : vector<1x8x32xf32> to vector<8x32xf32>
    %cst_40 = arith.constant dense<0.000000e+00> : vector<8x32xf32>
    %61 = tpu.matmul %58, %60, %cst_40 {dimension_numbers = #tpu.dot_dimension_numbers<[1], [0], [0], [1], [0, 0, 1, 1], [], []>} : vector<8x8xf32>, vector<8x32xf32>, vector<8x32xf32> -> vector<8x32xf32>
    %62 = arith.addf %43, %61 : vector<8x32xf32>
    %63 = vector.extract_strided_slice %17 {offsets = [0, 16], sizes = [8, 8], strides = [1, 1]} : vector<8x32xf32> to vector<8x8xf32>
    %64 = vector.extract_strided_slice %20 {offsets = [0, 16], sizes = [8, 8], strides = [1, 1]} : vector<8x32xf32> to vector<8x8xf32>
    %65 = vector.extract_strided_slice %23 {offsets = [0, 16], sizes = [8, 8], strides = [1, 1]} : vector<8x32xf32> to vector<8x8xf32>
    %cst_41 = arith.constant dense<0.000000e+00> : vector<8x8xf32>
    %66 = tpu.matmul %63, %64, %cst_41 {dimension_numbers = #tpu.dot_dimension_numbers<[1], [1], [0], [0], [0, 0, 1, 0], [], []>} : vector<8x8xf32>, vector<8x8xf32>, vector<8x8xf32> -> vector<8x8xf32>
    %cst_42 = arith.constant dense<0xFF800000> : vector<8xf32>
    %67 = vector.multi_reduction <maximumf>, %66, %cst_42 [1] : vector<8x8xf32> to vector<8xf32>
    %68 = vector.shape_cast %67 : vector<8xf32> to vector<8x1xf32>
    %69 = vector.broadcast %68 : vector<8x1xf32> to vector<8x8xf32>
    %70 = arith.subf %66, %69 : vector<8x8xf32>
    %71 = math.exp %70 : vector<8x8xf32>
    %cst_43 = arith.constant dense<0.000000e+00> : vector<8xf32>
    %72 = vector.multi_reduction <add>, %71, %cst_43 [1] : vector<8x8xf32> to vector<8xf32>
    %73 = vector.shape_cast %72 : vector<8xf32> to vector<8x1xf32>
    %74 = tpu.reciprocal %73 {approx = true} : vector<8x1xf32> -> vector<8x1xf32>
    %75 = vector.broadcast %74 : vector<8x1xf32> to vector<8x8xf32>
    %76 = arith.mulf %71, %75 : vector<8x8xf32>
    %cst_44 = arith.constant dense<0.000000e+00> : vector<8x8xf32>
    %77 = tpu.matmul %76, %65, %cst_44 {dimension_numbers = #tpu.dot_dimension_numbers<[1], [0], [0], [1], [0, 0, 1, 1], [], []>} : vector<8x8xf32>, vector<8x8xf32>, vector<8x8xf32> -> vector<8x8xf32>
    %c2 = arith.constant 2 : index
    %c0_45 = arith.constant 0 : index
    %c0_46 = arith.constant 0 : index
    %78 = vector.load %arg7[%c2, %c0_45, %c0_46] : memref<4x8x32xf32, #tpu.memory_space<vmem>>, vector<1x8x32xf32>
    %79 = vector.shape_cast %78 : vector<1x8x32xf32> to vector<8x32xf32>
    %cst_47 = arith.constant dense<0.000000e+00> : vector<8x32xf32>
    %80 = tpu.matmul %77, %79, %cst_47 {dimension_numbers = #tpu.dot_dimension_numbers<[1], [0], [0], [1], [0, 0, 1, 1], [], []>} : vector<8x8xf32>, vector<8x32xf32>, vector<8x32xf32> -> vector<8x32xf32>
    %81 = arith.addf %62, %80 : vector<8x32xf32>
    %82 = vector.extract_strided_slice %17 {offsets = [0, 24], sizes = [8, 8], strides = [1, 1]} : vector<8x32xf32> to vector<8x8xf32>
    %83 = vector.extract_strided_slice %20 {offsets = [0, 24], sizes = [8, 8], strides = [1, 1]} : vector<8x32xf32> to vector<8x8xf32>
    %84 = vector.extract_strided_slice %23 {offsets = [0, 24], sizes = [8, 8], strides = [1, 1]} : vector<8x32xf32> to vector<8x8xf32>
    %cst_48 = arith.constant dense<0.000000e+00> : vector<8x8xf32>
    %85 = tpu.matmul %82, %83, %cst_48 {dimension_numbers = #tpu.dot_dimension_numbers<[1], [1], [0], [0], [0, 0, 1, 0], [], []>} : vector<8x8xf32>, vector<8x8xf32>, vector<8x8xf32> -> vector<8x8xf32>
    %cst_49 = arith.constant dense<0xFF800000> : vector<8xf32>
    %86 = vector.multi_reduction <maximumf>, %85, %cst_49 [1] : vector<8x8xf32> to vector<8xf32>
    %87 = vector.shape_cast %86 : vector<8xf32> to vector<8x1xf32>
    %88 = vector.broadcast %87 : vector<8x1xf32> to vector<8x8xf32>
    %89 = arith.subf %85, %88 : vector<8x8xf32>
    %90 = math.exp %89 : vector<8x8xf32>
    %cst_50 = arith.constant dense<0.000000e+00> : vector<8xf32>
    %91 = vector.multi_reduction <add>, %90, %cst_50 [1] : vector<8x8xf32> to vector<8xf32>
    %92 = vector.shape_cast %91 : vector<8xf32> to vector<8x1xf32>
    %93 = tpu.reciprocal %92 {approx = true} : vector<8x1xf32> -> vector<8x1xf32>
    %94 = vector.broadcast %93 : vector<8x1xf32> to vector<8x8xf32>
    %95 = arith.mulf %90, %94 : vector<8x8xf32>
    %cst_51 = arith.constant dense<0.000000e+00> : vector<8x8xf32>
    %96 = tpu.matmul %95, %84, %cst_51 {dimension_numbers = #tpu.dot_dimension_numbers<[1], [0], [0], [1], [0, 0, 1, 1], [], []>} : vector<8x8xf32>, vector<8x8xf32>, vector<8x8xf32> -> vector<8x8xf32>
    %c3 = arith.constant 3 : index
    %c0_52 = arith.constant 0 : index
    %c0_53 = arith.constant 0 : index
    %97 = vector.load %arg7[%c3, %c0_52, %c0_53] : memref<4x8x32xf32, #tpu.memory_space<vmem>>, vector<1x8x32xf32>
    %98 = vector.shape_cast %97 : vector<1x8x32xf32> to vector<8x32xf32>
    %cst_54 = arith.constant dense<0.000000e+00> : vector<8x32xf32>
    %99 = tpu.matmul %96, %98, %cst_54 {dimension_numbers = #tpu.dot_dimension_numbers<[1], [0], [0], [1], [0, 0, 1, 1], [], []>} : vector<8x8xf32>, vector<8x32xf32>, vector<8x32xf32> -> vector<8x32xf32>
    %100 = arith.addf %81, %99 : vector<8x32xf32>
    %101 = vector.broadcast %6 : vector<1x32xf32> to vector<8x32xf32>
    %102 = arith.addf %100, %101 : vector<8x32xf32>
    %c0_55 = arith.constant 0 : index
    %c0_56 = arith.constant 0 : index
    %c0_57 = arith.constant 0 : index
    %103 = vector.load %arg12[%c0_55, %c0_56, %c0_57] : memref<2x8x32xf32, #tpu.memory_space<vmem>>, vector<1x8x32xf32>
    %104 = vector.shape_cast %103 : vector<1x8x32xf32> to vector<8x32xf32>
    %105 = vector.shape_cast %102 : vector<8x32xf32> to vector<1x8x32xf32>
    tpu.vector_store %arg12[%c0_55, %c0_56, %c0_57], %105 {strides = array<i32>} : memref<2x8x32xf32, #tpu.memory_space<vmem>>, vector<1x8x32xf32>,
    %c1_58 = arith.constant 1 : index
    %c0_59 = arith.constant 0 : index
    %c0_60 = arith.constant 0 : index
    %106 = vector.load %arg1[%c1_58, %c0_59, %c0_60] : memref<2x8x32xf32, #tpu.memory_space<vmem>>, vector<1x8x32xf32>
    %107 = vector.shape_cast %106 : vector<1x8x32xf32> to vector<8x32xf32>
    %c1_61 = arith.constant 1 : index
    %c0_62 = arith.constant 0 : index
    %c0_63 = arith.constant 0 : index
    %108 = vector.load %arg2[%c1_61, %c0_62, %c0_63] : memref<2x8x32xf32, #tpu.memory_space<vmem>>, vector<1x8x32xf32>
    %109 = vector.shape_cast %108 : vector<1x8x32xf32> to vector<8x32xf32>
    %c1_64 = arith.constant 1 : index
    %c0_65 = arith.constant 0 : index
    %c0_66 = arith.constant 0 : index
    %110 = vector.load %arg3[%c1_64, %c0_65, %c0_66] : memref<2x8x32xf32, #tpu.memory_space<vmem>>, vector<1x8x32xf32>
    %111 = vector.shape_cast %110 : vector<1x8x32xf32> to vector<8x32xf32>
    %cst_67 = arith.constant dense<0.000000e+00> : vector<8x32xf32>
    %112 = tpu.matmul %107, %0, %cst_67 {dimension_numbers = #tpu.dot_dimension_numbers<[1], [0], [0], [1], [0, 0, 1, 1], [], []>} : vector<8x32xf32>, vector<32x32xf32>, vector<8x32xf32> -> vector<8x32xf32>
    %113 = vector.broadcast %3 : vector<1x32xf32> to vector<8x32xf32>
    %114 = arith.addf %112, %113 : vector<8x32xf32>
    %cst_68 = arith.constant 0.353553385 : f32
    %115 = vector.broadcast %cst_68 : f32 to vector<8x32xf32>
    %116 = arith.mulf %114, %115 : vector<8x32xf32>
    %cst_69 = arith.constant dense<0.000000e+00> : vector<8x32xf32>
    %117 = tpu.matmul %109, %1, %cst_69 {dimension_numbers = #tpu.dot_dimension_numbers<[1], [0], [0], [1], [0, 0, 1, 1], [], []>} : vector<8x32xf32>, vector<32x32xf32>, vector<8x32xf32> -> vector<8x32xf32>
    %118 = vector.broadcast %4 : vector<1x32xf32> to vector<8x32xf32>
    %119 = arith.addf %117, %118 : vector<8x32xf32>
    %cst_70 = arith.constant dense<0.000000e+00> : vector<8x32xf32>
    %120 = tpu.matmul %111, %2, %cst_70 {dimension_numbers = #tpu.dot_dimension_numbers<[1], [0], [0], [1], [0, 0, 1, 1], [], []>} : vector<8x32xf32>, vector<32x32xf32>, vector<8x32xf32> -> vector<8x32xf32>
    %121 = vector.broadcast %5 : vector<1x32xf32> to vector<8x32xf32>
    %122 = arith.addf %120, %121 : vector<8x32xf32>
    %cst_71 = arith.constant 0.000000e+00 : f32
    %123 = vector.broadcast %cst_71 : f32 to vector<8x32xf32>
    %124 = vector.extract_strided_slice %116 {offsets = [0, 0], sizes = [8, 8], strides = [1, 1]} : vector<8x32xf32> to vector<8x8xf32>
    %125 = vector.extract_strided_slice %119 {offsets = [0, 0], sizes = [8, 8], strides = [1, 1]} : vector<8x32xf32> to vector<8x8xf32>
    %126 = vector.extract_strided_slice %122 {offsets = [0, 0], sizes = [8, 8], strides = [1, 1]} : vector<8x32xf32> to vector<8x8xf32>
    %cst_72 = arith.constant dense<0.000000e+00> : vector<8x8xf32>
    %127 = tpu.matmul %124, %125, %cst_72 {dimension_numbers = #tpu.dot_dimension_numbers<[1], [1], [0], [0], [0, 0, 1, 0], [], []>} : vector<8x8xf32>, vector<8x8xf32>, vector<8x8xf32> -> vector<8x8xf32>
    %cst_73 = arith.constant dense<0xFF800000> : vector<8xf32>
    %128 = vector.multi_reduction <maximumf>, %127, %cst_73 [1] : vector<8x8xf32> to vector<8xf32>
    %129 = vector.shape_cast %128 : vector<8xf32> to vector<8x1xf32>
    %130 = vector.broadcast %129 : vector<8x1xf32> to vector<8x8xf32>
    %131 = arith.subf %127, %130 : vector<8x8xf32>
    %132 = math.exp %131 : vector<8x8xf32>
    %cst_74 = arith.constant dense<0.000000e+00> : vector<8xf32>
    %133 = vector.multi_reduction <add>, %132, %cst_74 [1] : vector<8x8xf32> to vector<8xf32>
    %134 = vector.shape_cast %133 : vector<8xf32> to vector<8x1xf32>
    %135 = tpu.reciprocal %134 {approx = true} : vector<8x1xf32> -> vector<8x1xf32>
    %136 = vector.broadcast %135 : vector<8x1xf32> to vector<8x8xf32>
    %137 = arith.mulf %132, %136 : vector<8x8xf32>
    %cst_75 = arith.constant dense<0.000000e+00> : vector<8x8xf32>
    %138 = tpu.matmul %137, %126, %cst_75 {dimension_numbers = #tpu.dot_dimension_numbers<[1], [0], [0], [1], [0, 0, 1, 1], [], []>} : vector<8x8xf32>, vector<8x8xf32>, vector<8x8xf32> -> vector<8x8xf32>
    %c0_76 = arith.constant 0 : index
    %c0_77 = arith.constant 0 : index
    %c0_78 = arith.constant 0 : index
    %139 = vector.load %arg7[%c0_76, %c0_77, %c0_78] : memref<4x8x32xf32, #tpu.memory_space<vmem>>, vector<1x8x32xf32>
    %140 = vector.shape_cast %139 : vector<1x8x32xf32> to vector<8x32xf32>
    %cst_79 = arith.constant dense<0.000000e+00> : vector<8x32xf32>
    %141 = tpu.matmul %138, %140, %cst_79 {dimension_numbers = #tpu.dot_dimension_numbers<[1], [0], [0], [1], [0, 0, 1, 1], [], []>} : vector<8x8xf32>, vector<8x32xf32>, vector<8x32xf32> -> vector<8x32xf32>
    %142 = arith.addf %123, %141 : vector<8x32xf32>
    %143 = vector.extract_strided_slice %116 {offsets = [0, 8], sizes = [8, 8], strides = [1, 1]} : vector<8x32xf32> to vector<8x8xf32>
    %144 = vector.extract_strided_slice %119 {offsets = [0, 8], sizes = [8, 8], strides = [1, 1]} : vector<8x32xf32> to vector<8x8xf32>
    %145 = vector.extract_strided_slice %122 {offsets = [0, 8], sizes = [8, 8], strides = [1, 1]} : vector<8x32xf32> to vector<8x8xf32>
    %cst_80 = arith.constant dense<0.000000e+00> : vector<8x8xf32>
    %146 = tpu.matmul %143, %144, %cst_80 {dimension_numbers = #tpu.dot_dimension_numbers<[1], [1], [0], [0], [0, 0, 1, 0], [], []>} : vector<8x8xf32>, vector<8x8xf32>, vector<8x8xf32> -> vector<8x8xf32>
    %cst_81 = arith.constant dense<0xFF800000> : vector<8xf32>
    %147 = vector.multi_reduction <maximumf>, %146, %cst_81 [1] : vector<8x8xf32> to vector<8xf32>
    %148 = vector.shape_cast %147 : vector<8xf32> to vector<8x1xf32>
    %149 = vector.broadcast %148 : vector<8x1xf32> to vector<8x8xf32>
    %150 = arith.subf %146, %149 : vector<8x8xf32>
    %151 = math.exp %150 : vector<8x8xf32>
    %cst_82 = arith.constant dense<0.000000e+00> : vector<8xf32>
    %152 = vector.multi_reduction <add>, %151, %cst_82 [1] : vector<8x8xf32> to vector<8xf32>
    %153 = vector.shape_cast %152 : vector<8xf32> to vector<8x1xf32>
    %154 = tpu.reciprocal %153 {approx = true} : vector<8x1xf32> -> vector<8x1xf32>
    %155 = vector.broadcast %154 : vector<8x1xf32> to vector<8x8xf32>
    %156 = arith.mulf %151, %155 : vector<8x8xf32>
    %cst_83 = arith.constant dense<0.000000e+00> : vector<8x8xf32>
    %157 = tpu.matmul %156, %145, %cst_83 {dimension_numbers = #tpu.dot_dimension_numbers<[1], [0], [0], [1], [0, 0, 1, 1], [], []>} : vector<8x8xf32>, vector<8x8xf32>, vector<8x8xf32> -> vector<8x8xf32>
    %c1_84 = arith.constant 1 : index
    %c0_85 = arith.constant 0 : index
    %c0_86 = arith.constant 0 : index
    %158 = vector.load %arg7[%c1_84, %c0_85, %c0_86] : memref<4x8x32xf32, #tpu.memory_space<vmem>>, vector<1x8x32xf32>
    %159 = vector.shape_cast %158 : vector<1x8x32xf32> to vector<8x32xf32>
    %cst_87 = arith.constant dense<0.000000e+00> : vector<8x32xf32>
    %160 = tpu.matmul %157, %159, %cst_87 {dimension_numbers = #tpu.dot_dimension_numbers<[1], [0], [0], [1], [0, 0, 1, 1], [], []>} : vector<8x8xf32>, vector<8x32xf32>, vector<8x32xf32> -> vector<8x32xf32>
    %161 = arith.addf %142, %160 : vector<8x32xf32>
    %162 = vector.extract_strided_slice %116 {offsets = [0, 16], sizes = [8, 8], strides = [1, 1]} : vector<8x32xf32> to vector<8x8xf32>
    %163 = vector.extract_strided_slice %119 {offsets = [0, 16], sizes = [8, 8], strides = [1, 1]} : vector<8x32xf32> to vector<8x8xf32>
    %164 = vector.extract_strided_slice %122 {offsets = [0, 16], sizes = [8, 8], strides = [1, 1]} : vector<8x32xf32> to vector<8x8xf32>
    %cst_88 = arith.constant dense<0.000000e+00> : vector<8x8xf32>
    %165 = tpu.matmul %162, %163, %cst_88 {dimension_numbers = #tpu.dot_dimension_numbers<[1], [1], [0], [0], [0, 0, 1, 0], [], []>} : vector<8x8xf32>, vector<8x8xf32>, vector<8x8xf32> -> vector<8x8xf32>
    %cst_89 = arith.constant dense<0xFF800000> : vector<8xf32>
    %166 = vector.multi_reduction <maximumf>, %165, %cst_89 [1] : vector<8x8xf32> to vector<8xf32>
    %167 = vector.shape_cast %166 : vector<8xf32> to vector<8x1xf32>
    %168 = vector.broadcast %167 : vector<8x1xf32> to vector<8x8xf32>
    %169 = arith.subf %165, %168 : vector<8x8xf32>
    %170 = math.exp %169 : vector<8x8xf32>
    %cst_90 = arith.constant dense<0.000000e+00> : vector<8xf32>
    %171 = vector.multi_reduction <add>, %170, %cst_90 [1] : vector<8x8xf32> to vector<8xf32>
    %172 = vector.shape_cast %171 : vector<8xf32> to vector<8x1xf32>
    %173 = tpu.reciprocal %172 {approx = true} : vector<8x1xf32> -> vector<8x1xf32>
    %174 = vector.broadcast %173 : vector<8x1xf32> to vector<8x8xf32>
    %175 = arith.mulf %170, %174 : vector<8x8xf32>
    %cst_91 = arith.constant dense<0.000000e+00> : vector<8x8xf32>
    %176 = tpu.matmul %175, %164, %cst_91 {dimension_numbers = #tpu.dot_dimension_numbers<[1], [0], [0], [1], [0, 0, 1, 1], [], []>} : vector<8x8xf32>, vector<8x8xf32>, vector<8x8xf32> -> vector<8x8xf32>
    %c2_92 = arith.constant 2 : index
    %c0_93 = arith.constant 0 : index
    %c0_94 = arith.constant 0 : index
    %177 = vector.load %arg7[%c2_92, %c0_93, %c0_94] : memref<4x8x32xf32, #tpu.memory_space<vmem>>, vector<1x8x32xf32>
    %178 = vector.shape_cast %177 : vector<1x8x32xf32> to vector<8x32xf32>
    %cst_95 = arith.constant dense<0.000000e+00> : vector<8x32xf32>
    %179 = tpu.matmul %176, %178, %cst_95 {dimension_numbers = #tpu.dot_dimension_numbers<[1], [0], [0], [1], [0, 0, 1, 1], [], []>} : vector<8x8xf32>, vector<8x32xf32>, vector<8x32xf32> -> vector<8x32xf32>
    %180 = arith.addf %161, %179 : vector<8x32xf32>
    %181 = vector.extract_strided_slice %116 {offsets = [0, 24], sizes = [8, 8], strides = [1, 1]} : vector<8x32xf32> to vector<8x8xf32>
    %182 = vector.extract_strided_slice %119 {offsets = [0, 24], sizes = [8, 8], strides = [1, 1]} : vector<8x32xf32> to vector<8x8xf32>
    %183 = vector.extract_strided_slice %122 {offsets = [0, 24], sizes = [8, 8], strides = [1, 1]} : vector<8x32xf32> to vector<8x8xf32>
    %cst_96 = arith.constant dense<0.000000e+00> : vector<8x8xf32>
    %184 = tpu.matmul %181, %182, %cst_96 {dimension_numbers = #tpu.dot_dimension_numbers<[1], [1], [0], [0], [0, 0, 1, 0], [], []>} : vector<8x8xf32>, vector<8x8xf32>, vector<8x8xf32> -> vector<8x8xf32>
    %cst_97 = arith.constant dense<0xFF800000> : vector<8xf32>
    %185 = vector.multi_reduction <maximumf>, %184, %cst_97 [1] : vector<8x8xf32> to vector<8xf32>
    %186 = vector.shape_cast %185 : vector<8xf32> to vector<8x1xf32>
    %187 = vector.broadcast %186 : vector<8x1xf32> to vector<8x8xf32>
    %188 = arith.subf %184, %187 : vector<8x8xf32>
    %189 = math.exp %188 : vector<8x8xf32>
    %cst_98 = arith.constant dense<0.000000e+00> : vector<8xf32>
    %190 = vector.multi_reduction <add>, %189, %cst_98 [1] : vector<8x8xf32> to vector<8xf32>
    %191 = vector.shape_cast %190 : vector<8xf32> to vector<8x1xf32>
    %192 = tpu.reciprocal %191 {approx = true} : vector<8x1xf32> -> vector<8x1xf32>
    %193 = vector.broadcast %192 : vector<8x1xf32> to vector<8x8xf32>
    %194 = arith.mulf %189, %193 : vector<8x8xf32>
    %cst_99 = arith.constant dense<0.000000e+00> : vector<8x8xf32>
    %195 = tpu.matmul %194, %183, %cst_99 {dimension_numbers = #tpu.dot_dimension_numbers<[1], [0], [0], [1], [0, 0, 1, 1], [], []>} : vector<8x8xf32>, vector<8x8xf32>, vector<8x8xf32> -> vector<8x8xf32>
    %c3_100 = arith.constant 3 : index
    %c0_101 = arith.constant 0 : index
    %c0_102 = arith.constant 0 : index
    %196 = vector.load %arg7[%c3_100, %c0_101, %c0_102] : memref<4x8x32xf32, #tpu.memory_space<vmem>>, vector<1x8x32xf32>
    %197 = vector.shape_cast %196 : vector<1x8x32xf32> to vector<8x32xf32>
    %cst_103 = arith.constant dense<0.000000e+00> : vector<8x32xf32>
    %198 = tpu.matmul %195, %197, %cst_103 {dimension_numbers = #tpu.dot_dimension_numbers<[1], [0], [0], [1], [0, 0, 1, 1], [], []>} : vector<8x8xf32>, vector<8x32xf32>, vector<8x32xf32> -> vector<8x32xf32>
    %199 = arith.addf %180, %198 : vector<8x32xf32>
    %200 = vector.broadcast %6 : vector<1x32xf32> to vector<8x32xf32>
    %201 = arith.addf %199, %200 : vector<8x32xf32>
    %c1_104 = arith.constant 1 : index
    %c0_105 = arith.constant 0 : index
    %c0_106 = arith.constant 0 : index
    %202 = vector.load %arg12[%c1_104, %c0_105, %c0_106] : memref<2x8x32xf32, #tpu.memory_space<vmem>>, vector<1x8x32xf32>
    %203 = vector.shape_cast %202 : vector<1x8x32xf32> to vector<8x32xf32>
    %204 = vector.shape_cast %201 : vector<8x32xf32> to vector<1x8x32xf32>
    tpu.vector_store %arg12[%c1_104, %c0_105, %c0_106], %204 {strides = array<i32>} : memref<2x8x32xf32, #tpu.memory_space<vmem>>, vector<1x8x32xf32>,
    return
  }
  func.func @transform_0(%arg0: i32) -> (i32, i32, i32) {
    %c0_i32 = arith.constant 0 : i32
    %c0_i32_0 = arith.constant 0 : i32
    %c0_i32_1 = arith.constant 0 : i32
    return %arg0, %c0_i32, %c0_i32_0 : i32, i32, i32
  }
  func.func @transform_1(%arg0: i32) -> (i32, i32, i32) {
    %c0_i32 = arith.constant 0 : i32
    %c0_i32_0 = arith.constant 0 : i32
    %c0_i32_1 = arith.constant 0 : i32
    return %arg0, %c0_i32, %c0_i32_0 : i32, i32, i32
  }
  func.func @transform_2(%arg0: i32) -> (i32, i32, i32) {
    %c0_i32 = arith.constant 0 : i32
    %c0_i32_0 = arith.constant 0 : i32
    %c0_i32_1 = arith.constant 0 : i32
    return %arg0, %c0_i32, %c0_i32_0 : i32, i32, i32
  }
  func.func @transform_3(%arg0: i32) -> (i32, i32) {
    %c0_i32 = arith.constant 0 : i32
    %c0_i32_0 = arith.constant 0 : i32
    %c0_i32_1 = arith.constant 0 : i32
    return %c0_i32, %c0_i32_0 : i32, i32
  }
  func.func @transform_4(%arg0: i32) -> (i32, i32) {
    %c0_i32 = arith.constant 0 : i32
    %c0_i32_0 = arith.constant 0 : i32
    %c0_i32_1 = arith.constant 0 : i32
    return %c0_i32, %c0_i32_0 : i32, i32
  }
  func.func @transform_5(%arg0: i32) -> (i32, i32) {
    %c0_i32 = arith.constant 0 : i32
    %c0_i32_0 = arith.constant 0 : i32
    %c0_i32_1 = arith.constant 0 : i32
    return %c0_i32, %c0_i32_0 : i32, i32
  }
  func.func @transform_6(%arg0: i32) -> (i32, i32, i32) {
    %c0_i32 = arith.constant 0 : i32
    %c0_i32_0 = arith.constant 0 : i32
    %c0_i32_1 = arith.constant 0 : i32
    %c0_i32_2 = arith.constant 0 : i32
    return %c0_i32, %c0_i32_0, %c0_i32_1 : i32, i32, i32
  }
  func.func @transform_7(%arg0: i32) -> (i32, i32) {
    %c0_i32 = arith.constant 0 : i32
    %c0_i32_0 = arith.constant 0 : i32
    %c0_i32_1 = arith.constant 0 : i32
    return %c0_i32, %c0_i32_0 : i32, i32
  }
  func.func @transform_8(%arg0: i32) -> (i32, i32) {
    %c0_i32 = arith.constant 0 : i32
    %c0_i32_0 = arith.constant 0 : i32
    %c0_i32_1 = arith.constant 0 : i32
    return %c0_i32, %c0_i32_0 : i32, i32
  }
  func.func @transform_9(%arg0: i32) -> (i32, i32) {
    %c0_i32 = arith.constant 0 : i32
    %c0_i32_0 = arith.constant 0 : i32
    %c0_i32_1 = arith.constant 0 : i32
    return %c0_i32, %c0_i32_0 : i32, i32
  }
  func.func @transform_10(%arg0: i32) -> (i32, i32) {
    %c0_i32 = arith.constant 0 : i32
    %c0_i32_0 = arith.constant 0 : i32
    %c0_i32_1 = arith.constant 0 : i32
    return %c0_i32, %c0_i32_0 : i32, i32
  }
  func.func @transform_11(%arg0: i32) -> (i32, i32, i32) {
    %c0_i32 = arith.constant 0 : i32
    %c0_i32_0 = arith.constant 0 : i32
    %c0_i32_1 = arith.constant 0 : i32
    return %arg0, %c0_i32, %c0_i32_0 : i32, i32, i32
  }
}

module attributes {stable_mosaic.version = 11 : i64} {
  func.func @_fused_attention_layer_kernel(%arg0: i32, %arg1: memref<2x8x32xf32, #tpu.memory_space<vmem>>, %arg2: memref<2x8x32xf32, #tpu.memory_space<vmem>>, %arg3: memref<2x8x32xf32, #tpu.memory_space<vmem>>, %arg4: memref<32x32xf32, #tpu.memory_space<vmem>>, %arg5: memref<32x32xf32, #tpu.memory_space<vmem>>, %arg6: memref<32x32xf32, #tpu.memory_space<vmem>>, %arg7: memref<4x8x32xf32, #tpu.memory_space<vmem>>, %arg8: memref<1x32xf32, #tpu.memory_space<vmem>>, %arg9: memref<1x32xf32, #tpu.memory_space<vmem>>, %arg10: memref<1x32xf32, #tpu.memory_space<vmem>>, %arg11: memref<1x32xf32, #tpu.memory_space<vmem>>, %arg12: memref<2x8x32xf32, #tpu.memory_space<vmem>>) attributes {dimension_semantics = [#tpu.dimension_semantics<parallel>], iteration_bounds = array<i64: 1>, scalar_prefetch = 0 : i64, scratch_operands = 0 : i64, tpu.core_type = #tpu.core_type<tc>, window_params = [{transform_indices = @transform_0, window_bounds = array<i64: 2, 8, 32>}, {transform_indices = @transform_1, window_bounds = array<i64: 2, 8, 32>}, {transform_indices = @transform_2, window_bounds = array<i64: 2, 8, 32>}, {pipeline_mode = #tpu.pipeline_mode<synchronous>, transform_indices = @transform_3, window_bounds = array<i64: 32, 32>}, {pipeline_mode = #tpu.pipeline_mode<synchronous>, transform_indices = @transform_4, window_bounds = array<i64: 32, 32>}, {pipeline_mode = #tpu.pipeline_mode<synchronous>, transform_indices = @transform_5, window_bounds = array<i64: 32, 32>}, {pipeline_mode = #tpu.pipeline_mode<synchronous>, transform_indices = @transform_6, window_bounds = array<i64: 4, 8, 32>}, {pipeline_mode = #tpu.pipeline_mode<synchronous>, transform_indices = @transform_7, window_bounds = array<i64: 1, 32>}, {pipeline_mode = #tpu.pipeline_mode<synchronous>, transform_indices = @transform_8, window_bounds = array<i64: 1, 32>}, {pipeline_mode = #tpu.pipeline_mode<synchronous>, transform_indices = @transform_9, window_bounds = array<i64: 1, 32>}, {pipeline_mode = #tpu.pipeline_mode<synchronous>, transform_indices = @transform_10, window_bounds = array<i64: 1, 32>}, {transform_indices = @transform_11, window_bounds = array<i64: 2, 8, 32>}]} {
    %c0 = arith.constant 0 : index
    %c0_0 = arith.constant 0 : index
    %0 = vector.load %arg4[%c0, %c0_0] : memref<32x32xf32, #tpu.memory_space<vmem>>, vector<32x32xf32>
    %c0_1 = arith.constant 0 : index
    %c0_2 = arith.constant 0 : index
    %1 = vector.load %arg5[%c0_1, %c0_2] : memref<32x32xf32, #tpu.memory_space<vmem>>, vector<32x32xf32>
    %c0_3 = arith.constant 0 : index
    %c0_4 = arith.constant 0 : index
    %2 = vector.load %arg6[%c0_3, %c0_4] : memref<32x32xf32, #tpu.memory_space<vmem>>, vector<32x32xf32>
    %c0_5 = arith.constant 0 : index
    %c0_6 = arith.constant 0 : index
    %3 = vector.load %arg8[%c0_5, %c0_6] : memref<1x32xf32, #tpu.memory_space<vmem>>, vector<1x32xf32>
    %c0_7 = arith.constant 0 : index
    %c0_8 = arith.constant 0 : index
    %4 = vector.load %arg9[%c0_7, %c0_8] : memref<1x32xf32, #tpu.memory_space<vmem>>, vector<1x32xf32>
    %c0_9 = arith.constant 0 : index
    %c0_10 = arith.constant 0 : index
    %5 = vector.load %arg10[%c0_9, %c0_10] : memref<1x32xf32, #tpu.memory_space<vmem>>, vector<1x32xf32>
    %c0_11 = arith.constant 0 : index
    %c0_12 = arith.constant 0 : index
    %6 = vector.load %arg11[%c0_11, %c0_12] : memref<1x32xf32, #tpu.memory_space<vmem>>, vector<1x32xf32>
    %c0_13 = arith.constant 0 : index
    %c0_14 = arith.constant 0 : index
    %c0_15 = arith.constant 0 : index
    %7 = vector.load %arg1[%c0_13, %c0_14, %c0_15] : memref<2x8x32xf32, #tpu.memory_space<vmem>>, vector<1x8x32xf32>
    %8 = vector.shape_cast %7 : vector<1x8x32xf32> to vector<8x32xf32>
    %c0_16 = arith.constant 0 : index
    %c0_17 = arith.constant 0 : index
    %c0_18 = arith.constant 0 : index
    %9 = vector.load %arg2[%c0_16, %c0_17, %c0_18] : memref<2x8x32xf32, #tpu.memory_space<vmem>>, vector<1x8x32xf32>
    %10 = vector.shape_cast %9 : vector<1x8x32xf32> to vector<8x32xf32>
    %c0_19 = arith.constant 0 : index
    %c0_20 = arith.constant 0 : index
    %c0_21 = arith.constant 0 : index
    %11 = vector.load %arg3[%c0_19, %c0_20, %c0_21] : memref<2x8x32xf32, #tpu.memory_space<vmem>>, vector<1x8x32xf32>
    %12 = vector.shape_cast %11 : vector<1x8x32xf32> to vector<8x32xf32>
    %cst = arith.constant dense<0.000000e+00> : vector<8x32xf32>
    %13 = tpu.matmul %8, %0, %cst {dimension_numbers = #tpu.dot_dimension_numbers<[1], [0], [0], [1], [0, 0, 1, 1], [], []>} : vector<8x32xf32>, vector<32x32xf32>, vector<8x32xf32> -> vector<8x32xf32>
    %14 = vector.broadcast %3 : vector<1x32xf32> to vector<8x32xf32>
    %15 = arith.addf %13, %14 : vector<8x32xf32>
    %cst_22 = arith.constant 0.353553385 : f32
    %16 = vector.broadcast %cst_22 : f32 to vector<8x32xf32>
    %17 = arith.mulf %15, %16 : vector<8x32xf32>
    %cst_23 = arith.constant dense<0.000000e+00> : vector<8x32xf32>
    %18 = tpu.matmul %10, %1, %cst_23 {dimension_numbers = #tpu.dot_dimension_numbers<[1], [0], [0], [1], [0, 0, 1, 1], [], []>} : vector<8x32xf32>, vector<32x32xf32>, vector<8x32xf32> -> vector<8x32xf32>
    %19 = vector.broadcast %4 : vector<1x32xf32> to vector<8x32xf32>
    %20 = arith.addf %18, %19 : vector<8x32xf32>
    %cst_24 = arith.constant dense<0.000000e+00> : vector<8x32xf32>
    %21 = tpu.matmul %12, %2, %cst_24 {dimension_numbers = #tpu.dot_dimension_numbers<[1], [0], [0], [1], [0, 0, 1, 1], [], []>} : vector<8x32xf32>, vector<32x32xf32>, vector<8x32xf32> -> vector<8x32xf32>
    %22 = vector.broadcast %5 : vector<1x32xf32> to vector<8x32xf32>
    %23 = arith.addf %21, %22 : vector<8x32xf32>
    %cst_25 = arith.constant 0.000000e+00 : f32
    %24 = vector.broadcast %cst_25 : f32 to vector<8x32xf32>
    %25 = vector.extract_strided_slice %17 {offsets = [0, 0], sizes = [8, 8], strides = [1, 1]} : vector<8x32xf32> to vector<8x8xf32>
    %26 = vector.extract_strided_slice %20 {offsets = [0, 0], sizes = [8, 8], strides = [1, 1]} : vector<8x32xf32> to vector<8x8xf32>
    %27 = vector.extract_strided_slice %23 {offsets = [0, 0], sizes = [8, 8], strides = [1, 1]} : vector<8x32xf32> to vector<8x8xf32>
    %cst_26 = arith.constant dense<0.000000e+00> : vector<8x8xf32>
    %28 = tpu.matmul %25, %26, %cst_26 {dimension_numbers = #tpu.dot_dimension_numbers<[1], [1], [0], [0], [0, 0, 1, 0], [], []>} : vector<8x8xf32>, vector<8x8xf32>, vector<8x8xf32> -> vector<8x8xf32>
    %cst_27 = arith.constant dense<0xFF800000> : vector<8xf32>
    %29 = vector.multi_reduction <maximumf>, %28, %cst_27 [1] : vector<8x8xf32> to vector<8xf32>
    %30 = vector.shape_cast %29 : vector<8xf32> to vector<8x1xf32>
    %31 = vector.broadcast %30 : vector<8x1xf32> to vector<8x8xf32>
    %32 = arith.subf %28, %31 : vector<8x8xf32>
    %33 = math.exp %32 : vector<8x8xf32>
    %cst_28 = arith.constant dense<0.000000e+00> : vector<8xf32>
    %34 = vector.multi_reduction <add>, %33, %cst_28 [1] : vector<8x8xf32> to vector<8xf32>
    %35 = vector.shape_cast %34 : vector<8xf32> to vector<8x1xf32>
    %36 = tpu.reciprocal %35 {approx = true} : vector<8x1xf32> -> vector<8x1xf32>
    %37 = vector.broadcast %36 : vector<8x1xf32> to vector<8x8xf32>
    %38 = arith.mulf %33, %37 : vector<8x8xf32>
    %cst_29 = arith.constant dense<0.000000e+00> : vector<8x8xf32>
    %39 = tpu.matmul %38, %27, %cst_29 {dimension_numbers = #tpu.dot_dimension_numbers<[1], [0], [0], [1], [0, 0, 1, 1], [], []>} : vector<8x8xf32>, vector<8x8xf32>, vector<8x8xf32> -> vector<8x8xf32>
    %c0_30 = arith.constant 0 : index
    %c0_31 = arith.constant 0 : index
    %c0_32 = arith.constant 0 : index
    %40 = vector.load %arg7[%c0_30, %c0_31, %c0_32] : memref<4x8x32xf32, #tpu.memory_space<vmem>>, vector<1x8x32xf32>
    %41 = vector.shape_cast %40 : vector<1x8x32xf32> to vector<8x32xf32>
    %cst_33 = arith.constant dense<0.000000e+00> : vector<8x32xf32>
    %42 = tpu.matmul %39, %41, %cst_33 {dimension_numbers = #tpu.dot_dimension_numbers<[1], [0], [0], [1], [0, 0, 1, 1], [], []>} : vector<8x8xf32>, vector<8x32xf32>, vector<8x32xf32> -> vector<8x32xf32>
    %43 = arith.addf %24, %42 : vector<8x32xf32>
    %44 = vector.extract_strided_slice %17 {offsets = [0, 8], sizes = [8, 8], strides = [1, 1]} : vector<8x32xf32> to vector<8x8xf32>
    %45 = vector.extract_strided_slice %20 {offsets = [0, 8], sizes = [8, 8], strides = [1, 1]} : vector<8x32xf32> to vector<8x8xf32>
    %46 = vector.extract_strided_slice %23 {offsets = [0, 8], sizes = [8, 8], strides = [1, 1]} : vector<8x32xf32> to vector<8x8xf32>
    %cst_34 = arith.constant dense<0.000000e+00> : vector<8x8xf32>
    %47 = tpu.matmul %44, %45, %cst_34 {dimension_numbers = #tpu.dot_dimension_numbers<[1], [1], [0], [0], [0, 0, 1, 0], [], []>} : vector<8x8xf32>, vector<8x8xf32>, vector<8x8xf32> -> vector<8x8xf32>
    %cst_35 = arith.constant dense<0xFF800000> : vector<8xf32>
    %48 = vector.multi_reduction <maximumf>, %47, %cst_35 [1] : vector<8x8xf32> to vector<8xf32>
    %49 = vector.shape_cast %48 : vector<8xf32> to vector<8x1xf32>
    %50 = vector.broadcast %49 : vector<8x1xf32> to vector<8x8xf32>
    %51 = arith.subf %47, %50 : vector<8x8xf32>
    %52 = math.exp %51 : vector<8x8xf32>
    %cst_36 = arith.constant dense<0.000000e+00> : vector<8xf32>
    %53 = vector.multi_reduction <add>, %52, %cst_36 [1] : vector<8x8xf32> to vector<8xf32>
    %54 = vector.shape_cast %53 : vector<8xf32> to vector<8x1xf32>
    %55 = tpu.reciprocal %54 {approx = true} : vector<8x1xf32> -> vector<8x1xf32>
    %56 = vector.broadcast %55 : vector<8x1xf32> to vector<8x8xf32>
    %57 = arith.mulf %52, %56 : vector<8x8xf32>
    %cst_37 = arith.constant dense<0.000000e+00> : vector<8x8xf32>
    %58 = tpu.matmul %57, %46, %cst_37 {dimension_numbers = #tpu.dot_dimension_numbers<[1], [0], [0], [1], [0, 0, 1, 1], [], []>} : vector<8x8xf32>, vector<8x8xf32>, vector<8x8xf32> -> vector<8x8xf32>
    %c1 = arith.constant 1 : index
    %c0_38 = arith.constant 0 : index
    %c0_39 = arith.constant 0 : index
    %59 = vector.load %arg7[%c1, %c0_38, %c0_39] : memref<4x8x32xf32, #tpu.memory_space<vmem>>, vector<1x8x32xf32>
    %60 = vector.shape_cast %59 : vector<1x8x32xf32> to vector<8x32xf32>
    %cst_40 = arith.constant dense<0.000000e+00> : vector<8x32xf32>
    %61 = tpu.matmul %58, %60, %cst_40 {dimension_numbers = #tpu.dot_dimension_numbers<[1], [0], [0], [1], [0, 0, 1, 1], [], []>} : vector<8x8xf32>, vector<8x32xf32>, vector<8x32xf32> -> vector<8x32xf32>
    %62 = arith.addf %43, %61 : vector<8x32xf32>
    %63 = vector.extract_strided_slice %17 {offsets = [0, 16], sizes = [8, 8], strides = [1, 1]} : vector<8x32xf32> to vector<8x8xf32>
    %64 = vector.extract_strided_slice %20 {offsets = [0, 16], sizes = [8, 8], strides = [1, 1]} : vector<8x32xf32> to vector<8x8xf32>
    %65 = vector.extract_strided_slice %23 {offsets = [0, 16], sizes = [8, 8], strides = [1, 1]} : vector<8x32xf32> to vector<8x8xf32>
    %cst_41 = arith.constant dense<0.000000e+00> : vector<8x8xf32>
    %66 = tpu.matmul %63, %64, %cst_41 {dimension_numbers = #tpu.dot_dimension_numbers<[1], [1], [0], [0], [0, 0, 1, 0], [], []>} : vector<8x8xf32>, vector<8x8xf32>, vector<8x8xf32> -> vector<8x8xf32>
    %cst_42 = arith.constant dense<0xFF800000> : vector<8xf32>
    %67 = vector.multi_reduction <maximumf>, %66, %cst_42 [1] : vector<8x8xf32> to vector<8xf32>
    %68 = vector.shape_cast %67 : vector<8xf32> to vector<8x1xf32>
    %69 = vector.broadcast %68 : vector<8x1xf32> to vector<8x8xf32>
    %70 = arith.subf %66, %69 : vector<8x8xf32>
    %71 = math.exp %70 : vector<8x8xf32>
    %cst_43 = arith.constant dense<0.000000e+00> : vector<8xf32>
    %72 = vector.multi_reduction <add>, %71, %cst_43 [1] : vector<8x8xf32> to vector<8xf32>
    %73 = vector.shape_cast %72 : vector<8xf32> to vector<8x1xf32>
    %74 = tpu.reciprocal %73 {approx = true} : vector<8x1xf32> -> vector<8x1xf32>
    %75 = vector.broadcast %74 : vector<8x1xf32> to vector<8x8xf32>
    %76 = arith.mulf %71, %75 : vector<8x8xf32>
    %cst_44 = arith.constant dense<0.000000e+00> : vector<8x8xf32>
    %77 = tpu.matmul %76, %65, %cst_44 {dimension_numbers = #tpu.dot_dimension_numbers<[1], [0], [0], [1], [0, 0, 1, 1], [], []>} : vector<8x8xf32>, vector<8x8xf32>, vector<8x8xf32> -> vector<8x8xf32>
    %c2 = arith.constant 2 : index
    %c0_45 = arith.constant 0 : index
    %c0_46 = arith.constant 0 : index
    %78 = vector.load %arg7[%c2, %c0_45, %c0_46] : memref<4x8x32xf32, #tpu.memory_space<vmem>>, vector<1x8x32xf32>
    %79 = vector.shape_cast %78 : vector<1x8x32xf32> to vector<8x32xf32>
    %cst_47 = arith.constant dense<0.000000e+00> : vector<8x32xf32>
    %80 = tpu.matmul %77, %79, %cst_47 {dimension_numbers = #tpu.dot_dimension_numbers<[1], [0], [0], [1], [0, 0, 1, 1], [], []>} : vector<8x8xf32>, vector<8x32xf32>, vector<8x32xf32> -> vector<8x32xf32>
    %81 = arith.addf %62, %80 : vector<8x32xf32>
    %82 = vector.extract_strided_slice %17 {offsets = [0, 24], sizes = [8, 8], strides = [1, 1]} : vector<8x32xf32> to vector<8x8xf32>
    %83 = vector.extract_strided_slice %20 {offsets = [0, 24], sizes = [8, 8], strides = [1, 1]} : vector<8x32xf32> to vector<8x8xf32>
    %84 = vector.extract_strided_slice %23 {offsets = [0, 24], sizes = [8, 8], strides = [1, 1]} : vector<8x32xf32> to vector<8x8xf32>
    %cst_48 = arith.constant dense<0.000000e+00> : vector<8x8xf32>
    %85 = tpu.matmul %82, %83, %cst_48 {dimension_numbers = #tpu.dot_dimension_numbers<[1], [1], [0], [0], [0, 0, 1, 0], [], []>} : vector<8x8xf32>, vector<8x8xf32>, vector<8x8xf32> -> vector<8x8xf32>
    %cst_49 = arith.constant dense<0xFF800000> : vector<8xf32>
    %86 = vector.multi_reduction <maximumf>, %85, %cst_49 [1] : vector<8x8xf32> to vector<8xf32>
    %87 = vector.shape_cast %86 : vector<8xf32> to vector<8x1xf32>
    %88 = vector.broadcast %87 : vector<8x1xf32> to vector<8x8xf32>
    %89 = arith.subf %85, %88 : vector<8x8xf32>
    %90 = math.exp %89 : vector<8x8xf32>
    %cst_50 = arith.constant dense<0.000000e+00> : vector<8xf32>
    %91 = vector.multi_reduction <add>, %90, %cst_50 [1] : vector<8x8xf32> to vector<8xf32>
    %92 = vector.shape_cast %91 : vector<8xf32> to vector<8x1xf32>
    %93 = tpu.reciprocal %92 {approx = true} : vector<8x1xf32> -> vector<8x1xf32>
    %94 = vector.broadcast %93 : vector<8x1xf32> to vector<8x8xf32>
    %95 = arith.mulf %90, %94 : vector<8x8xf32>
    %cst_51 = arith.constant dense<0.000000e+00> : vector<8x8xf32>
    %96 = tpu.matmul %95, %84, %cst_51 {dimension_numbers = #tpu.dot_dimension_numbers<[1], [0], [0], [1], [0, 0, 1, 1], [], []>} : vector<8x8xf32>, vector<8x8xf32>, vector<8x8xf32> -> vector<8x8xf32>
    %c3 = arith.constant 3 : index
    %c0_52 = arith.constant 0 : index
    %c0_53 = arith.constant 0 : index
    %97 = vector.load %arg7[%c3, %c0_52, %c0_53] : memref<4x8x32xf32, #tpu.memory_space<vmem>>, vector<1x8x32xf32>
    %98 = vector.shape_cast %97 : vector<1x8x32xf32> to vector<8x32xf32>
    %cst_54 = arith.constant dense<0.000000e+00> : vector<8x32xf32>
    %99 = tpu.matmul %96, %98, %cst_54 {dimension_numbers = #tpu.dot_dimension_numbers<[1], [0], [0], [1], [0, 0, 1, 1], [], []>} : vector<8x8xf32>, vector<8x32xf32>, vector<8x32xf32> -> vector<8x32xf32>
    %100 = arith.addf %81, %99 : vector<8x32xf32>
    %101 = vector.broadcast %6 : vector<1x32xf32> to vector<8x32xf32>
    %102 = arith.addf %100, %101 : vector<8x32xf32>
    %c0_55 = arith.constant 0 : index
    %c0_56 = arith.constant 0 : index
    %c0_57 = arith.constant 0 : index
    %103 = vector.load %arg12[%c0_55, %c0_56, %c0_57] : memref<2x8x32xf32, #tpu.memory_space<vmem>>, vector<1x8x32xf32>
    %104 = vector.shape_cast %103 : vector<1x8x32xf32> to vector<8x32xf32>
    %105 = vector.shape_cast %102 : vector<8x32xf32> to vector<1x8x32xf32>
    tpu.vector_store %arg12[%c0_55, %c0_56, %c0_57], %105 {strides = array<i32>} : memref<2x8x32xf32, #tpu.memory_space<vmem>>, vector<1x8x32xf32>,
    %c1_58 = arith.constant 1 : index
    %c0_59 = arith.constant 0 : index
    %c0_60 = arith.constant 0 : index
    %106 = vector.load %arg1[%c1_58, %c0_59, %c0_60] : memref<2x8x32xf32, #tpu.memory_space<vmem>>, vector<1x8x32xf32>
    %107 = vector.shape_cast %106 : vector<1x8x32xf32> to vector<8x32xf32>
    %c1_61 = arith.constant 1 : index
    %c0_62 = arith.constant 0 : index
    %c0_63 = arith.constant 0 : index
    %108 = vector.load %arg2[%c1_61, %c0_62, %c0_63] : memref<2x8x32xf32, #tpu.memory_space<vmem>>, vector<1x8x32xf32>
    %109 = vector.shape_cast %108 : vector<1x8x32xf32> to vector<8x32xf32>
    %c1_64 = arith.constant 1 : index
    %c0_65 = arith.constant 0 : index
    %c0_66 = arith.constant 0 : index
    %110 = vector.load %arg3[%c1_64, %c0_65, %c0_66] : memref<2x8x32xf32, #tpu.memory_space<vmem>>, vector<1x8x32xf32>
    %111 = vector.shape_cast %110 : vector<1x8x32xf32> to vector<8x32xf32>
    %cst_67 = arith.constant dense<0.000000e+00> : vector<8x32xf32>
    %112 = tpu.matmul %107, %0, %cst_67 {dimension_numbers = #tpu.dot_dimension_numbers<[1], [0], [0], [1], [0, 0, 1, 1], [], []>} : vector<8x32xf32>, vector<32x32xf32>, vector<8x32xf32> -> vector<8x32xf32>
    %113 = vector.broadcast %3 : vector<1x32xf32> to vector<8x32xf32>
    %114 = arith.addf %112, %113 : vector<8x32xf32>
    %cst_68 = arith.constant 0.353553385 : f32
    %115 = vector.broadcast %cst_68 : f32 to vector<8x32xf32>
    %116 = arith.mulf %114, %115 : vector<8x32xf32>
    %cst_69 = arith.constant dense<0.000000e+00> : vector<8x32xf32>
    %117 = tpu.matmul %109, %1, %cst_69 {dimension_numbers = #tpu.dot_dimension_numbers<[1], [0], [0], [1], [0, 0, 1, 1], [], []>} : vector<8x32xf32>, vector<32x32xf32>, vector<8x32xf32> -> vector<8x32xf32>
    %118 = vector.broadcast %4 : vector<1x32xf32> to vector<8x32xf32>
    %119 = arith.addf %117, %118 : vector<8x32xf32>
    %cst_70 = arith.constant dense<0.000000e+00> : vector<8x32xf32>
    %120 = tpu.matmul %111, %2, %cst_70 {dimension_numbers = #tpu.dot_dimension_numbers<[1], [0], [0], [1], [0, 0, 1, 1], [], []>} : vector<8x32xf32>, vector<32x32xf32>, vector<8x32xf32> -> vector<8x32xf32>
    %121 = vector.broadcast %5 : vector<1x32xf32> to vector<8x32xf32>
    %122 = arith.addf %120, %121 : vector<8x32xf32>
    %cst_71 = arith.constant 0.000000e+00 : f32
    %123 = vector.broadcast %cst_71 : f32 to vector<8x32xf32>
    %124 = vector.extract_strided_slice %116 {offsets = [0, 0], sizes = [8, 8], strides = [1, 1]} : vector<8x32xf32> to vector<8x8xf32>
    %125 = vector.extract_strided_slice %119 {offsets = [0, 0], sizes = [8, 8], strides = [1, 1]} : vector<8x32xf32> to vector<8x8xf32>
    %126 = vector.extract_strided_slice %122 {offsets = [0, 0], sizes = [8, 8], strides = [1, 1]} : vector<8x32xf32> to vector<8x8xf32>
    %cst_72 = arith.constant dense<0.000000e+00> : vector<8x8xf32>
    %127 = tpu.matmul %124, %125, %cst_72 {dimension_numbers = #tpu.dot_dimension_numbers<[1], [1], [0], [0], [0, 0, 1, 0], [], []>} : vector<8x8xf32>, vector<8x8xf32>, vector<8x8xf32> -> vector<8x8xf32>
    %cst_73 = arith.constant dense<0xFF800000> : vector<8xf32>
    %128 = vector.multi_reduction <maximumf>, %127, %cst_73 [1] : vector<8x8xf32> to vector<8xf32>
    %129 = vector.shape_cast %128 : vector<8xf32> to vector<8x1xf32>
    %130 = vector.broadcast %129 : vector<8x1xf32> to vector<8x8xf32>
    %131 = arith.subf %127, %130 : vector<8x8xf32>
    %132 = math.exp %131 : vector<8x8xf32>
    %cst_74 = arith.constant dense<0.000000e+00> : vector<8xf32>
    %133 = vector.multi_reduction <add>, %132, %cst_74 [1] : vector<8x8xf32> to vector<8xf32>
    %134 = vector.shape_cast %133 : vector<8xf32> to vector<8x1xf32>
    %135 = tpu.reciprocal %134 {approx = true} : vector<8x1xf32> -> vector<8x1xf32>
    %136 = vector.broadcast %135 : vector<8x1xf32> to vector<8x8xf32>
    %137 = arith.mulf %132, %136 : vector<8x8xf32>
    %cst_75 = arith.constant dense<0.000000e+00> : vector<8x8xf32>
    %138 = tpu.matmul %137, %126, %cst_75 {dimension_numbers = #tpu.dot_dimension_numbers<[1], [0], [0], [1], [0, 0, 1, 1], [], []>} : vector<8x8xf32>, vector<8x8xf32>, vector<8x8xf32> -> vector<8x8xf32>
    %c0_76 = arith.constant 0 : index
    %c0_77 = arith.constant 0 : index
    %c0_78 = arith.constant 0 : index
    %139 = vector.load %arg7[%c0_76, %c0_77, %c0_78] : memref<4x8x32xf32, #tpu.memory_space<vmem>>, vector<1x8x32xf32>
    %140 = vector.shape_cast %139 : vector<1x8x32xf32> to vector<8x32xf32>
    %cst_79 = arith.constant dense<0.000000e+00> : vector<8x32xf32>
    %141 = tpu.matmul %138, %140, %cst_79 {dimension_numbers = #tpu.dot_dimension_numbers<[1], [0], [0], [1], [0, 0, 1, 1], [], []>} : vector<8x8xf32>, vector<8x32xf32>, vector<8x32xf32> -> vector<8x32xf32>
    %142 = arith.addf %123, %141 : vector<8x32xf32>
    %143 = vector.extract_strided_slice %116 {offsets = [0, 8], sizes = [8, 8], strides = [1, 1]} : vector<8x32xf32> to vector<8x8xf32>
    %144 = vector.extract_strided_slice %119 {offsets = [0, 8], sizes = [8, 8], strides = [1, 1]} : vector<8x32xf32> to vector<8x8xf32>
    %145 = vector.extract_strided_slice %122 {offsets = [0, 8], sizes = [8, 8], strides = [1, 1]} : vector<8x32xf32> to vector<8x8xf32>
    %cst_80 = arith.constant dense<0.000000e+00> : vector<8x8xf32>
    %146 = tpu.matmul %143, %144, %cst_80 {dimension_numbers = #tpu.dot_dimension_numbers<[1], [1], [0], [0], [0, 0, 1, 0], [], []>} : vector<8x8xf32>, vector<8x8xf32>, vector<8x8xf32> -> vector<8x8xf32>
    %cst_81 = arith.constant dense<0xFF800000> : vector<8xf32>
    %147 = vector.multi_reduction <maximumf>, %146, %cst_81 [1] : vector<8x8xf32> to vector<8xf32>
    %148 = vector.shape_cast %147 : vector<8xf32> to vector<8x1xf32>
    %149 = vector.broadcast %148 : vector<8x1xf32> to vector<8x8xf32>
    %150 = arith.subf %146, %149 : vector<8x8xf32>
    %151 = math.exp %150 : vector<8x8xf32>
    %cst_82 = arith.constant dense<0.000000e+00> : vector<8xf32>
    %152 = vector.multi_reduction <add>, %151, %cst_82 [1] : vector<8x8xf32> to vector<8xf32>
    %153 = vector.shape_cast %152 : vector<8xf32> to vector<8x1xf32>
    %154 = tpu.reciprocal %153 {approx = true} : vector<8x1xf32> -> vector<8x1xf32>
    %155 = vector.broadcast %154 : vector<8x1xf32> to vector<8x8xf32>
    %156 = arith.mulf %151, %155 : vector<8x8xf32>
    %cst_83 = arith.constant dense<0.000000e+00> : vector<8x8xf32>
    %157 = tpu.matmul %156, %145, %cst_83 {dimension_numbers = #tpu.dot_dimension_numbers<[1], [0], [0], [1], [0, 0, 1, 1], [], []>} : vector<8x8xf32>, vector<8x8xf32>, vector<8x8xf32> -> vector<8x8xf32>
    %c1_84 = arith.constant 1 : index
    %c0_85 = arith.constant 0 : index
    %c0_86 = arith.constant 0 : index
    %158 = vector.load %arg7[%c1_84, %c0_85, %c0_86] : memref<4x8x32xf32, #tpu.memory_space<vmem>>, vector<1x8x32xf32>
    %159 = vector.shape_cast %158 : vector<1x8x32xf32> to vector<8x32xf32>
    %cst_87 = arith.constant dense<0.000000e+00> : vector<8x32xf32>
    %160 = tpu.matmul %157, %159, %cst_87 {dimension_numbers = #tpu.dot_dimension_numbers<[1], [0], [0], [1], [0, 0, 1, 1], [], []>} : vector<8x8xf32>, vector<8x32xf32>, vector<8x32xf32> -> vector<8x32xf32>
    %161 = arith.addf %142, %160 : vector<8x32xf32>
    %162 = vector.extract_strided_slice %116 {offsets = [0, 16], sizes = [8, 8], strides = [1, 1]} : vector<8x32xf32> to vector<8x8xf32>
    %163 = vector.extract_strided_slice %119 {offsets = [0, 16], sizes = [8, 8], strides = [1, 1]} : vector<8x32xf32> to vector<8x8xf32>
    %164 = vector.extract_strided_slice %122 {offsets = [0, 16], sizes = [8, 8], strides = [1, 1]} : vector<8x32xf32> to vector<8x8xf32>
    %cst_88 = arith.constant dense<0.000000e+00> : vector<8x8xf32>
    %165 = tpu.matmul %162, %163, %cst_88 {dimension_numbers = #tpu.dot_dimension_numbers<[1], [1], [0], [0], [0, 0, 1, 0], [], []>} : vector<8x8xf32>, vector<8x8xf32>, vector<8x8xf32> -> vector<8x8xf32>
    %cst_89 = arith.constant dense<0xFF800000> : vector<8xf32>
    %166 = vector.multi_reduction <maximumf>, %165, %cst_89 [1] : vector<8x8xf32> to vector<8xf32>
    %167 = vector.shape_cast %166 : vector<8xf32> to vector<8x1xf32>
    %168 = vector.broadcast %167 : vector<8x1xf32> to vector<8x8xf32>
    %169 = arith.subf %165, %168 : vector<8x8xf32>
    %170 = math.exp %169 : vector<8x8xf32>
    %cst_90 = arith.constant dense<0.000000e+00> : vector<8xf32>
    %171 = vector.multi_reduction <add>, %170, %cst_90 [1] : vector<8x8xf32> to vector<8xf32>
    %172 = vector.shape_cast %171 : vector<8xf32> to vector<8x1xf32>
    %173 = tpu.reciprocal %172 {approx = true} : vector<8x1xf32> -> vector<8x1xf32>
    %174 = vector.broadcast %173 : vector<8x1xf32> to vector<8x8xf32>
    %175 = arith.mulf %170, %174 : vector<8x8xf32>
    %cst_91 = arith.constant dense<0.000000e+00> : vector<8x8xf32>
    %176 = tpu.matmul %175, %164, %cst_91 {dimension_numbers = #tpu.dot_dimension_numbers<[1], [0], [0], [1], [0, 0, 1, 1], [], []>} : vector<8x8xf32>, vector<8x8xf32>, vector<8x8xf32> -> vector<8x8xf32>
    %c2_92 = arith.constant 2 : index
    %c0_93 = arith.constant 0 : index
    %c0_94 = arith.constant 0 : index
    %177 = vector.load %arg7[%c2_92, %c0_93, %c0_94] : memref<4x8x32xf32, #tpu.memory_space<vmem>>, vector<1x8x32xf32>
    %178 = vector.shape_cast %177 : vector<1x8x32xf32> to vector<8x32xf32>
    %cst_95 = arith.constant dense<0.000000e+00> : vector<8x32xf32>
    %179 = tpu.matmul %176, %178, %cst_95 {dimension_numbers = #tpu.dot_dimension_numbers<[1], [0], [0], [1], [0, 0, 1, 1], [], []>} : vector<8x8xf32>, vector<8x32xf32>, vector<8x32xf32> -> vector<8x32xf32>
    %180 = arith.addf %161, %179 : vector<8x32xf32>
    %181 = vector.extract_strided_slice %116 {offsets = [0, 24], sizes = [8, 8], strides = [1, 1]} : vector<8x32xf32> to vector<8x8xf32>
    %182 = vector.extract_strided_slice %119 {offsets = [0, 24], sizes = [8, 8], strides = [1, 1]} : vector<8x32xf32> to vector<8x8xf32>
    %183 = vector.extract_strided_slice %122 {offsets = [0, 24], sizes = [8, 8], strides = [1, 1]} : vector<8x32xf32> to vector<8x8xf32>
    %cst_96 = arith.constant dense<0.000000e+00> : vector<8x8xf32>
    %184 = tpu.matmul %181, %182, %cst_96 {dimension_numbers = #tpu.dot_dimension_numbers<[1], [1], [0], [0], [0, 0, 1, 0], [], []>} : vector<8x8xf32>, vector<8x8xf32>, vector<8x8xf32> -> vector<8x8xf32>
    %cst_97 = arith.constant dense<0xFF800000> : vector<8xf32>
    %185 = vector.multi_reduction <maximumf>, %184, %cst_97 [1] : vector<8x8xf32> to vector<8xf32>
    %186 = vector.shape_cast %185 : vector<8xf32> to vector<8x1xf32>
    %187 = vector.broadcast %186 : vector<8x1xf32> to vector<8x8xf32>
    %188 = arith.subf %184, %187 : vector<8x8xf32>
    %189 = math.exp %188 : vector<8x8xf32>
    %cst_98 = arith.constant dense<0.000000e+00> : vector<8xf32>
    %190 = vector.multi_reduction <add>, %189, %cst_98 [1] : vector<8x8xf32> to vector<8xf32>
    %191 = vector.shape_cast %190 : vector<8xf32> to vector<8x1xf32>
    %192 = tpu.reciprocal %191 {approx = true} : vector<8x1xf32> -> vector<8x1xf32>
    %193 = vector.broadcast %192 : vector<8x1xf32> to vector<8x8xf32>
    %194 = arith.mulf %189, %193 : vector<8x8xf32>
    %cst_99 = arith.constant dense<0.000000e+00> : vector<8x8xf32>
    %195 = tpu.matmul %194, %183, %cst_99 {dimension_numbers = #tpu.dot_dimension_numbers<[1], [0], [0], [1], [0, 0, 1, 1], [], []>} : vector<8x8xf32>, vector<8x8xf32>, vector<8x8xf32> -> vector<8x8xf32>
    %c3_100 = arith.constant 3 : index
    %c0_101 = arith.constant 0 : index
    %c0_102 = arith.constant 0 : index
    %196 = vector.load %arg7[%c3_100, %c0_101, %c0_102] : memref<4x8x32xf32, #tpu.memory_space<vmem>>, vector<1x8x32xf32>
    %197 = vector.shape_cast %196 : vector<1x8x32xf32> to vector<8x32xf32>
    %cst_103 = arith.constant dense<0.000000e+00> : vector<8x32xf32>
    %198 = tpu.matmul %195, %197, %cst_103 {dimension_numbers = #tpu.dot_dimension_numbers<[1], [0], [0], [1], [0, 0, 1, 1], [], []>} : vector<8x8xf32>, vector<8x32xf32>, vector<8x32xf32> -> vector<8x32xf32>
    %199 = arith.addf %180, %198 : vector<8x32xf32>
    %200 = vector.broadcast %6 : vector<1x32xf32> to vector<8x32xf32>
    %201 = arith.addf %199, %200 : vector<8x32xf32>
    %c1_104 = arith.constant 1 : index
    %c0_105 = arith.constant 0 : index
    %c0_106 = arith.constant 0 : index
    %202 = vector.load %arg12[%c1_104, %c0_105, %c0_106] : memref<2x8x32xf32, #tpu.memory_space<vmem>>, vector<1x8x32xf32>
    %203 = vector.shape_cast %202 : vector<1x8x32xf32> to vector<8x32xf32>
    %204 = vector.shape_cast %201 : vector<8x32xf32> to vector<1x8x32xf32>
    tpu.vector_store %arg12[%c1_104, %c0_105, %c0_106], %204 {strides = array<i32>} : memref<2x8x32xf32, #tpu.memory_space<vmem>>, vector<1x8x32xf32>,
    return
  }
  func.func @transform_0(%arg0: i32) -> (i32, i32, i32) {
    %c0_i32 = arith.constant 0 : i32
    %c0_i32_0 = arith.constant 0 : i32
    %c0_i32_1 = arith.constant 0 : i32
    return %arg0, %c0_i32, %c0_i32_0 : i32, i32, i32
  }
  func.func @transform_1(%arg0: i32) -> (i32, i32, i32) {
    %c0_i32 = arith.constant 0 : i32
    %c0_i32_0 = arith.constant 0 : i32
    %c0_i32_1 = arith.constant 0 : i32
    return %arg0, %c0_i32, %c0_i32_0 : i32, i32, i32
  }
  func.func @transform_2(%arg0: i32) -> (i32, i32, i32) {
    %c0_i32 = arith.constant 0 : i32
    %c0_i32_0 = arith.constant 0 : i32
    %c0_i32_1 = arith.constant 0 : i32
    return %arg0, %c0_i32, %c0_i32_0 : i32, i32, i32
  }
  func.func @transform_3(%arg0: i32) -> (i32, i32) {
    %c0_i32 = arith.constant 0 : i32
    %c0_i32_0 = arith.constant 0 : i32
    %c0_i32_1 = arith.constant 0 : i32
    return %c0_i32, %c0_i32_0 : i32, i32
  }
  func.func @transform_4(%arg0: i32) -> (i32, i32) {
    %c0_i32 = arith.constant 0 : i32
    %c0_i32_0 = arith.constant 0 : i32
    %c0_i32_1 = arith.constant 0 : i32
    return %c0_i32, %c0_i32_0 : i32, i32
  }
  func.func @transform_5(%arg0: i32) -> (i32, i32) {
    %c0_i32 = arith.constant 0 : i32
    %c0_i32_0 = arith.constant 0 : i32
    %c0_i32_1 = arith.constant 0 : i32
    return %c0_i32, %c0_i32_0 : i32, i32
  }
  func.func @transform_6(%arg0: i32) -> (i32, i32, i32) {
    %c0_i32 = arith.constant 0 : i32
    %c0_i32_0 = arith.constant 0 : i32
    %c0_i32_1 = arith.constant 0 : i32
    %c0_i32_2 = arith.constant 0 : i32
    return %c0_i32, %c0_i32_0, %c0_i32_1 : i32, i32, i32
  }
  func.func @transform_7(%arg0: i32) -> (i32, i32) {
    %c0_i32 = arith.constant 0 : i32
    %c0_i32_0 = arith.constant 0 : i32
    %c0_i32_1 = arith.constant 0 : i32
    return %c0_i32, %c0_i32_0 : i32, i32
  }
  func.func @transform_8(%arg0: i32) -> (i32, i32) {
    %c0_i32 = arith.constant 0 : i32
    %c0_i32_0 = arith.constant 0 : i32
    %c0_i32_1 = arith.constant 0 : i32
    return %c0_i32, %c0_i32_0 : i32, i32
  }
  func.func @transform_9(%arg0: i32) -> (i32, i32) {
    %c0_i32 = arith.constant 0 : i32
    %c0_i32_0 = arith.constant 0 : i32
    %c0_i32_1 = arith.constant 0 : i32
    return %c0_i32, %c0_i32_0 : i32, i32
  }
  func.func @transform_10(%arg0: i32) -> (i32, i32) {
    %c0_i32 = arith.constant 0 : i32
    %c0_i32_0 = arith.constant 0 : i32
    %c0_i32_1 = arith.constant 0 : i32
    return %c0_i32, %c0_i32_0 : i32, i32
  }
  func.func @transform_11(%arg0: i32) -> (i32, i32, i32) {
    %c0_i32 = arith.constant 0 : i32
    %c0_i32_0 = arith.constant 0 : i32
    %c0_i32_1 = arith.constant 0 : i32
    return %arg0, %c0_i32, %c0_i32_0 : i32, i32, i32
  }
}

</mosaic_0001>

<bundles_post_ra>
// kernel: tpu_custom_call.1
= control target key start
LH: loop header
LB: loop body
LE: loop exit
PB: predicated region body
PF: predicated region fallthrough
CT: control target
= control target key end

     0   :  { %16 = vsyncpa [#allocation3], 0  ;;  %s3622_s0 = inlined_call_operand.hbm [shape: f32[2,8,32], index: 0, kind: input, shape index: {}]   ;;  %s3623_s1 = inlined_call_operand.hbm [shape: f32[2,8,32], index: 1, kind: input, shape index: {}]   ;;  %s3624_s2 = inlined_call_operand.hbm [shape: f32[2,8,32], index: 2, kind: input, shape index: {}]   ;;  %s3625_s3 = inlined_call_operand.hbm [shape: f32[32,32], index: 3, kind: input, shape index: {}]   ;;  %s3626_s4 = inlined_call_operand.hbm [shape: f32[32,32], index: 4, kind: input, shape index: {}]   ;;  %s3627_s5 = inlined_call_operand.hbm [shape: f32[32,32], index: 5, kind: input, shape index: {}]   ;;  %s3628_s6 = inlined_call_operand.hbm [shape: f32[4,8,32], index: 6, kind: input, shape index: {}]   ;;  %s3629_s7 = inlined_call_operand.vmem [shape: f32[1,32], index: 7, kind: input, shape index: {}]   ;;  %s3630_s8 = inlined_call_operand.vmem [shape: f32[1,32], index: 8, kind: input, shape index: {}]   ;;  %s3631_s9 = inlined_call_operand.vmem [shape: f32[1,32], index: 9, kind: input, shape index: {}]   ;;  %s3632_s10 = inlined_call_operand.vmem [shape: f32[1,32], index: 10, kind: input, shape index: {}]   ;;  %s3633_s11 = inlined_call_operand.hbm [shape: f32[2,8,32], index: 11, kind: output, shape index: {}]  }
   0x1   :  { %17 = vsyncpa [#allocation6], 0 }
   0x2   :  { %18 = vsyncpa [#allocation9], 0 }
   0x3   :  { %19 = vsyncpa [#allocation12], 0 }
   0x4   :  { %20 = vsyncpa [#allocation4], 0  ;;  %s3137_s17 = smov [#allocation5]   ;;  %s3138_s19 = smov [#allocation8]  }
   0x5   :  { %s38_s18 = sshll.u32 %s3137_s17, 4  ;;  %s62_s20 = sshll.u32 %s3138_s19, 4  ;;  %s39_s18 = int_to_ptr.vmem [resolvable:$true] %s38_s18  ;;  %s3213_s20 = int_to_ptr.vmem [resolvable:$true] %s62_s20 }
   0x6   :  { %s2951_s23 = scalar_lea.hbm %s3623_s1, 256 }
   0x7   :  { %p2952_p0 = scmp.ne.s32.totalorder %s3623_s1, %s2951_s23  ;;  %p2955_p1 = scmp.lt.u32.totalorder %s2951_s23, %s3623_s1 }
   0x9   :  { %p2957_p2 = pnand %p2955_p1, %p2952_p0 }
   0xb   :  { %2960 = shalt.err (!%p2957_p2)
}
   0xc   :  { %s2961_s28 = scalar_lea.vmem %s39_s18, 256  ;;  %p2966_p4 = scmp.lt.s32.totalorder %s39_s18, %s39_s18 }
   0xd   :  { %p2962_p3 = scmp.ne.s32.totalorder %s39_s18, %s2961_s28  ;;  %p2967_p5 = scmp.lt.s32.totalorder %s2961_s28, %s2961_s28 }
   0xf   :  { %p2968_p6 = por %p2967_p5, %p2966_p4 }
  0x11   :  { %p2969_p7 = pnand %p2968_p6, %p2962_p3 }
  0x13   :  { %2972 = shalt.err (!%p2969_p7)
}
  0x14   :  { %s3139_s29 = smov 128   ;;  %s3140_s30 = smov 8  }
  0x15   :  { %44 = dma.hbm_to_vmem [thread:$0]  %s3623_s1, 256, %s39_s18, [#allocation6], %s3139_s29, %s3139_s29, %s3140_s30  }
  0x16   :  { %s2973_s16 = scalar_lea.hbm %s3625_s3, 512 }
  0x17   :  { %p2974_p8 = scmp.ne.s32.totalorder %s3625_s3, %s2973_s16  ;;  %p2977_p9 = scmp.lt.u32.totalorder %s2973_s16, %s3625_s3 }
  0x19   :  { %p2979_p10 = pnand %p2977_p9, %p2974_p8 }
  0x1b   :  { %2982 = shalt.err (!%p2979_p10)
}
  0x1c   :  { %s2983_s23 = scalar_lea.vmem %s3213_s20, 512  ;;  %p2988_p12 = scmp.lt.s32.totalorder %s3213_s20, %s3213_s20 }
  0x1d   :  { %p2984_p11 = scmp.ne.s32.totalorder %s3213_s20, %s2983_s23  ;;  %p2989_p13 = scmp.lt.s32.totalorder %s2983_s23, %s2983_s23 }
  0x1f   :  { %p2990_p0 = por %p2989_p13, %p2988_p12 }
  0x21   :  { %p2991_p1 = pnand %p2990_p0, %p2984_p11 }
  0x23   :  { %2994 = shalt.err (!%p2991_p1)
}
  0x24   :  { %68 = dma.hbm_to_vmem [thread:$0]  %s3625_s3, 512, %s3213_s20, [#allocation9], %s3139_s29, %s3139_s29, %s3140_s30  }
  0x25   :  { %s3141_s24 = smov [#allocation11]   ;;  %s3142_s26 = smov [#allocation2]  }
  0x26   :  { %s86_s25 = sshll.u32 %s3141_s24, 4  ;;  %s26_s27 = sshll.u32 %s3142_s26, 4  ;;  %s87_s25 = int_to_ptr.vmem [resolvable:$true] %s86_s25  ;;  %s3250_s27 = int_to_ptr.vmem [resolvable:$true] %s26_s27 }
  0x27   :  { %s2995_s13 = scalar_lea.hbm %s3627_s5, 512 }
  0x28   :  { %p2996_p2 = scmp.ne.s32.totalorder %s3627_s5, %s2995_s13  ;;  %p2999_p3 = scmp.lt.u32.totalorder %s2995_s13, %s3627_s5 }
  0x2a   :  { %p3001_p4 = pnand %p2999_p3, %p2996_p2 }
  0x2c   :  { %3004 = shalt.err (!%p3001_p4)
}
  0x2d   :  { %s3005_s3 = scalar_lea.vmem %s87_s25, 512  ;;  %p3010_p6 = scmp.lt.s32.totalorder %s87_s25, %s87_s25 }
  0x2e   :  { %p3006_p5 = scmp.ne.s32.totalorder %s87_s25, %s3005_s3  ;;  %p3011_p7 = scmp.lt.s32.totalorder %s3005_s3, %s3005_s3 }
  0x30   :  { %p3012_p8 = por %p3011_p7, %p3010_p6 }
  0x32   :  { %p3013_p9 = pnand %p3012_p8, %p3006_p5 }
  0x34   :  { %3016 = shalt.err (!%p3013_p9)
}
  0x35   :  { %92 = dma.hbm_to_vmem [thread:$0]  %s3627_s5, 512, %s87_s25, [#allocation12], %s3139_s29, %s3139_s29, %s3140_s30  }
  0x36   :  { %s3017_s23 = scalar_lea.hbm %s3622_s0, 256 }
  0x37   :  { %p3018_p10 = scmp.ne.s32.totalorder %s3622_s0, %s3017_s23  ;;  %p3021_p11 = scmp.lt.u32.totalorder %s3017_s23, %s3622_s0 }
  0x39   :  { %p3023_p12 = pnand %p3021_p11, %p3018_p10 }
  0x3b   :  { %3026 = shalt.err (!%p3023_p12)
}
  0x3c   :  { %s3027_s28 = scalar_lea.vmem %s3250_s27, 256  ;;  %p3032_p0 = scmp.lt.s32.totalorder %s3250_s27, %s3250_s27 }
  0x3d   :  { %p3028_p13 = scmp.ne.s32.totalorder %s3250_s27, %s3027_s28  ;;  %p3033_p1 = scmp.lt.s32.totalorder %s3027_s28, %s3027_s28 }
  0x3f   :  { %p3034_p2 = por %p3033_p1, %p3032_p0 }
  0x41   :  { %p3035_p3 = pnand %p3034_p2, %p3028_p13 }
  0x43   :  { %3038 = shalt.err (!%p3035_p3)
}
  0x44   :  { %32 = dma.hbm_to_vmem [thread:$0]  %s3622_s0, 256, %s3250_s27, [#allocation3], %s3139_s29, %s3139_s29, %s3140_s30  }
  0x45   :  { %s3143_s12 = smov [#allocation7]   ;;  %s3144_s14 = smov [#allocation10]  }
  0x46   :  { %s50_s13 = sshll.u32 %s3143_s12, 4  ;;  %s74_s15 = sshll.u32 %s3144_s14, 4  ;;  %s51_s13 = int_to_ptr.vmem [resolvable:$true] %s50_s13  ;;  %s3287_s15 = int_to_ptr.vmem [resolvable:$true] %s74_s15 }
  0x47   :  { %s3039_s3 = scalar_lea.hbm %s3624_s2, 256 }
  0x48   :  { %p3040_p4 = scmp.ne.s32.totalorder %s3624_s2, %s3039_s3  ;;  %p3043_p5 = scmp.lt.u32.totalorder %s3039_s3, %s3624_s2 }
  0x4a   :  { %p3045_p6 = pnand %p3043_p5, %p3040_p4 }
  0x4c   :  { %3048 = shalt.err (!%p3045_p6)
}
  0x4d   :  { %s3049_s0 = scalar_lea.vmem %s51_s13, 256  ;;  %p3054_p8 = scmp.lt.s32.totalorder %s51_s13, %s51_s13 }
  0x4e   :  { %p3050_p7 = scmp.ne.s32.totalorder %s51_s13, %s3049_s0  ;;  %p3055_p9 = scmp.lt.s32.totalorder %s3049_s0, %s3049_s0 }
  0x50   :  { %p3056_p10 = por %p3055_p9, %p3054_p8 }
  0x52   :  { %p3057_p11 = pnand %p3056_p10, %p3050_p7 }
  0x54   :  { %3060 = shalt.err (!%p3057_p11)
}
  0x55   :  { %56 = dma.hbm_to_vmem [thread:$0]  %s3624_s2, 256, %s51_s13, [#allocation6], %s3139_s29, %s3139_s29, %s3140_s30  }
  0x56   :  { %s3061_s24 = scalar_lea.hbm %s3626_s4, 512 }
  0x57   :  { %p3062_p12 = scmp.ne.s32.totalorder %s3626_s4, %s3061_s24  ;;  %p3065_p13 = scmp.lt.u32.totalorder %s3061_s24, %s3626_s4 }
  0x59   :  { %p3067_p0 = pnand %p3065_p13, %p3062_p12 }
  0x5b   :  { %3070 = shalt.err (!%p3067_p0)
}
  0x5c   :  { %s3071_s12 = scalar_lea.vmem %s3287_s15, 512  ;;  %p3076_p2 = scmp.lt.s32.totalorder %s3287_s15, %s3287_s15 }
  0x5d   :  { %p3072_p1 = scmp.ne.s32.totalorder %s3287_s15, %s3071_s12  ;;  %p3077_p3 = scmp.lt.s32.totalorder %s3071_s12, %s3071_s12 }
  0x5f   :  { %p3078_p4 = por %p3077_p3, %p3076_p2 }
  0x61   :  { %p3079_p5 = pnand %p3078_p4, %p3072_p1 }
  0x63   :  { %3082 = shalt.err (!%p3079_p5)
}
  0x64   :  { %80 = dma.hbm_to_vmem [thread:$0]  %s3626_s4, 512, %s3287_s15, [#allocation9], %s3139_s29, %s3139_s29, %s3140_s30  }
  0x65   :  { %s3145_s14 = smov [#allocation13]   ;;  %s3083_s20 = scalar_lea.hbm %s3628_s6, 512 }
  0x66   :  { %s98_s16 = sshll.u32 %s3145_s14, 4  ;;  %p3084_p6 = scmp.ne.s32.totalorder %s3628_s6, %s3083_s20  ;;  %s99_s16 = int_to_ptr.vmem [resolvable:$true] %s98_s16 }
  0x67   :  { %p3087_p7 = scmp.lt.u32.totalorder %s3083_s20, %s3628_s6 }
  0x69   :  { %p3089_p8 = pnand %p3087_p7, %p3084_p6 }
  0x6b   :  { %3092 = shalt.err (!%p3089_p8)
}
  0x6c   :  { %s3093_s27 = scalar_lea.vmem %s99_s16, 512  ;;  %p3098_p10 = scmp.lt.s32.totalorder %s99_s16, %s99_s16 }
  0x6d   :  { %p3094_p9 = scmp.ne.s32.totalorder %s99_s16, %s3093_s27  ;;  %p3099_p11 = scmp.lt.s32.totalorder %s3093_s27, %s3093_s27 }
  0x6f   :  { %p3100_p12 = por %p3099_p11, %p3098_p10 }
  0x71   :  { %p3101_p13 = pnand %p3100_p12, %p3094_p9 }
  0x73   :  { %3104 = shalt.err (!%p3101_p13)
}
  0x74   :  { %104 = dma.hbm_to_vmem [thread:$0]  %s3628_s6, 512, %s99_s16, [#allocation12], %s3139_s29, %s3139_s29, %s3140_s30  }
  0x75   :  { %3127 = dma.done.wait [#allocation3], 256  }
  0x76   :  { %3128 = vsyncadd [#allocation3], 4294967040 }
  0x77   :  { %3129 = dma.done.wait [#allocation6], 512  }
  0x78   :  { %3130 = vsyncadd [#allocation6], 4294966784 }
  0x79   :  { %3131 = dma.done.wait [#allocation9], 1024  }
  0x7a   :  { %3132 = vsyncadd [#allocation9], 4294966272 }
  0x7b   :  { %3133 = dma.done.wait [#allocation12], 1024  }
  0x7c   :  { %3134 = vsyncadd [#allocation12], 4294966272  ;;  %v3146_v0 = vmov 0.0|0.0   ;;  %vm3147_vm0 = vmmov 0   ;;  %v3148_v1 = vmov 0.0   ;;  %v138_v2 = vld [vmem:[#allocation10] sm:$0xff] }
  0x7d   :  { %2873 = vmatprep.subr.bf16.mxu1 %v3146_v0  ;;  %2867 = vmatprep.subr.bf16.mxu0 %v3146_v0  ;;  %v139_v3 = vld [vmem:[#allocation10 + $0x8] sm:$0xff]  ;;  %v134_v4 = vld [vmem:[#allocation8] sm:$0xff]  ;;  %v140_v7 = vld [vmem:[#allocation10 + $0x10] sm:$0xff]  ;;  %vm159_vm1 = vcmask 261120   ;;  %vm392_vm2 = vcmask 64512   ;;  %s3149_s24 = smov 120  }
  0x7e   :  { %2700 = vmatprep.mubr.msk.f32.mxu1 %vm3147_vm0, %v3148_v1  ;;  %2689 = vmatprep.mubr.msk.f32.mxu0 %vm3147_vm0, %v3148_v1  ;;  %v3345_v5 = vpack.c.bf16 %v139_v3, %v138_v2  ;;  %v135_v6 = vld [vmem:[#allocation8 + $0x8] sm:$0xff]  ;;  %v141_v8 = vld [vmem:[#allocation10 + $0x18] sm:$0xff]  ;;  %v136_v10 = vld [vmem:[#allocation8 + $0x10] sm:$0xff]  ;;  %s3151_s26 = smov 104  }
  0x7f   :  { %v3347_v9 = vpack.c.bf16 %v135_v6, %v134_v4  ;;  %v137_v11 = vld [vmem:[#allocation8 + $0x18] sm:$0xff]  ;;  %v3350_v12 = vpack.c.bf16 %v141_v8, %v140_v7  ;;  %v151_v14 = vld [vmem:[#allocation5] sm:$0xff]  ;;  %v150_v15 = vld [vmem:[#allocation2] sm:$0xff] }
  0x80   :  { %2875 = vmatpush3.bf16.msra.mxu1 %v3345_v5  ;;  %v3354_v13 = vpack.c.bf16 %v137_v11, %v136_v10  ;;  %v142_v16 = vld [vmem:[#allocation11] sm:$0xff]  ;;  %v143_v17 = vld [vmem:[#allocation11 + $0x8] sm:$0xff]  ;;  %v144_v18 = vld [vmem:[#allocation11 + $0x10] sm:$0xff] }
  0x81   :  { %2869 = vmatpush3.bf16.msra.mxu0 %v3347_v9  ;;  %2876 = vmatprep.subr.bf16.mxu1 %v3146_v0  ;;  %v3367_v19 = vpack.c.bf16 %v143_v17, %v142_v16  ;;  %v145_v20 = vld [vmem:[#allocation11 + $0x18] sm:$0xff]  ;;  %v152_v22 = vld [vmem:[#allocation7] sm:$0xff]  ;;  %v3431_v57 = vld [vmem:[#allocation13 + $0x8] sm:$0xff] }
  0x82   :  { %2870 = vmatprep.subr.bf16.mxu0 %v3146_v0  ;;  %v3370_v21 = vpack.c.bf16 %v145_v20, %v144_v18  ;;  %v3381_v23 = vld [vmem:[%s3630_s8] ss:$0 sm:$0xff]  ;;  %v3436_v62 = vld [vmem:[#allocation13] sm:$0xff] }
  0x83   :  { %v3386_v24 = vld [vmem:[%s3629_s7] ss:$0 sm:$0xff] }
  0x84   :  { %2878 = vmatpush3.bf16.msra.mxu1 %v3350_v12  ;;  %v3409_v34 = vld [vmem:[%s3631_s9] ss:$0 sm:$0xff]  ;;  %s3150_s9 = smov 112  }
  0x85   :  { %2872 = vmatpush3.bf16.msra.mxu0 %v3354_v13  ;;  %2714 = vmatprep.subr.mxu1 %v3148_v1 }
  0x86   :  { %2879 = vmatprep.subr.bf16.mxu0 %v3146_v0 }
  0x87   :  { %2701 = vmatmul.mubr.msk.f32.vlgmr.msra.gmra.mrb[0].mxu1 %vm159_vm1, %v151_v14 }
  0x88   :  { %2690 = vmatmul.mubr.msk.f32.vlgmr.msra.gmra.mrb[0].mxu0 %vm159_vm1, %v150_v15  ;;  %2716 = vmatprep.mubr.msk.f32.mxu1 %vm3147_vm0, %v3148_v1 }
  0x89   :  { %2711 = vmatprep.mubr.msk.f32.mxu0 %vm3147_vm0, %v3148_v1  ;;  %2881 = vmatpush3.bf16.msra.mxu0 %v3367_v19 }
  0x8a   :  { %2882 = vmatprep.subr.bf16.mxu0 %v3146_v0 }
  0x8d   :  { %2884 = vmatpush3.bf16.msra.mxu0 %v3370_v21 }
  0x8e   :  { %2724 = vmatprep.subr.mxu0 %v3148_v1 }
  0x90   :  { %2712 = vmatmul.mubr.msk.f32.vlgmr.msra.gmra.mrb[2].mxu0 %vm159_vm1, %v152_v22 }
  0x91   :  { %2726 = vmatprep.mubr.msk.f32.mxu0 %vm3147_vm0, %v3148_v1 }
 0x15a   :  { %v309_v25 = vpop.f32.mrb[0].mxu1 }
 0x15b   :  { %v310_v26 = vadd.f32 %v3381_v23, %v309_v25  ;;  %v229_v27 = vpop.f32.mrb[0].mxu0  ;;  %v2702_v28 = vpop.f32.mrb[1].mxu1 }
 0x15c   :  { %v230_v29 = vadd.f32 %v3386_v24, %v229_v27  ;;  %v2691_v30 = vpop.f32.mrb[1].mxu0 }
 0x15d   :  { %556 = vrot.lane.b32.xlu0 %v310_v26, %s3149_s24  ;;  %2715 = vmatpush3.xpose.msk.msra.mxu1 %vm392_vm2, %v310_v26 }
 0x15e   :  { %v3392_v31 = vmul.f32 0.35355338, %v230_v29  ;;  %2719 = vmatprep.subr.mxu1 %v3148_v1 }
 0x160   :  { %2717 = vmatmul.mubr.msk.f32.vlgmr.msra.gmra.mrb[2].mxu1 %vm392_vm2, %v3392_v31 }
 0x161   :  { %554 = vrot.lane.b32.xlu0 %v3392_v31, %s3149_s24  ;;  %2721 = vmatprep.mubr.msk.f32.mxu1 %vm3147_vm0, %v3148_v1 }
 0x163   :  { %v388_v35 = vpop.f32.mrb[2].mxu0 }
 0x164   :  { %v3412_v36 = vadd.f32 %v3409_v34, %v388_v35  ;;  %v2713_v37 = vpop.f32.mrb[3].mxu0 }
 0x166   :  { %2720 = vmatpush3.msra.mxu1 %v3412_v36 }
 0x167   :  { %2729 = vmatprep.subr.mxu1 %v3148_v1 }
 0x1cf   :  { %v557_v32 = vpop.permute.xlu0 %556 }
 0x1d0   :  { %2725 = vmatpush3.xpose.msk.msra.mxu0 %vm392_vm2, %v557_v32 }
 0x1d1   :  { %2734 = vmatprep.subr.mxu0 %v3148_v1 }
 0x1d3   :  { %v555_v33 = vpop.permute.xlu0 %554 }
 0x1d4   :  { %2727 = vmatmul.mubr.msk.f32.vlgmr.msra.gmra.mrb[4].mxu0 %vm392_vm2, %v555_v33 }
 0x1d5   :  { %2736 = vmatprep.mubr.msk.f32.mxu0 %vm3147_vm0, %v3148_v1  ;;  %2735 = vmatpush3.msra.mxu0 %v3431_v57 }
 0x1d6   :  { %2744 = vmatprep.subr.mxu0 %v3148_v1 }
 0x233   :  { %v465_v38 = vpop.f32.mrb[2].mxu1 }
 0x234   :  { %v2718_v39 = vpop.f32.mrb[3].mxu1  ;;  %v469_v40 = vsel %vm392_vm2, %v465_v38, -inf }
 0x235   :  { %470 = vmax.xlane.f32.xlu1 %v469_v40 }
 0x2a7   :  { %v628_v41 = vpop.f32.mrb[4].mxu0 }
 0x2a8   :  { %v2728_v42 = vpop.f32.mrb[5].mxu0  ;;  %v632_v43 = vsel %vm392_vm2, %v628_v41, -inf }
 0x2a9   :  { %633 = vmax.xlane.f32.xlu1 %v632_v43 }
 0x2c2   :  { %v471_v44 = vpop.xlane.xlu1 %470 }
 0x2c3   :  { %v472_v45 = vsub.f32 %v465_v38, %v471_v44 }
 0x2c5   :  { %v473_v46 = vmul.f32 1.442695, %v472_v45 }
 0x2c7   :  { %2919 = vpow2.f32 %v473_v46 }
 0x2d1   :  { %v2920_v47 = vpop.eup %2919 }
 0x2d2   :  { %v475_v48 = vsel %vm392_vm2, %v2920_v47, 0.0 }
 0x2d3   :  { %476 = vadd.xlane.f32.xlu0 %v475_v48 }
 0x2e9   :  { %957 = vrot.lane.b32.xlu0 %v3412_v36, %s3150_s9 }
 0x2ed   :  { %1111 = vrot.lane.b32.xlu0 %v310_v26, %s3151_s26 }
 0x336   :  { %v634_v49 = vpop.xlane.xlu1 %633 }
 0x337   :  { %v635_v50 = vsub.f32 %v628_v41, %v634_v49 }
 0x339   :  { %v636_v51 = vmul.f32 1.442695, %v635_v50 }
 0x33b   :  { %2921 = vpow2.f32 %v636_v51 }
 0x345   :  { %v2922_v52 = vpop.eup %2921 }
 0x346   :  { %v638_v53 = vsel %vm392_vm2, %v2922_v52, 0.0 }
 0x347   :  { %639 = vadd.xlane.f32.xlu1 %v638_v53 }
 0x358   :  { %644 = vrot.lane.b32.xlu1 %v3412_v36, %s3149_s24 }
 0x35c   :  { %870 = vrot.lane.b32.xlu1 %v310_v26, %s3150_s9 }
 0x360   :  { %v477_v54 = vpop.xlane.xlu0 %476  ;;  %868 = vrot.lane.b32.xlu1 %v3392_v31, %s3150_s9 }
 0x361   :  { %2923 = vrcp.f32 %v477_v54 }
 0x364   :  { %v958_v2 = vpop.permute.xlu0 %957 }
 0x368   :  { %v1112_v29 = vpop.permute.xlu0 %1111 }
 0x36b   :  { %v2924_v55 = vpop.eup %2923 }
 0x36c   :  { %v479_v56 = vmul.f32 %v2924_v55, %v2920_v47  ;;  %v3478_v47 = vld [vmem:[#allocation13 + $0x18] sm:$0xff] }
 0x36e   :  { %2722 = vmatmul.mubr.msk.f32.vlgmr.msra.gmra.mrb[4].mxu1 %vm392_vm2, %v479_v56  ;;  %v1363_v56 = vld [vmem:[#allocation7 + $0x8] sm:$0xff] }
 0x36f   :  { %2731 = vmatprep.mubr.msk.f32.mxu1 %vm3147_vm0, %v3148_v1 }
 0x3d4   :  { %v640_v58 = vpop.xlane.xlu1 %639 }
 0x3d5   :  { %2925 = vrcp.f32 %v640_v58 }
 0x3d8   :  { %v645_v59 = vpop.permute.xlu1 %644 }
 0x3d9   :  { %2730 = vmatpush3.msra.mxu1 %v645_v59 }
 0x3da   :  { %2739 = vmatprep.subr.mxu1 %v3148_v1 }
 0x3dc   :  { %v871_v4 = vpop.permute.xlu1 %870 }
 0x3df   :  { %v2926_v60 = vpop.eup %2925 }
 0x3e0   :  { %v642_v61 = vmul.f32 %v2926_v60, %v2922_v52  ;;  %v869_v8 = vpop.permute.xlu1 %868 }
 0x3e2   :  { %2732 = vmatmul.mubr.msk.f32.vlgmr.msra.gmra.mrb[6].mxu1 %vm392_vm2, %v642_v61 }
 0x3e3   :  { %2740 = vmatpush3.msra.mxu1 %v3436_v62  ;;  %2741 = vmatprep.mubr.msk.f32.mxu1 %vm3147_vm0, %v3148_v1 }
 0x3e4   :  { %2749 = vmatprep.subr.mxu1 %v3148_v1 }
 0x441   :  { %v549_v63 = vpop.f32.mrb[4].mxu1 }
 0x442   :  { %v2723_v3 = vpop.f32.mrb[5].mxu1  ;;  %2742 = vmatmul.mubr.msk.f32.vlgmr.msra.gmra.mrb[8].mxu1 %vm392_vm2, %v549_v63 }
 0x443   :  { %2750 = vmatpush3.msra.mxu1 %v958_v2  ;;  %2751 = vmatprep.mubr.msk.f32.mxu1 %vm3147_vm0, %v3148_v1 }
 0x444   :  { %2759 = vmatprep.subr.mxu1 %v3148_v1 }
 0x4b5   :  { %v716_v6 = vpop.f32.mrb[6].mxu1 }
 0x4b6   :  { %v2733_v7 = vpop.f32.mrb[7].mxu1  ;;  %2737 = vmatmul.mubr.msk.f32.vlgmr.msra.gmra.mrb[6].mxu0 %vm392_vm2, %v716_v6 }
 0x4b7   :  { %2745 = vmatpush3.xpose.msk.msra.mxu0 %vm392_vm2, %v871_v4  ;;  %2746 = vmatprep.mubr.msk.f32.mxu0 %vm3147_vm0, %v3148_v1 }
 0x4b8   :  { %2754 = vmatprep.subr.mxu0 %v3148_v1 }
 0x4ba   :  { %2747 = vmatmul.mubr.msk.f32.vlgmr.msra.gmra.mrb[8].mxu0 %vm392_vm2, %v869_v8 }
 0x4bb   :  { %2756 = vmatprep.mubr.msk.f32.mxu0 %vm3147_vm0, %v3148_v1 }
 0x515   :  { %v864_v10 = vpop.f32.mrb[8].mxu1 }
 0x516   :  { %v2743_v11 = vpop.f32.mrb[9].mxu1 }
 0x589   :  { %v791_v14 = vpop.f32.mrb[6].mxu0 }
 0x58a   :  { %v865_v15 = vadd.f32 %v864_v10, %v791_v14  ;;  %v2738_v16 = vpop.f32.mrb[7].mxu0 }
 0x58d   :  { %v942_v17 = vpop.f32.mrb[8].mxu0 }
 0x58e   :  { %v2748_v18 = vpop.f32.mrb[9].mxu0  ;;  %v946_v20 = vsel %vm392_vm2, %v942_v17, -inf }
 0x58f   :  { %947 = vmax.xlane.f32.xlu1 %v946_v20 }
 0x61c   :  { %v948_v22 = vpop.xlane.xlu1 %947 }
 0x61d   :  { %v949_v25 = vsub.f32 %v942_v17, %v948_v22 }
 0x61f   :  { %v950_v26 = vmul.f32 1.442695, %v949_v25 }
 0x621   :  { %2927 = vpow2.f32 %v950_v26 }
 0x62b   :  { %v2928_v27 = vpop.eup %2927 }
 0x62c   :  { %v952_v28 = vsel %vm392_vm2, %v2928_v27, 0.0 }
 0x62d   :  { %953 = vadd.xlane.f32.xlu0 %v952_v28 }
 0x643   :  { %1109 = vrot.lane.b32.xlu0 %v3392_v31, %s3151_s26  ;;  %v3467_v31 = vld [vmem:[#allocation13 + $0x10] sm:$0xff] }
 0x644   :  { %2755 = vmatpush3.msra.mxu0 %v3467_v31 }
 0x645   :  { %2764 = vmatprep.subr.mxu0 %v3148_v1 }
 0x6ba   :  { %v954_v30 = vpop.xlane.xlu0 %953 }
 0x6bb   :  { %2929 = vrcp.f32 %v954_v30 }
 0x6be   :  { %v1110_v35 = vpop.permute.xlu0 %1109 }
 0x6c5   :  { %v2930_v32 = vpop.eup %2929 }
 0x6c6   :  { %v956_v33 = vmul.f32 %v2930_v32, %v2928_v27 }
 0x6c8   :  { %2752 = vmatmul.mubr.msk.f32.vlgmr.msra.gmra.mrb[10].mxu1 %vm392_vm2, %v956_v33 }
 0x6c9   :  { %2760 = vmatpush3.xpose.msk.msra.mxu1 %vm392_vm2, %v1112_v29  ;;  %2761 = vmatprep.mubr.msk.f32.mxu1 %vm3147_vm0, %v3148_v1 }
 0x6ca   :  { %2769 = vmatprep.subr.mxu1 %v3148_v1 }
 0x6cc   :  { %2762 = vmatmul.mubr.msk.f32.vlgmr.msra.gmra.mrb[12].mxu1 %vm392_vm2, %v1110_v35 }
 0x6cd   :  { %2771 = vmatprep.mubr.msk.f32.mxu1 %vm3147_vm0, %v3148_v1  ;;  %2770 = vmatpush3.msra.mxu1 %v3478_v47 }
 0x6ce   :  { %2891 = vmatprep.subr.bf16.mxu1 %v3146_v0 }
 0x79b   :  { %v1029_v37 = vpop.f32.mrb[10].mxu1 }
 0x79c   :  { %v2753_v38 = vpop.f32.mrb[11].mxu1  ;;  %2757 = vmatmul.mubr.msk.f32.vlgmr.msra.gmra.mrb[10].mxu0 %vm392_vm2, %v1029_v37 }
 0x79d   :  { %2766 = vmatprep.mubr.msk.f32.mxu0 %vm3147_vm0, %v3148_v1 }
 0x79f   :  { %v1183_v39 = vpop.f32.mrb[12].mxu1 }
 0x7a0   :  { %v2763_v40 = vpop.f32.mrb[13].mxu1  ;;  %v1187_v41 = vsel %vm392_vm2, %v1183_v39, -inf }
 0x7a1   :  { %1188 = vmax.xlane.f32.xlu0 %v1187_v41 }
 0x82e   :  { %v1189_v42 = vpop.xlane.xlu0 %1188 }
 0x82f   :  { %v1190_v43 = vsub.f32 %v1183_v39, %v1189_v42 }
 0x831   :  { %v1191_v44 = vmul.f32 1.442695, %v1190_v43 }
 0x833   :  { %2931 = vpow2.f32 %v1191_v44 }
 0x83d   :  { %v2932_v45 = vpop.eup %2931 }
 0x83e   :  { %v1193_v46 = vsel %vm392_vm2, %v2932_v45, 0.0 }
 0x83f   :  { %1194 = vadd.xlane.f32.xlu1 %v1193_v46 }
 0x850   :  { %1198 = vrot.lane.b32.xlu1 %v3412_v36, %s3151_s26  ;;  %v1359_v36 = vld [vmem:[#allocation2 + $0x8] sm:$0xff] }
 0x86f   :  { %v1104_v48 = vpop.f32.mrb[10].mxu0 }
 0x870   :  { %v1108_v49 = vadd.f32 %v1104_v48, %v865_v15  ;;  %v2758_v50 = vpop.f32.mrb[11].mxu0 }
 0x8cc   :  { %v1195_v51 = vpop.xlane.xlu1 %1194 }
 0x8cd   :  { %2933 = vrcp.f32 %v1195_v51 }
 0x8d0   :  { %v1199_v52 = vpop.permute.xlu1 %1198 }
 0x8d1   :  { %2765 = vmatpush3.msra.mxu0 %v1199_v52 }
 0x8d2   :  { %2885 = vmatprep.subr.bf16.mxu0 %v3146_v0 }
 0x8d7   :  { %v2934_v53 = vpop.eup %2933 }
 0x8d8   :  { %v1197_v54 = vmul.f32 %v2934_v53, %v2932_v45 }
 0x8da   :  { %2767 = vmatmul.mubr.msk.f32.vlgmr.msra.gmra.mrb[12].mxu0 %vm392_vm2, %v1197_v54 }
 0x8db   :  { %2887 = vmatpush3.bf16.msra.mxu0 %v3347_v9  ;;  %2782 = vmatprep.mubr.msk.f32.mxu0 %vm3147_vm0, %v3148_v1 }
 0x8dc   :  { %2888 = vmatprep.subr.bf16.mxu0 %v3146_v0 }
 0x8df   :  { %2890 = vmatpush3.bf16.msra.mxu0 %v3354_v13  ;;  %v1361_v13 = vld [vmem:[#allocation5 + $0x8] sm:$0xff] }
 0x8e0   :  { %2897 = vmatprep.subr.bf16.mxu0 %v3146_v0 }
 0x8e2   :  { %2783 = vmatmul.mubr.msk.f32.vlgmr.msra.gmra.mrb[14].mxu0 %vm159_vm1, %v1359_v36 }
 0x8e3   :  { %2899 = vmatpush3.bf16.msra.mxu0 %v3367_v19  ;;  %2804 = vmatprep.mubr.msk.f32.mxu0 %vm3147_vm0, %v3148_v1 }
 0x8e4   :  { %2900 = vmatprep.subr.bf16.mxu0 %v3146_v0 }
 0x8e7   :  { %2902 = vmatpush3.bf16.msra.mxu0 %v3370_v21 }
 0x8e8   :  { %2817 = vmatprep.subr.mxu0 %v3148_v1 }
 0x8ea   :  { %2805 = vmatmul.mubr.msk.f32.vlgmr.msra.gmra.mrb[16].mxu0 %vm159_vm1, %v1363_v56 }
 0x8eb   :  { %2819 = vmatprep.mubr.msk.f32.mxu0 %vm3147_vm0, %v3148_v1 }
 0x9ad   :  { %v1270_v9 = vpop.f32.mrb[12].mxu0 }
 0x9ae   :  { %v2768_v55 = vpop.f32.mrb[13].mxu0  ;;  %2772 = vmatmul.mubr.msk.f32.vlgmr.msra.gmra.mrb[14].mxu1 %vm392_vm2, %v1270_v9 }
 0x9af   :  { %2893 = vmatpush3.bf16.msra.mxu1 %v3345_v5  ;;  %2793 = vmatprep.mubr.msk.f32.mxu1 %vm3147_vm0, %v3148_v1 }
 0x9b0   :  { %2894 = vmatprep.subr.bf16.mxu1 %v3146_v0  ;;  %v3513_v0 = vld [vmem:[%s3632_s10] ss:$0 sm:$0xff]  ;;  %s3152_s10 = smov [#allocation14]  }
 0x9b1   :  { %s2546_s25 = sshll.u32 %s3152_s10, 4  ;;  %s2547_s25 = int_to_ptr.vmem [resolvable:$true] %s2546_s25 }
 0x9b2   :  { %s3105_s12 = scalar_lea.vmem %s2547_s25, 256  ;;  %p3110_p1 = scmp.lt.s32.totalorder %s2547_s25, %s2547_s25 }
 0x9b3   :  { %2896 = vmatpush3.bf16.msra.mxu1 %v3350_v12  ;;  %p3106_p0 = scmp.ne.s32.totalorder %s2547_s25, %s3105_s12  ;;  %p3111_p2 = scmp.lt.s32.totalorder %s3105_s12, %s3105_s12 }
 0x9b4   :  { %2807 = vmatprep.subr.mxu1 %v3148_v1 }
 0x9b5   :  { %v1433_v19 = vpop.f32.mrb[14].mxu0  ;;  %p3112_p3 = por %p3111_p2, %p3110_p1 }
 0x9b6   :  { %2794 = vmatmul.mubr.msk.f32.vlgmr.msra.gmra.mrb[16].mxu1 %vm159_vm1, %v1361_v13  ;;  %v2784_v21 = vpop.f32.mrb[15].mxu0  ;;  %v1434_v60 = vadd.f32 %v3386_v24, %v1433_v19 }
 0x9b7   :  { %2809 = vmatprep.mubr.msk.f32.mxu1 %vm3147_vm0, %v3148_v1  ;;  %p3113_p4 = pnand %p3112_p3, %p3106_p0 }
 0x9b8   :  { %v3521_v3 = vmul.f32 0.35355338, %v1434_v60 }
 0xa81   :  { %v1345_v5 = vpop.f32.mrb[14].mxu1 }
 0xa82   :  { %v1349_v12 = vadd.f32 %v1345_v5, %v1108_v49  ;;  %v2773_v58 = vpop.f32.mrb[15].mxu1 }
 0xa84   :  { %v1356_v59 = vadd.f32 %v3513_v0, %v1349_v12 }
 0xa86   :  { %1357 = vst.msk [vmem:[#allocation14] sm:$0xff] %vm159_vm1, %v1356_v59 }
 0xa89   :  { %v1507_v61 = vpop.f32.mrb[16].mxu1 }
 0xa8a   :  { %v3519_v63 = vadd.f32 %v3381_v23, %v1507_v61  ;;  %v2795_v2 = vpop.f32.mrb[17].mxu1  ;;  %v1580_v23 = vpop.f32.mrb[16].mxu0 }
 0xa8b   :  { %v3535_v24 = vadd.f32 %v3409_v34, %v1580_v23  ;;  %v2806_v4 = vpop.f32.mrb[17].mxu0 }
 0xa8c   :  { %1747 = vrot.lane.b32.xlu1 %v3519_v63, %s3149_s24  ;;  %2808 = vmatpush3.xpose.msk.msra.mxu1 %vm392_vm2, %v3519_v63 }
 0xa8d   :  { %2812 = vmatprep.subr.mxu1 %v3148_v1 }
 0xa8f   :  { %2810 = vmatmul.mubr.msk.f32.vlgmr.msra.gmra.mrb[18].mxu1 %vm392_vm2, %v3521_v3 }
 0xa90   :  { %1745 = vrot.lane.b32.xlu1 %v3521_v3, %s3149_s24  ;;  %2814 = vmatprep.mubr.msk.f32.mxu1 %vm3147_vm0, %v3148_v1 }
 0xa91   :  { %2813 = vmatpush3.msra.mxu1 %v3535_v24 }
 0xa92   :  { %2822 = vmatprep.subr.mxu1 %v3148_v1 }
 0xafe   :  { %v1748_v6 = vpop.permute.xlu1 %1747 }
 0xaff   :  { %2818 = vmatpush3.xpose.msk.msra.mxu0 %vm392_vm2, %v1748_v6 }
 0xb00   :  { %2827 = vmatprep.subr.mxu0 %v3148_v1 }
 0xb02   :  { %v1746_v7 = vpop.permute.xlu1 %1745 }
 0xb03   :  { %2820 = vmatmul.mubr.msk.f32.vlgmr.msra.gmra.mrb[18].mxu0 %vm392_vm2, %v1746_v7 }
 0xb04   :  { %2828 = vmatpush3.msra.mxu0 %v3431_v57  ;;  %2829 = vmatprep.mubr.msk.f32.mxu0 %vm3147_vm0, %v3148_v1 }
 0xb05   :  { %2837 = vmatprep.subr.mxu0 %v3148_v1 }
 0xb62   :  { %v1656_v34 = vpop.f32.mrb[18].mxu1 }
 0xb63   :  { %v2811_v8 = vpop.f32.mrb[19].mxu1  ;;  %v1660_v10 = vsel %vm392_vm2, %v1656_v34, -inf }
 0xb64   :  { %1661 = vmax.xlane.f32.xlu1 %v1660_v10 }
 0xb75   :  { %2058 = vrot.lane.b32.xlu1 %v3521_v3, %s3150_s9 }
 0xbd6   :  { %v1819_v11 = vpop.f32.mrb[18].mxu0 }
 0xbd7   :  { %v2821_v14 = vpop.f32.mrb[19].mxu0  ;;  %v1823_v15 = vsel %vm392_vm2, %v1819_v11, -inf }
 0xbd8   :  { %1824 = vmax.xlane.f32.xlu0 %v1823_v15 }
 0xbf1   :  { %v1662_v16 = vpop.xlane.xlu1 %1661 }
 0xbf2   :  { %v1663_v57 = vsub.f32 %v1656_v34, %v1662_v16 }
 0xbf4   :  { %v1664_v17 = vmul.f32 1.442695, %v1663_v57 }
 0xbf6   :  { %2935 = vpow2.f32 %v1664_v17 }
 0xc00   :  { %v2936_v18 = vpop.eup %2935 }
 0xc01   :  { %v1666_v20 = vsel %vm392_vm2, %v2936_v18, 0.0 }
 0xc02   :  { %1667 = vadd.xlane.f32.xlu0 %v1666_v20 }
 0xc65   :  { %v1825_v22 = vpop.xlane.xlu0 %1824 }
 0xc66   :  { %v1826_v25 = vsub.f32 %v1819_v11, %v1825_v22 }
 0xc68   :  { %v1827_v26 = vmul.f32 1.442695, %v1826_v25 }
 0xc6a   :  { %2937 = vpow2.f32 %v1827_v26 }
 0xc74   :  { %v2938_v27 = vpop.eup %2937 }
 0xc75   :  { %v1829_v28 = vsel %vm392_vm2, %v2938_v27, 0.0 }
 0xc76   :  { %1830 = vadd.xlane.f32.xlu0 %v1829_v28 }
 0xc8c   :  { %1835 = vrot.lane.b32.xlu0 %v3535_v24, %s3149_s24 }
 0xc8f   :  { %v1668_v29 = vpop.xlane.xlu0 %1667 }
 0xc90   :  { %2939 = vrcp.f32 %v1668_v29  ;;  %2060 = vrot.lane.b32.xlu0 %v3519_v63, %s3150_s9 }
 0xc9a   :  { %v2940_v30 = vpop.eup %2939 }
 0xc9b   :  { %v1670_v32 = vmul.f32 %v2940_v30, %v2936_v18 }
 0xc9d   :  { %2815 = vmatmul.mubr.msk.f32.vlgmr.msra.gmra.mrb[20].mxu1 %vm392_vm2, %v1670_v32 }
 0xc9e   :  { %2824 = vmatprep.mubr.msk.f32.mxu1 %vm3147_vm0, %v3148_v1 }
 0xd03   :  { %v1831_v33 = vpop.xlane.xlu0 %1830 }
 0xd04   :  { %2941 = vrcp.f32 %v1831_v33 }
 0xd07   :  { %v1836_v35 = vpop.permute.xlu0 %1835 }
 0xd08   :  { %2823 = vmatpush3.msra.mxu1 %v1836_v35 }
 0xd09   :  { %2832 = vmatprep.subr.mxu1 %v3148_v1 }
 0xd0b   :  { %v2061_v42 = vpop.permute.xlu0 %2060 }
 0xd0e   :  { %v2942_v37 = vpop.eup %2941 }
 0xd0f   :  { %v1833_v38 = vmul.f32 %v2942_v37, %v2938_v27 }
 0xd11   :  { %2825 = vmatmul.mubr.msk.f32.vlgmr.msra.gmra.mrb[22].mxu1 %vm392_vm2, %v1833_v38 }
 0xd12   :  { %2833 = vmatpush3.msra.mxu1 %v3436_v62  ;;  %2834 = vmatprep.mubr.msk.f32.mxu1 %vm3147_vm0, %v3148_v1  ;;  %v2059_v62 = vpop.permute.xlu1 %2058 }
 0xd13   :  { %2842 = vmatprep.subr.mxu1 %v3148_v1 }
 0xd70   :  { %v1740_v39 = vpop.f32.mrb[20].mxu1 }
 0xd71   :  { %v2816_v40 = vpop.f32.mrb[21].mxu1  ;;  %2835 = vmatmul.mubr.msk.f32.vlgmr.msra.gmra.mrb[24].mxu1 %vm392_vm2, %v1740_v39 }
 0xd72   :  { %2844 = vmatprep.mubr.msk.f32.mxu1 %vm3147_vm0, %v3148_v1 }
 0xde4   :  { %v1907_v41 = vpop.f32.mrb[22].mxu1 }
 0xde5   :  { %v2826_v43 = vpop.f32.mrb[23].mxu1  ;;  %2830 = vmatmul.mubr.msk.f32.vlgmr.msra.gmra.mrb[20].mxu0 %vm392_vm2, %v1907_v41 }
 0xde6   :  { %2838 = vmatpush3.xpose.msk.msra.mxu0 %vm392_vm2, %v2061_v42  ;;  %2839 = vmatprep.mubr.msk.f32.mxu0 %vm3147_vm0, %v3148_v1 }
 0xde7   :  { %2847 = vmatprep.subr.mxu0 %v3148_v1 }
 0xde9   :  { %2840 = vmatmul.mubr.msk.f32.vlgmr.msra.gmra.mrb[22].mxu0 %vm392_vm2, %v2059_v62 }
 0xdea   :  { %2848 = vmatpush3.msra.mxu0 %v3467_v31  ;;  %2849 = vmatprep.mubr.msk.f32.mxu0 %vm3147_vm0, %v3148_v1 }
 0xdeb   :  { %2857 = vmatprep.subr.mxu0 %v3148_v1 }
 0xe44   :  { %v2054_v44 = vpop.f32.mrb[24].mxu1 }
 0xe45   :  { %v2836_v45 = vpop.f32.mrb[25].mxu1 }
 0xeb8   :  { %v1981_v46 = vpop.f32.mrb[20].mxu0 }
 0xeb9   :  { %v2055_v48 = vadd.f32 %v2054_v44, %v1981_v46  ;;  %v2831_v49 = vpop.f32.mrb[21].mxu0 }
 0xebc   :  { %v2132_v50 = vpop.f32.mrb[22].mxu0 }
 0xebd   :  { %v2841_v51 = vpop.f32.mrb[23].mxu0  ;;  %v2136_v52 = vsel %vm392_vm2, %v2132_v50, -inf }
 0xebe   :  { %2137 = vmax.xlane.f32.xlu0 %v2136_v52 }
 0xed4   :  { %2147 = vrot.lane.b32.xlu0 %v3535_v24, %s3150_s9 }
 0xed8   :  { %2298 = vrot.lane.b32.xlu0 %v3521_v3, %s3151_s26 }
 0xf4b   :  { %v2138_v31 = vpop.xlane.xlu0 %2137 }
 0xf4c   :  { %v2139_v53 = vsub.f32 %v2132_v50, %v2138_v31 }
 0xf4e   :  { %v2140_v54 = vmul.f32 1.442695, %v2139_v53 }
 0xf4f   :  { %v2148_v36 = vpop.permute.xlu0 %2147 }
 0xf50   :  { %2943 = vpow2.f32 %v2140_v54  ;;  %2843 = vmatpush3.msra.mxu1 %v2148_v36 }
 0xf51   :  { %2852 = vmatprep.subr.mxu1 %v3148_v1 }
 0xf53   :  { %v2299_v5 = vpop.permute.xlu0 %2298 }
 0xf5a   :  { %v2944_v9 = vpop.eup %2943 }
 0xf5b   :  { %v2142_v55 = vsel %vm392_vm2, %v2944_v9, 0.0 }
 0xf5c   :  { %2143 = vadd.xlane.f32.xlu1 %v2142_v55 }
 0xf6d   :  { %2300 = vrot.lane.b32.xlu1 %v3519_v63, %s3151_s26 }
 0xfe9   :  { %v2144_v13 = vpop.xlane.xlu1 %2143 }
 0xfea   :  { %2945 = vrcp.f32 %v2144_v13 }
 0xfed   :  { %v2301_v56 = vpop.permute.xlu1 %2300 }
 0xff4   :  { %v2946_v19 = vpop.eup %2945 }
 0xff5   :  { %v2146_v21 = vmul.f32 %v2946_v19, %v2944_v9 }
 0xff7   :  { %2845 = vmatmul.mubr.msk.f32.vlgmr.msra.gmra.mrb[26].mxu1 %vm392_vm2, %v2146_v21 }
 0xff8   :  { %2853 = vmatpush3.xpose.msk.msra.mxu1 %vm392_vm2, %v2301_v56  ;;  %2854 = vmatprep.mubr.msk.f32.mxu1 %vm3147_vm0, %v3148_v1 }
 0xff9   :  { %2862 = vmatprep.subr.mxu1 %v3148_v1 }
 0xffb   :  { %2855 = vmatmul.mubr.msk.f32.vlgmr.msra.gmra.mrb[28].mxu1 %vm392_vm2, %v2299_v5 }
 0xffc   :  { %2863 = vmatpush3.msra.mxu1 %v3478_v47  ;;  %2864 = vmatprep.mubr.msk.f32.mxu1 %vm3147_vm0, %v3148_v1 }
0x10ca   :  { %v2219_v12 = vpop.f32.mrb[26].mxu1 }
0x10cb   :  { %v2846_v58 = vpop.f32.mrb[27].mxu1  ;;  %2850 = vmatmul.mubr.msk.f32.vlgmr.msra.gmra.mrb[24].mxu0 %vm392_vm2, %v2219_v12 }
0x10cc   :  { %2859 = vmatprep.mubr.msk.f32.mxu0 %vm3147_vm0, %v3148_v1 }
0x10ce   :  { %v2372_v59 = vpop.f32.mrb[28].mxu1 }
0x10cf   :  { %v2856_v60 = vpop.f32.mrb[29].mxu1  ;;  %v2376_v61 = vsel %vm392_vm2, %v2372_v59, -inf }
0x10d0   :  { %2377 = vmax.xlane.f32.xlu0 %v2376_v61 }
0x10e6   :  { %2387 = vrot.lane.b32.xlu0 %v3535_v24, %s3151_s26 }
0x115d   :  { %v2378_v63 = vpop.xlane.xlu0 %2377 }
0x115e   :  { %v2379_v47 = vsub.f32 %v2372_v59, %v2378_v63 }
0x1160   :  { %v2380_v2 = vmul.f32 1.442695, %v2379_v47 }
0x1161   :  { %v2388_v3 = vpop.permute.xlu0 %2387 }
0x1162   :  { %2947 = vpow2.f32 %v2380_v2  ;;  %2858 = vmatpush3.msra.mxu0 %v2388_v3 }
0x116c   :  { %v2948_v23 = vpop.eup %2947 }
0x116d   :  { %v2382_v4 = vsel %vm392_vm2, %v2948_v23, 0.0 }
0x116e   :  { %2383 = vadd.xlane.f32.xlu1 %v2382_v4 }
0x119e   :  { %v2293_v6 = vpop.f32.mrb[24].mxu0 }
0x119f   :  { %v2297_v1 = vadd.f32 %v2293_v6, %v2055_v48  ;;  %v2851_v7 = vpop.f32.mrb[25].mxu0 }
0x11fb   :  { %v2384_v34 = vpop.xlane.xlu1 %2383 }
0x11fc   :  { %2949 = vrcp.f32 %v2384_v34 }
0x1206   :  { %v2950_v8 = vpop.eup %2949 }
0x1207   :  { %v2386_v10 = vmul.f32 %v2950_v8, %v2948_v23 }
0x1209   :  { %2860 = vmatmul.mubr.msk.f32.vlgmr.msra.gmra.mrb[26].mxu0 %vm392_vm2, %v2386_v10 }
0x12dc   :  { %v2459_v24 = vpop.f32.mrb[26].mxu0 }
0x12dd   :  { %v2861_v11 = vpop.f32.mrb[27].mxu0  ;;  %2865 = vmatmul.mubr.msk.f32.vlgmr.msra.gmra.mrb[30].mxu1 %vm392_vm2, %v2459_v24 }
0x13b0   :  { %v2533_v14 = vpop.f32.mrb[30].mxu1 }
0x13b1   :  { %v2537_v15 = vadd.f32 %v2533_v14, %v2297_v1  ;;  %v2866_v16 = vpop.f32.mrb[31].mxu1 }
0x13b3   :  { %v2538_v57 = vadd.f32 %v3513_v0, %v2537_v15 }
0x13b5   :  { %2540 = vst.msk [vmem:[#allocation14 + $0x8] sm:$0xff] %vm159_vm1, %v2538_v57 }
0x13b6   :  { %3116 = shalt.err (!%p3113_p4)
}
0x13b7   :  { %s3117_s14 = scalar_lea.hbm %s3633_s11, 256 }
0x13b8   :  { %p3118_p5 = scmp.ne.s32.totalorder %s3633_s11, %s3117_s14  ;;  %p3121_p6 = scmp.lt.u32.totalorder %s3117_s14, %s3633_s11 }
0x13ba   :  { %p3123_p7 = pnand %p3121_p6, %p3118_p5 }
0x13bc   :  { %3126 = shalt.err (!%p3123_p7)
}
0x13bd   :  { %2552 = dma.vmem_to_hbm [thread:$0]  %s2547_s25, 256, %s3633_s11, [#allocation4], %s3139_s29, %s3139_s29, %s3140_s30  }
0x13be   :  { %3135 = dma.done.wait [#allocation4], 256  }
0x13bf   :  { %3136 = vsyncadd [#allocation4], 4294967040 }
0x13c0   :  { %2556 = vsyncpa [#allocation3], 1 }
0x13c1   :  { %2557 = vsyncpa [#allocation6], 1 }
0x13c2   :  { %2558 = vsyncpa [#allocation9], 1 }
0x13c3   :  { %2559 = vsyncpa [#allocation12], 1 }
0x13c4   :  { %2560 = vsyncpa [#allocation4], 1 }

// kernel: tpu_custom_call.1
= control target key start
LH: loop header
LB: loop body
LE: loop exit
PB: predicated region body
PF: predicated region fallthrough
CT: control target
= control target key end

     0   :  { %16 = vsyncpa [#allocation3], 0  ;;  %s3622_s0 = inlined_call_operand.hbm [shape: f32[2,8,32], index: 0, kind: input, shape index: {}]   ;;  %s3623_s1 = inlined_call_operand.hbm [shape: f32[2,8,32], index: 1, kind: input, shape index: {}]   ;;  %s3624_s2 = inlined_call_operand.hbm [shape: f32[2,8,32], index: 2, kind: input, shape index: {}]   ;;  %s3625_s3 = inlined_call_operand.hbm [shape: f32[32,32], index: 3, kind: input, shape index: {}]   ;;  %s3626_s4 = inlined_call_operand.hbm [shape: f32[32,32], index: 4, kind: input, shape index: {}]   ;;  %s3627_s5 = inlined_call_operand.hbm [shape: f32[32,32], index: 5, kind: input, shape index: {}]   ;;  %s3628_s6 = inlined_call_operand.hbm [shape: f32[4,8,32], index: 6, kind: input, shape index: {}]   ;;  %s3629_s7 = inlined_call_operand.vmem [shape: f32[1,32], index: 7, kind: input, shape index: {}]   ;;  %s3630_s8 = inlined_call_operand.vmem [shape: f32[1,32], index: 8, kind: input, shape index: {}]   ;;  %s3631_s9 = inlined_call_operand.vmem [shape: f32[1,32], index: 9, kind: input, shape index: {}]   ;;  %s3632_s10 = inlined_call_operand.vmem [shape: f32[1,32], index: 10, kind: input, shape index: {}]   ;;  %s3633_s11 = inlined_call_operand.hbm [shape: f32[2,8,32], index: 11, kind: output, shape index: {}]  }
   0x1   :  { %17 = vsyncpa [#allocation6], 0 }
   0x2   :  { %18 = vsyncpa [#allocation9], 0 }
   0x3   :  { %19 = vsyncpa [#allocation12], 0 }
   0x4   :  { %20 = vsyncpa [#allocation4], 0  ;;  %s3137_s17 = smov [#allocation5]   ;;  %s3138_s19 = smov [#allocation8]  }
   0x5   :  { %s38_s18 = sshll.u32 %s3137_s17, 4  ;;  %s62_s20 = sshll.u32 %s3138_s19, 4  ;;  %s39_s18 = int_to_ptr.vmem [resolvable:$true] %s38_s18  ;;  %s3213_s20 = int_to_ptr.vmem [resolvable:$true] %s62_s20 }
   0x6   :  { %s2951_s23 = scalar_lea.hbm %s3623_s1, 256 }
   0x7   :  { %p2952_p0 = scmp.ne.s32.totalorder %s3623_s1, %s2951_s23  ;;  %p2955_p1 = scmp.lt.u32.totalorder %s2951_s23, %s3623_s1 }
   0x9   :  { %p2957_p2 = pnand %p2955_p1, %p2952_p0 }
   0xb   :  { %2960 = shalt.err (!%p2957_p2)
}
   0xc   :  { %s2961_s28 = scalar_lea.vmem %s39_s18, 256  ;;  %p2966_p4 = scmp.lt.s32.totalorder %s39_s18, %s39_s18 }
   0xd   :  { %p2962_p3 = scmp.ne.s32.totalorder %s39_s18, %s2961_s28  ;;  %p2967_p5 = scmp.lt.s32.totalorder %s2961_s28, %s2961_s28 }
   0xf   :  { %p2968_p6 = por %p2967_p5, %p2966_p4 }
  0x11   :  { %p2969_p7 = pnand %p2968_p6, %p2962_p3 }
  0x13   :  { %2972 = shalt.err (!%p2969_p7)
}
  0x14   :  { %s3139_s29 = smov 128   ;;  %s3140_s30 = smov 8  }
  0x15   :  { %44 = dma.hbm_to_vmem [thread:$0]  %s3623_s1, 256, %s39_s18, [#allocation6], %s3139_s29, %s3139_s29, %s3140_s30  }
  0x16   :  { %s2973_s16 = scalar_lea.hbm %s3625_s3, 512 }
  0x17   :  { %p2974_p8 = scmp.ne.s32.totalorder %s3625_s3, %s2973_s16  ;;  %p2977_p9 = scmp.lt.u32.totalorder %s2973_s16, %s3625_s3 }
  0x19   :  { %p2979_p10 = pnand %p2977_p9, %p2974_p8 }
  0x1b   :  { %2982 = shalt.err (!%p2979_p10)
}
  0x1c   :  { %s2983_s23 = scalar_lea.vmem %s3213_s20, 512  ;;  %p2988_p12 = scmp.lt.s32.totalorder %s3213_s20, %s3213_s20 }
  0x1d   :  { %p2984_p11 = scmp.ne.s32.totalorder %s3213_s20, %s2983_s23  ;;  %p2989_p13 = scmp.lt.s32.totalorder %s2983_s23, %s2983_s23 }
  0x1f   :  { %p2990_p0 = por %p2989_p13, %p2988_p12 }
  0x21   :  { %p2991_p1 = pnand %p2990_p0, %p2984_p11 }
  0x23   :  { %2994 = shalt.err (!%p2991_p1)
}
  0x24   :  { %68 = dma.hbm_to_vmem [thread:$0]  %s3625_s3, 512, %s3213_s20, [#allocation9], %s3139_s29, %s3139_s29, %s3140_s30  }
  0x25   :  { %s3141_s24 = smov [#allocation11]   ;;  %s3142_s26 = smov [#allocation2]  }
  0x26   :  { %s86_s25 = sshll.u32 %s3141_s24, 4  ;;  %s26_s27 = sshll.u32 %s3142_s26, 4  ;;  %s87_s25 = int_to_ptr.vmem [resolvable:$true] %s86_s25  ;;  %s3250_s27 = int_to_ptr.vmem [resolvable:$true] %s26_s27 }
  0x27   :  { %s2995_s13 = scalar_lea.hbm %s3627_s5, 512 }
  0x28   :  { %p2996_p2 = scmp.ne.s32.totalorder %s3627_s5, %s2995_s13  ;;  %p2999_p3 = scmp.lt.u32.totalorder %s2995_s13, %s3627_s5 }
  0x2a   :  { %p3001_p4 = pnand %p2999_p3, %p2996_p2 }
  0x2c   :  { %3004 = shalt.err (!%p3001_p4)
}
  0x2d   :  { %s3005_s3 = scalar_lea.vmem %s87_s25, 512  ;;  %p3010_p6 = scmp.lt.s32.totalorder %s87_s25, %s87_s25 }
  0x2e   :  { %p3006_p5 = scmp.ne.s32.totalorder %s87_s25, %s3005_s3  ;;  %p3011_p7 = scmp.lt.s32.totalorder %s3005_s3, %s3005_s3 }
  0x30   :  { %p3012_p8 = por %p3011_p7, %p3010_p6 }
  0x32   :  { %p3013_p9 = pnand %p3012_p8, %p3006_p5 }
  0x34   :  { %3016 = shalt.err (!%p3013_p9)
}
  0x35   :  { %92 = dma.hbm_to_vmem [thread:$0]  %s3627_s5, 512, %s87_s25, [#allocation12], %s3139_s29, %s3139_s29, %s3140_s30  }
  0x36   :  { %s3017_s23 = scalar_lea.hbm %s3622_s0, 256 }
  0x37   :  { %p3018_p10 = scmp.ne.s32.totalorder %s3622_s0, %s3017_s23  ;;  %p3021_p11 = scmp.lt.u32.totalorder %s3017_s23, %s3622_s0 }
  0x39   :  { %p3023_p12 = pnand %p3021_p11, %p3018_p10 }
  0x3b   :  { %3026 = shalt.err (!%p3023_p12)
}
  0x3c   :  { %s3027_s28 = scalar_lea.vmem %s3250_s27, 256  ;;  %p3032_p0 = scmp.lt.s32.totalorder %s3250_s27, %s3250_s27 }
  0x3d   :  { %p3028_p13 = scmp.ne.s32.totalorder %s3250_s27, %s3027_s28  ;;  %p3033_p1 = scmp.lt.s32.totalorder %s3027_s28, %s3027_s28 }
  0x3f   :  { %p3034_p2 = por %p3033_p1, %p3032_p0 }
  0x41   :  { %p3035_p3 = pnand %p3034_p2, %p3028_p13 }
  0x43   :  { %3038 = shalt.err (!%p3035_p3)
}
  0x44   :  { %32 = dma.hbm_to_vmem [thread:$0]  %s3622_s0, 256, %s3250_s27, [#allocation3], %s3139_s29, %s3139_s29, %s3140_s30  }
  0x45   :  { %s3143_s12 = smov [#allocation7]   ;;  %s3144_s14 = smov [#allocation10]  }
  0x46   :  { %s50_s13 = sshll.u32 %s3143_s12, 4  ;;  %s74_s15 = sshll.u32 %s3144_s14, 4  ;;  %s51_s13 = int_to_ptr.vmem [resolvable:$true] %s50_s13  ;;  %s3287_s15 = int_to_ptr.vmem [resolvable:$true] %s74_s15 }
  0x47   :  { %s3039_s3 = scalar_lea.hbm %s3624_s2, 256 }
  0x48   :  { %p3040_p4 = scmp.ne.s32.totalorder %s3624_s2, %s3039_s3  ;;  %p3043_p5 = scmp.lt.u32.totalorder %s3039_s3, %s3624_s2 }
  0x4a   :  { %p3045_p6 = pnand %p3043_p5, %p3040_p4 }
  0x4c   :  { %3048 = shalt.err (!%p3045_p6)
}
  0x4d   :  { %s3049_s0 = scalar_lea.vmem %s51_s13, 256  ;;  %p3054_p8 = scmp.lt.s32.totalorder %s51_s13, %s51_s13 }
  0x4e   :  { %p3050_p7 = scmp.ne.s32.totalorder %s51_s13, %s3049_s0  ;;  %p3055_p9 = scmp.lt.s32.totalorder %s3049_s0, %s3049_s0 }
  0x50   :  { %p3056_p10 = por %p3055_p9, %p3054_p8 }
  0x52   :  { %p3057_p11 = pnand %p3056_p10, %p3050_p7 }
  0x54   :  { %3060 = shalt.err (!%p3057_p11)
}
  0x55   :  { %56 = dma.hbm_to_vmem [thread:$0]  %s3624_s2, 256, %s51_s13, [#allocation6], %s3139_s29, %s3139_s29, %s3140_s30  }
  0x56   :  { %s3061_s24 = scalar_lea.hbm %s3626_s4, 512 }
  0x57   :  { %p3062_p12 = scmp.ne.s32.totalorder %s3626_s4, %s3061_s24  ;;  %p3065_p13 = scmp.lt.u32.totalorder %s3061_s24, %s3626_s4 }
  0x59   :  { %p3067_p0 = pnand %p3065_p13, %p3062_p12 }
  0x5b   :  { %3070 = shalt.err (!%p3067_p0)
}
  0x5c   :  { %s3071_s12 = scalar_lea.vmem %s3287_s15, 512  ;;  %p3076_p2 = scmp.lt.s32.totalorder %s3287_s15, %s3287_s15 }
  0x5d   :  { %p3072_p1 = scmp.ne.s32.totalorder %s3287_s15, %s3071_s12  ;;  %p3077_p3 = scmp.lt.s32.totalorder %s3071_s12, %s3071_s12 }
  0x5f   :  { %p3078_p4 = por %p3077_p3, %p3076_p2 }
  0x61   :  { %p3079_p5 = pnand %p3078_p4, %p3072_p1 }
  0x63   :  { %3082 = shalt.err (!%p3079_p5)
}
  0x64   :  { %80 = dma.hbm_to_vmem [thread:$0]  %s3626_s4, 512, %s3287_s15, [#allocation9], %s3139_s29, %s3139_s29, %s3140_s30  }
  0x65   :  { %s3145_s14 = smov [#allocation13]   ;;  %s3083_s20 = scalar_lea.hbm %s3628_s6, 512 }
  0x66   :  { %s98_s16 = sshll.u32 %s3145_s14, 4  ;;  %p3084_p6 = scmp.ne.s32.totalorder %s3628_s6, %s3083_s20  ;;  %s99_s16 = int_to_ptr.vmem [resolvable:$true] %s98_s16 }
  0x67   :  { %p3087_p7 = scmp.lt.u32.totalorder %s3083_s20, %s3628_s6 }
  0x69   :  { %p3089_p8 = pnand %p3087_p7, %p3084_p6 }
  0x6b   :  { %3092 = shalt.err (!%p3089_p8)
}
  0x6c   :  { %s3093_s27 = scalar_lea.vmem %s99_s16, 512  ;;  %p3098_p10 = scmp.lt.s32.totalorder %s99_s16, %s99_s16 }
  0x6d   :  { %p3094_p9 = scmp.ne.s32.totalorder %s99_s16, %s3093_s27  ;;  %p3099_p11 = scmp.lt.s32.totalorder %s3093_s27, %s3093_s27 }
  0x6f   :  { %p3100_p12 = por %p3099_p11, %p3098_p10 }
  0x71   :  { %p3101_p13 = pnand %p3100_p12, %p3094_p9 }
  0x73   :  { %3104 = shalt.err (!%p3101_p13)
}
  0x74   :  { %104 = dma.hbm_to_vmem [thread:$0]  %s3628_s6, 512, %s99_s16, [#allocation12], %s3139_s29, %s3139_s29, %s3140_s30  }
  0x75   :  { %3127 = dma.done.wait [#allocation3], 256  }
  0x76   :  { %3128 = vsyncadd [#allocation3], 4294967040 }
  0x77   :  { %3129 = dma.done.wait [#allocation6], 512  }
  0x78   :  { %3130 = vsyncadd [#allocation6], 4294966784 }
  0x79   :  { %3131 = dma.done.wait [#allocation9], 1024  }
  0x7a   :  { %3132 = vsyncadd [#allocation9], 4294966272 }
  0x7b   :  { %3133 = dma.done.wait [#allocation12], 1024  }
  0x7c   :  { %3134 = vsyncadd [#allocation12], 4294966272  ;;  %v3146_v0 = vmov 0.0|0.0   ;;  %vm3147_vm0 = vmmov 0   ;;  %v3148_v1 = vmov 0.0   ;;  %v138_v2 = vld [vmem:[#allocation10] sm:$0xff] }
  0x7d   :  { %2873 = vmatprep.subr.bf16.mxu1 %v3146_v0  ;;  %2867 = vmatprep.subr.bf16.mxu0 %v3146_v0  ;;  %v139_v3 = vld [vmem:[#allocation10 + $0x8] sm:$0xff]  ;;  %v134_v4 = vld [vmem:[#allocation8] sm:$0xff]  ;;  %v140_v7 = vld [vmem:[#allocation10 + $0x10] sm:$0xff]  ;;  %vm159_vm1 = vcmask 261120   ;;  %vm392_vm2 = vcmask 64512   ;;  %s3149_s24 = smov 120  }
  0x7e   :  { %2700 = vmatprep.mubr.msk.f32.mxu1 %vm3147_vm0, %v3148_v1  ;;  %2689 = vmatprep.mubr.msk.f32.mxu0 %vm3147_vm0, %v3148_v1  ;;  %v3345_v5 = vpack.c.bf16 %v139_v3, %v138_v2  ;;  %v135_v6 = vld [vmem:[#allocation8 + $0x8] sm:$0xff]  ;;  %v141_v8 = vld [vmem:[#allocation10 + $0x18] sm:$0xff]  ;;  %v136_v10 = vld [vmem:[#allocation8 + $0x10] sm:$0xff]  ;;  %s3151_s26 = smov 104  }
  0x7f   :  { %v3347_v9 = vpack.c.bf16 %v135_v6, %v134_v4  ;;  %v137_v11 = vld [vmem:[#allocation8 + $0x18] sm:$0xff]  ;;  %v3350_v12 = vpack.c.bf16 %v141_v8, %v140_v7  ;;  %v151_v14 = vld [vmem:[#allocation5] sm:$0xff]  ;;  %v150_v15 = vld [vmem:[#allocation2] sm:$0xff] }
  0x80   :  { %2875 = vmatpush3.bf16.msra.mxu1 %v3345_v5  ;;  %v3354_v13 = vpack.c.bf16 %v137_v11, %v136_v10  ;;  %v142_v16 = vld [vmem:[#allocation11] sm:$0xff]  ;;  %v143_v17 = vld [vmem:[#allocation11 + $0x8] sm:$0xff]  ;;  %v144_v18 = vld [vmem:[#allocation11 + $0x10] sm:$0xff] }
  0x81   :  { %2869 = vmatpush3.bf16.msra.mxu0 %v3347_v9  ;;  %2876 = vmatprep.subr.bf16.mxu1 %v3146_v0  ;;  %v3367_v19 = vpack.c.bf16 %v143_v17, %v142_v16  ;;  %v145_v20 = vld [vmem:[#allocation11 + $0x18] sm:$0xff]  ;;  %v152_v22 = vld [vmem:[#allocation7] sm:$0xff]  ;;  %v3431_v57 = vld [vmem:[#allocation13 + $0x8] sm:$0xff] }
  0x82   :  { %2870 = vmatprep.subr.bf16.mxu0 %v3146_v0  ;;  %v3370_v21 = vpack.c.bf16 %v145_v20, %v144_v18  ;;  %v3381_v23 = vld [vmem:[%s3630_s8] ss:$0 sm:$0xff]  ;;  %v3436_v62 = vld [vmem:[#allocation13] sm:$0xff] }
  0x83   :  { %v3386_v24 = vld [vmem:[%s3629_s7] ss:$0 sm:$0xff] }
  0x84   :  { %2878 = vmatpush3.bf16.msra.mxu1 %v3350_v12  ;;  %v3409_v34 = vld [vmem:[%s3631_s9] ss:$0 sm:$0xff]  ;;  %s3150_s9 = smov 112  }
  0x85   :  { %2872 = vmatpush3.bf16.msra.mxu0 %v3354_v13  ;;  %2714 = vmatprep.subr.mxu1 %v3148_v1 }
  0x86   :  { %2879 = vmatprep.subr.bf16.mxu0 %v3146_v0 }
  0x87   :  { %2701 = vmatmul.mubr.msk.f32.vlgmr.msra.gmra.mrb[0].mxu1 %vm159_vm1, %v151_v14 }
  0x88   :  { %2690 = vmatmul.mubr.msk.f32.vlgmr.msra.gmra.mrb[0].mxu0 %vm159_vm1, %v150_v15  ;;  %2716 = vmatprep.mubr.msk.f32.mxu1 %vm3147_vm0, %v3148_v1 }
  0x89   :  { %2711 = vmatprep.mubr.msk.f32.mxu0 %vm3147_vm0, %v3148_v1  ;;  %2881 = vmatpush3.bf16.msra.mxu0 %v3367_v19 }
  0x8a   :  { %2882 = vmatprep.subr.bf16.mxu0 %v3146_v0 }
  0x8d   :  { %2884 = vmatpush3.bf16.msra.mxu0 %v3370_v21 }
  0x8e   :  { %2724 = vmatprep.subr.mxu0 %v3148_v1 }
  0x90   :  { %2712 = vmatmul.mubr.msk.f32.vlgmr.msra.gmra.mrb[2].mxu0 %vm159_vm1, %v152_v22 }
  0x91   :  { %2726 = vmatprep.mubr.msk.f32.mxu0 %vm3147_vm0, %v3148_v1 }
 0x15a   :  { %v309_v25 = vpop.f32.mrb[0].mxu1 }
 0x15b   :  { %v310_v26 = vadd.f32 %v3381_v23, %v309_v25  ;;  %v229_v27 = vpop.f32.mrb[0].mxu0  ;;  %v2702_v28 = vpop.f32.mrb[1].mxu1 }
 0x15c   :  { %v230_v29 = vadd.f32 %v3386_v24, %v229_v27  ;;  %v2691_v30 = vpop.f32.mrb[1].mxu0 }
 0x15d   :  { %556 = vrot.lane.b32.xlu0 %v310_v26, %s3149_s24  ;;  %2715 = vmatpush3.xpose.msk.msra.mxu1 %vm392_vm2, %v310_v26 }
 0x15e   :  { %v3392_v31 = vmul.f32 0.35355338, %v230_v29  ;;  %2719 = vmatprep.subr.mxu1 %v3148_v1 }
 0x160   :  { %2717 = vmatmul.mubr.msk.f32.vlgmr.msra.gmra.mrb[2].mxu1 %vm392_vm2, %v3392_v31 }
 0x161   :  { %554 = vrot.lane.b32.xlu0 %v3392_v31, %s3149_s24  ;;  %2721 = vmatprep.mubr.msk.f32.mxu1 %vm3147_vm0, %v3148_v1 }
 0x163   :  { %v388_v35 = vpop.f32.mrb[2].mxu0 }
 0x164   :  { %v3412_v36 = vadd.f32 %v3409_v34, %v388_v35  ;;  %v2713_v37 = vpop.f32.mrb[3].mxu0 }
 0x166   :  { %2720 = vmatpush3.msra.mxu1 %v3412_v36 }
 0x167   :  { %2729 = vmatprep.subr.mxu1 %v3148_v1 }
 0x1cf   :  { %v557_v32 = vpop.permute.xlu0 %556 }
 0x1d0   :  { %2725 = vmatpush3.xpose.msk.msra.mxu0 %vm392_vm2, %v557_v32 }
 0x1d1   :  { %2734 = vmatprep.subr.mxu0 %v3148_v1 }
 0x1d3   :  { %v555_v33 = vpop.permute.xlu0 %554 }
 0x1d4   :  { %2727 = vmatmul.mubr.msk.f32.vlgmr.msra.gmra.mrb[4].mxu0 %vm392_vm2, %v555_v33 }
 0x1d5   :  { %2736 = vmatprep.mubr.msk.f32.mxu0 %vm3147_vm0, %v3148_v1  ;;  %2735 = vmatpush3.msra.mxu0 %v3431_v57 }
 0x1d6   :  { %2744 = vmatprep.subr.mxu0 %v3148_v1 }
 0x233   :  { %v465_v38 = vpop.f32.mrb[2].mxu1 }
 0x234   :  { %v2718_v39 = vpop.f32.mrb[3].mxu1  ;;  %v469_v40 = vsel %vm392_vm2, %v465_v38, -inf }
 0x235   :  { %470 = vmax.xlane.f32.xlu1 %v469_v40 }
 0x2a7   :  { %v628_v41 = vpop.f32.mrb[4].mxu0 }
 0x2a8   :  { %v2728_v42 = vpop.f32.mrb[5].mxu0  ;;  %v632_v43 = vsel %vm392_vm2, %v628_v41, -inf }
 0x2a9   :  { %633 = vmax.xlane.f32.xlu1 %v632_v43 }
 0x2c2   :  { %v471_v44 = vpop.xlane.xlu1 %470 }
 0x2c3   :  { %v472_v45 = vsub.f32 %v465_v38, %v471_v44 }
 0x2c5   :  { %v473_v46 = vmul.f32 1.442695, %v472_v45 }
 0x2c7   :  { %2919 = vpow2.f32 %v473_v46 }
 0x2d1   :  { %v2920_v47 = vpop.eup %2919 }
 0x2d2   :  { %v475_v48 = vsel %vm392_vm2, %v2920_v47, 0.0 }
 0x2d3   :  { %476 = vadd.xlane.f32.xlu0 %v475_v48 }
 0x2e9   :  { %957 = vrot.lane.b32.xlu0 %v3412_v36, %s3150_s9 }
 0x2ed   :  { %1111 = vrot.lane.b32.xlu0 %v310_v26, %s3151_s26 }
 0x336   :  { %v634_v49 = vpop.xlane.xlu1 %633 }
 0x337   :  { %v635_v50 = vsub.f32 %v628_v41, %v634_v49 }
 0x339   :  { %v636_v51 = vmul.f32 1.442695, %v635_v50 }
 0x33b   :  { %2921 = vpow2.f32 %v636_v51 }
 0x345   :  { %v2922_v52 = vpop.eup %2921 }
 0x346   :  { %v638_v53 = vsel %vm392_vm2, %v2922_v52, 0.0 }
 0x347   :  { %639 = vadd.xlane.f32.xlu1 %v638_v53 }
 0x358   :  { %644 = vrot.lane.b32.xlu1 %v3412_v36, %s3149_s24 }
 0x35c   :  { %870 = vrot.lane.b32.xlu1 %v310_v26, %s3150_s9 }
 0x360   :  { %v477_v54 = vpop.xlane.xlu0 %476  ;;  %868 = vrot.lane.b32.xlu1 %v3392_v31, %s3150_s9 }
 0x361   :  { %2923 = vrcp.f32 %v477_v54 }
 0x364   :  { %v958_v2 = vpop.permute.xlu0 %957 }
 0x368   :  { %v1112_v29 = vpop.permute.xlu0 %1111 }
 0x36b   :  { %v2924_v55 = vpop.eup %2923 }
 0x36c   :  { %v479_v56 = vmul.f32 %v2924_v55, %v2920_v47  ;;  %v3478_v47 = vld [vmem:[#allocation13 + $0x18] sm:$0xff] }
 0x36e   :  { %2722 = vmatmul.mubr.msk.f32.vlgmr.msra.gmra.mrb[4].mxu1 %vm392_vm2, %v479_v56  ;;  %v1363_v56 = vld [vmem:[#allocation7 + $0x8] sm:$0xff] }
 0x36f   :  { %2731 = vmatprep.mubr.msk.f32.mxu1 %vm3147_vm0, %v3148_v1 }
 0x3d4   :  { %v640_v58 = vpop.xlane.xlu1 %639 }
 0x3d5   :  { %2925 = vrcp.f32 %v640_v58 }
 0x3d8   :  { %v645_v59 = vpop.permute.xlu1 %644 }
 0x3d9   :  { %2730 = vmatpush3.msra.mxu1 %v645_v59 }
 0x3da   :  { %2739 = vmatprep.subr.mxu1 %v3148_v1 }
 0x3dc   :  { %v871_v4 = vpop.permute.xlu1 %870 }
 0x3df   :  { %v2926_v60 = vpop.eup %2925 }
 0x3e0   :  { %v642_v61 = vmul.f32 %v2926_v60, %v2922_v52  ;;  %v869_v8 = vpop.permute.xlu1 %868 }
 0x3e2   :  { %2732 = vmatmul.mubr.msk.f32.vlgmr.msra.gmra.mrb[6].mxu1 %vm392_vm2, %v642_v61 }
 0x3e3   :  { %2740 = vmatpush3.msra.mxu1 %v3436_v62  ;;  %2741 = vmatprep.mubr.msk.f32.mxu1 %vm3147_vm0, %v3148_v1 }
 0x3e4   :  { %2749 = vmatprep.subr.mxu1 %v3148_v1 }
 0x441   :  { %v549_v63 = vpop.f32.mrb[4].mxu1 }
 0x442   :  { %v2723_v3 = vpop.f32.mrb[5].mxu1  ;;  %2742 = vmatmul.mubr.msk.f32.vlgmr.msra.gmra.mrb[8].mxu1 %vm392_vm2, %v549_v63 }
 0x443   :  { %2750 = vmatpush3.msra.mxu1 %v958_v2  ;;  %2751 = vmatprep.mubr.msk.f32.mxu1 %vm3147_vm0, %v3148_v1 }
 0x444   :  { %2759 = vmatprep.subr.mxu1 %v3148_v1 }
 0x4b5   :  { %v716_v6 = vpop.f32.mrb[6].mxu1 }
 0x4b6   :  { %v2733_v7 = vpop.f32.mrb[7].mxu1  ;;  %2737 = vmatmul.mubr.msk.f32.vlgmr.msra.gmra.mrb[6].mxu0 %vm392_vm2, %v716_v6 }
 0x4b7   :  { %2745 = vmatpush3.xpose.msk.msra.mxu0 %vm392_vm2, %v871_v4  ;;  %2746 = vmatprep.mubr.msk.f32.mxu0 %vm3147_vm0, %v3148_v1 }
 0x4b8   :  { %2754 = vmatprep.subr.mxu0 %v3148_v1 }
 0x4ba   :  { %2747 = vmatmul.mubr.msk.f32.vlgmr.msra.gmra.mrb[8].mxu0 %vm392_vm2, %v869_v8 }
 0x4bb   :  { %2756 = vmatprep.mubr.msk.f32.mxu0 %vm3147_vm0, %v3148_v1 }
 0x515   :  { %v864_v10 = vpop.f32.mrb[8].mxu1 }
 0x516   :  { %v2743_v11 = vpop.f32.mrb[9].mxu1 }
 0x589   :  { %v791_v14 = vpop.f32.mrb[6].mxu0 }
 0x58a   :  { %v865_v15 = vadd.f32 %v864_v10, %v791_v14  ;;  %v2738_v16 = vpop.f32.mrb[7].mxu0 }
 0x58d   :  { %v942_v17 = vpop.f32.mrb[8].mxu0 }
 0x58e   :  { %v2748_v18 = vpop.f32.mrb[9].mxu0  ;;  %v946_v20 = vsel %vm392_vm2, %v942_v17, -inf }
 0x58f   :  { %947 = vmax.xlane.f32.xlu1 %v946_v20 }
 0x61c   :  { %v948_v22 = vpop.xlane.xlu1 %947 }
 0x61d   :  { %v949_v25 = vsub.f32 %v942_v17, %v948_v22 }
 0x61f   :  { %v950_v26 = vmul.f32 1.442695, %v949_v25 }
 0x621   :  { %2927 = vpow2.f32 %v950_v26 }
 0x62b   :  { %v2928_v27 = vpop.eup %2927 }
 0x62c   :  { %v952_v28 = vsel %vm392_vm2, %v2928_v27, 0.0 }
 0x62d   :  { %953 = vadd.xlane.f32.xlu0 %v952_v28 }
 0x643   :  { %1109 = vrot.lane.b32.xlu0 %v3392_v31, %s3151_s26  ;;  %v3467_v31 = vld [vmem:[#allocation13 + $0x10] sm:$0xff] }
 0x644   :  { %2755 = vmatpush3.msra.mxu0 %v3467_v31 }
 0x645   :  { %2764 = vmatprep.subr.mxu0 %v3148_v1 }
 0x6ba   :  { %v954_v30 = vpop.xlane.xlu0 %953 }
 0x6bb   :  { %2929 = vrcp.f32 %v954_v30 }
 0x6be   :  { %v1110_v35 = vpop.permute.xlu0 %1109 }
 0x6c5   :  { %v2930_v32 = vpop.eup %2929 }
 0x6c6   :  { %v956_v33 = vmul.f32 %v2930_v32, %v2928_v27 }
 0x6c8   :  { %2752 = vmatmul.mubr.msk.f32.vlgmr.msra.gmra.mrb[10].mxu1 %vm392_vm2, %v956_v33 }
 0x6c9   :  { %2760 = vmatpush3.xpose.msk.msra.mxu1 %vm392_vm2, %v1112_v29  ;;  %2761 = vmatprep.mubr.msk.f32.mxu1 %vm3147_vm0, %v3148_v1 }
 0x6ca   :  { %2769 = vmatprep.subr.mxu1 %v3148_v1 }
 0x6cc   :  { %2762 = vmatmul.mubr.msk.f32.vlgmr.msra.gmra.mrb[12].mxu1 %vm392_vm2, %v1110_v35 }
 0x6cd   :  { %2771 = vmatprep.mubr.msk.f32.mxu1 %vm3147_vm0, %v3148_v1  ;;  %2770 = vmatpush3.msra.mxu1 %v3478_v47 }
 0x6ce   :  { %2891 = vmatprep.subr.bf16.mxu1 %v3146_v0 }
 0x79b   :  { %v1029_v37 = vpop.f32.mrb[10].mxu1 }
 0x79c   :  { %v2753_v38 = vpop.f32.mrb[11].mxu1  ;;  %2757 = vmatmul.mubr.msk.f32.vlgmr.msra.gmra.mrb[10].mxu0 %vm392_vm2, %v1029_v37 }
 0x79d   :  { %2766 = vmatprep.mubr.msk.f32.mxu0 %vm3147_vm0, %v3148_v1 }
 0x79f   :  { %v1183_v39 = vpop.f32.mrb[12].mxu1 }
 0x7a0   :  { %v2763_v40 = vpop.f32.mrb[13].mxu1  ;;  %v1187_v41 = vsel %vm392_vm2, %v1183_v39, -inf }
 0x7a1   :  { %1188 = vmax.xlane.f32.xlu0 %v1187_v41 }
 0x82e   :  { %v1189_v42 = vpop.xlane.xlu0 %1188 }
 0x82f   :  { %v1190_v43 = vsub.f32 %v1183_v39, %v1189_v42 }
 0x831   :  { %v1191_v44 = vmul.f32 1.442695, %v1190_v43 }
 0x833   :  { %2931 = vpow2.f32 %v1191_v44 }
 0x83d   :  { %v2932_v45 = vpop.eup %2931 }
 0x83e   :  { %v1193_v46 = vsel %vm392_vm2, %v2932_v45, 0.0 }
 0x83f   :  { %1194 = vadd.xlane.f32.xlu1 %v1193_v46 }
 0x850   :  { %1198 = vrot.lane.b32.xlu1 %v3412_v36, %s3151_s26  ;;  %v1359_v36 = vld [vmem:[#allocation2 + $0x8] sm:$0xff] }
 0x86f   :  { %v1104_v48 = vpop.f32.mrb[10].mxu0 }
 0x870   :  { %v1108_v49 = vadd.f32 %v1104_v48, %v865_v15  ;;  %v2758_v50 = vpop.f32.mrb[11].mxu0 }
 0x8cc   :  { %v1195_v51 = vpop.xlane.xlu1 %1194 }
 0x8cd   :  { %2933 = vrcp.f32 %v1195_v51 }
 0x8d0   :  { %v1199_v52 = vpop.permute.xlu1 %1198 }
 0x8d1   :  { %2765 = vmatpush3.msra.mxu0 %v1199_v52 }
 0x8d2   :  { %2885 = vmatprep.subr.bf16.mxu0 %v3146_v0 }
 0x8d7   :  { %v2934_v53 = vpop.eup %2933 }
 0x8d8   :  { %v1197_v54 = vmul.f32 %v2934_v53, %v2932_v45 }
 0x8da   :  { %2767 = vmatmul.mubr.msk.f32.vlgmr.msra.gmra.mrb[12].mxu0 %vm392_vm2, %v1197_v54 }
 0x8db   :  { %2887 = vmatpush3.bf16.msra.mxu0 %v3347_v9  ;;  %2782 = vmatprep.mubr.msk.f32.mxu0 %vm3147_vm0, %v3148_v1 }
 0x8dc   :  { %2888 = vmatprep.subr.bf16.mxu0 %v3146_v0 }
 0x8df   :  { %2890 = vmatpush3.bf16.msra.mxu0 %v3354_v13  ;;  %v1361_v13 = vld [vmem:[#allocation5 + $0x8] sm:$0xff] }
 0x8e0   :  { %2897 = vmatprep.subr.bf16.mxu0 %v3146_v0 }
 0x8e2   :  { %2783 = vmatmul.mubr.msk.f32.vlgmr.msra.gmra.mrb[14].mxu0 %vm159_vm1, %v1359_v36 }
 0x8e3   :  { %2899 = vmatpush3.bf16.msra.mxu0 %v3367_v19  ;;  %2804 = vmatprep.mubr.msk.f32.mxu0 %vm3147_vm0, %v3148_v1 }
 0x8e4   :  { %2900 = vmatprep.subr.bf16.mxu0 %v3146_v0 }
 0x8e7   :  { %2902 = vmatpush3.bf16.msra.mxu0 %v3370_v21 }
 0x8e8   :  { %2817 = vmatprep.subr.mxu0 %v3148_v1 }
 0x8ea   :  { %2805 = vmatmul.mubr.msk.f32.vlgmr.msra.gmra.mrb[16].mxu0 %vm159_vm1, %v1363_v56 }
 0x8eb   :  { %2819 = vmatprep.mubr.msk.f32.mxu0 %vm3147_vm0, %v3148_v1 }
 0x9ad   :  { %v1270_v9 = vpop.f32.mrb[12].mxu0 }
 0x9ae   :  { %v2768_v55 = vpop.f32.mrb[13].mxu0  ;;  %2772 = vmatmul.mubr.msk.f32.vlgmr.msra.gmra.mrb[14].mxu1 %vm392_vm2, %v1270_v9 }
 0x9af   :  { %2893 = vmatpush3.bf16.msra.mxu1 %v3345_v5  ;;  %2793 = vmatprep.mubr.msk.f32.mxu1 %vm3147_vm0, %v3148_v1 }
 0x9b0   :  { %2894 = vmatprep.subr.bf16.mxu1 %v3146_v0  ;;  %v3513_v0 = vld [vmem:[%s3632_s10] ss:$0 sm:$0xff]  ;;  %s3152_s10 = smov [#allocation14]  }
 0x9b1   :  { %s2546_s25 = sshll.u32 %s3152_s10, 4  ;;  %s2547_s25 = int_to_ptr.vmem [resolvable:$true] %s2546_s25 }
 0x9b2   :  { %s3105_s12 = scalar_lea.vmem %s2547_s25, 256  ;;  %p3110_p1 = scmp.lt.s32.totalorder %s2547_s25, %s2547_s25 }
 0x9b3   :  { %2896 = vmatpush3.bf16.msra.mxu1 %v3350_v12  ;;  %p3106_p0 = scmp.ne.s32.totalorder %s2547_s25, %s3105_s12  ;;  %p3111_p2 = scmp.lt.s32.totalorder %s3105_s12, %s3105_s12 }
 0x9b4   :  { %2807 = vmatprep.subr.mxu1 %v3148_v1 }
 0x9b5   :  { %v1433_v19 = vpop.f32.mrb[14].mxu0  ;;  %p3112_p3 = por %p3111_p2, %p3110_p1 }
 0x9b6   :  { %2794 = vmatmul.mubr.msk.f32.vlgmr.msra.gmra.mrb[16].mxu1 %vm159_vm1, %v1361_v13  ;;  %v2784_v21 = vpop.f32.mrb[15].mxu0  ;;  %v1434_v60 = vadd.f32 %v3386_v24, %v1433_v19 }
 0x9b7   :  { %2809 = vmatprep.mubr.msk.f32.mxu1 %vm3147_vm0, %v3148_v1  ;;  %p3113_p4 = pnand %p3112_p3, %p3106_p0 }
 0x9b8   :  { %v3521_v3 = vmul.f32 0.35355338, %v1434_v60 }
 0xa81   :  { %v1345_v5 = vpop.f32.mrb[14].mxu1 }
 0xa82   :  { %v1349_v12 = vadd.f32 %v1345_v5, %v1108_v49  ;;  %v2773_v58 = vpop.f32.mrb[15].mxu1 }
 0xa84   :  { %v1356_v59 = vadd.f32 %v3513_v0, %v1349_v12 }
 0xa86   :  { %1357 = vst.msk [vmem:[#allocation14] sm:$0xff] %vm159_vm1, %v1356_v59 }
 0xa89   :  { %v1507_v61 = vpop.f32.mrb[16].mxu1 }
 0xa8a   :  { %v3519_v63 = vadd.f32 %v3381_v23, %v1507_v61  ;;  %v2795_v2 = vpop.f32.mrb[17].mxu1  ;;  %v1580_v23 = vpop.f32.mrb[16].mxu0 }
 0xa8b   :  { %v3535_v24 = vadd.f32 %v3409_v34, %v1580_v23  ;;  %v2806_v4 = vpop.f32.mrb[17].mxu0 }
 0xa8c   :  { %1747 = vrot.lane.b32.xlu1 %v3519_v63, %s3149_s24  ;;  %2808 = vmatpush3.xpose.msk.msra.mxu1 %vm392_vm2, %v3519_v63 }
 0xa8d   :  { %2812 = vmatprep.subr.mxu1 %v3148_v1 }
 0xa8f   :  { %2810 = vmatmul.mubr.msk.f32.vlgmr.msra.gmra.mrb[18].mxu1 %vm392_vm2, %v3521_v3 }
 0xa90   :  { %1745 = vrot.lane.b32.xlu1 %v3521_v3, %s3149_s24  ;;  %2814 = vmatprep.mubr.msk.f32.mxu1 %vm3147_vm0, %v3148_v1 }
 0xa91   :  { %2813 = vmatpush3.msra.mxu1 %v3535_v24 }
 0xa92   :  { %2822 = vmatprep.subr.mxu1 %v3148_v1 }
 0xafe   :  { %v1748_v6 = vpop.permute.xlu1 %1747 }
 0xaff   :  { %2818 = vmatpush3.xpose.msk.msra.mxu0 %vm392_vm2, %v1748_v6 }
 0xb00   :  { %2827 = vmatprep.subr.mxu0 %v3148_v1 }
 0xb02   :  { %v1746_v7 = vpop.permute.xlu1 %1745 }
 0xb03   :  { %2820 = vmatmul.mubr.msk.f32.vlgmr.msra.gmra.mrb[18].mxu0 %vm392_vm2, %v1746_v7 }
 0xb04   :  { %2828 = vmatpush3.msra.mxu0 %v3431_v57  ;;  %2829 = vmatprep.mubr.msk.f32.mxu0 %vm3147_vm0, %v3148_v1 }
 0xb05   :  { %2837 = vmatprep.subr.mxu0 %v3148_v1 }
 0xb62   :  { %v1656_v34 = vpop.f32.mrb[18].mxu1 }
 0xb63   :  { %v2811_v8 = vpop.f32.mrb[19].mxu1  ;;  %v1660_v10 = vsel %vm392_vm2, %v1656_v34, -inf }
 0xb64   :  { %1661 = vmax.xlane.f32.xlu1 %v1660_v10 }
 0xb75   :  { %2058 = vrot.lane.b32.xlu1 %v3521_v3, %s3150_s9 }
 0xbd6   :  { %v1819_v11 = vpop.f32.mrb[18].mxu0 }
 0xbd7   :  { %v2821_v14 = vpop.f32.mrb[19].mxu0  ;;  %v1823_v15 = vsel %vm392_vm2, %v1819_v11, -inf }
 0xbd8   :  { %1824 = vmax.xlane.f32.xlu0 %v1823_v15 }
 0xbf1   :  { %v1662_v16 = vpop.xlane.xlu1 %1661 }
 0xbf2   :  { %v1663_v57 = vsub.f32 %v1656_v34, %v1662_v16 }
 0xbf4   :  { %v1664_v17 = vmul.f32 1.442695, %v1663_v57 }
 0xbf6   :  { %2935 = vpow2.f32 %v1664_v17 }
 0xc00   :  { %v2936_v18 = vpop.eup %2935 }
 0xc01   :  { %v1666_v20 = vsel %vm392_vm2, %v2936_v18, 0.0 }
 0xc02   :  { %1667 = vadd.xlane.f32.xlu0 %v1666_v20 }
 0xc65   :  { %v1825_v22 = vpop.xlane.xlu0 %1824 }
 0xc66   :  { %v1826_v25 = vsub.f32 %v1819_v11, %v1825_v22 }
 0xc68   :  { %v1827_v26 = vmul.f32 1.442695, %v1826_v25 }
 0xc6a   :  { %2937 = vpow2.f32 %v1827_v26 }
 0xc74   :  { %v2938_v27 = vpop.eup %2937 }
 0xc75   :  { %v1829_v28 = vsel %vm392_vm2, %v2938_v27, 0.0 }
 0xc76   :  { %1830 = vadd.xlane.f32.xlu0 %v1829_v28 }
 0xc8c   :  { %1835 = vrot.lane.b32.xlu0 %v3535_v24, %s3149_s24 }
 0xc8f   :  { %v1668_v29 = vpop.xlane.xlu0 %1667 }
 0xc90   :  { %2939 = vrcp.f32 %v1668_v29  ;;  %2060 = vrot.lane.b32.xlu0 %v3519_v63, %s3150_s9 }
 0xc9a   :  { %v2940_v30 = vpop.eup %2939 }
 0xc9b   :  { %v1670_v32 = vmul.f32 %v2940_v30, %v2936_v18 }
 0xc9d   :  { %2815 = vmatmul.mubr.msk.f32.vlgmr.msra.gmra.mrb[20].mxu1 %vm392_vm2, %v1670_v32 }
 0xc9e   :  { %2824 = vmatprep.mubr.msk.f32.mxu1 %vm3147_vm0, %v3148_v1 }
 0xd03   :  { %v1831_v33 = vpop.xlane.xlu0 %1830 }
 0xd04   :  { %2941 = vrcp.f32 %v1831_v33 }
 0xd07   :  { %v1836_v35 = vpop.permute.xlu0 %1835 }
 0xd08   :  { %2823 = vmatpush3.msra.mxu1 %v1836_v35 }
 0xd09   :  { %2832 = vmatprep.subr.mxu1 %v3148_v1 }
 0xd0b   :  { %v2061_v42 = vpop.permute.xlu0 %2060 }
 0xd0e   :  { %v2942_v37 = vpop.eup %2941 }
 0xd0f   :  { %v1833_v38 = vmul.f32 %v2942_v37, %v2938_v27 }
 0xd11   :  { %2825 = vmatmul.mubr.msk.f32.vlgmr.msra.gmra.mrb[22].mxu1 %vm392_vm2, %v1833_v38 }
 0xd12   :  { %2833 = vmatpush3.msra.mxu1 %v3436_v62  ;;  %2834 = vmatprep.mubr.msk.f32.mxu1 %vm3147_vm0, %v3148_v1  ;;  %v2059_v62 = vpop.permute.xlu1 %2058 }
 0xd13   :  { %2842 = vmatprep.subr.mxu1 %v3148_v1 }
 0xd70   :  { %v1740_v39 = vpop.f32.mrb[20].mxu1 }
 0xd71   :  { %v2816_v40 = vpop.f32.mrb[21].mxu1  ;;  %2835 = vmatmul.mubr.msk.f32.vlgmr.msra.gmra.mrb[24].mxu1 %vm392_vm2, %v1740_v39 }
 0xd72   :  { %2844 = vmatprep.mubr.msk.f32.mxu1 %vm3147_vm0, %v3148_v1 }
 0xde4   :  { %v1907_v41 = vpop.f32.mrb[22].mxu1 }
 0xde5   :  { %v2826_v43 = vpop.f32.mrb[23].mxu1  ;;  %2830 = vmatmul.mubr.msk.f32.vlgmr.msra.gmra.mrb[20].mxu0 %vm392_vm2, %v1907_v41 }
 0xde6   :  { %2838 = vmatpush3.xpose.msk.msra.mxu0 %vm392_vm2, %v2061_v42  ;;  %2839 = vmatprep.mubr.msk.f32.mxu0 %vm3147_vm0, %v3148_v1 }
 0xde7   :  { %2847 = vmatprep.subr.mxu0 %v3148_v1 }
 0xde9   :  { %2840 = vmatmul.mubr.msk.f32.vlgmr.msra.gmra.mrb[22].mxu0 %vm392_vm2, %v2059_v62 }
 0xdea   :  { %2848 = vmatpush3.msra.mxu0 %v3467_v31  ;;  %2849 = vmatprep.mubr.msk.f32.mxu0 %vm3147_vm0, %v3148_v1 }
 0xdeb   :  { %2857 = vmatprep.subr.mxu0 %v3148_v1 }
 0xe44   :  { %v2054_v44 = vpop.f32.mrb[24].mxu1 }
 0xe45   :  { %v2836_v45 = vpop.f32.mrb[25].mxu1 }
 0xeb8   :  { %v1981_v46 = vpop.f32.mrb[20].mxu0 }
 0xeb9   :  { %v2055_v48 = vadd.f32 %v2054_v44, %v1981_v46  ;;  %v2831_v49 = vpop.f32.mrb[21].mxu0 }
 0xebc   :  { %v2132_v50 = vpop.f32.mrb[22].mxu0 }
 0xebd   :  { %v2841_v51 = vpop.f32.mrb[23].mxu0  ;;  %v2136_v52 = vsel %vm392_vm2, %v2132_v50, -inf }
 0xebe   :  { %2137 = vmax.xlane.f32.xlu0 %v2136_v52 }
 0xed4   :  { %2147 = vrot.lane.b32.xlu0 %v3535_v24, %s3150_s9 }
 0xed8   :  { %2298 = vrot.lane.b32.xlu0 %v3521_v3, %s3151_s26 }
 0xf4b   :  { %v2138_v31 = vpop.xlane.xlu0 %2137 }
 0xf4c   :  { %v2139_v53 = vsub.f32 %v2132_v50, %v2138_v31 }
 0xf4e   :  { %v2140_v54 = vmul.f32 1.442695, %v2139_v53 }
 0xf4f   :  { %v2148_v36 = vpop.permute.xlu0 %2147 }
 0xf50   :  { %2943 = vpow2.f32 %v2140_v54  ;;  %2843 = vmatpush3.msra.mxu1 %v2148_v36 }
 0xf51   :  { %2852 = vmatprep.subr.mxu1 %v3148_v1 }
 0xf53   :  { %v2299_v5 = vpop.permute.xlu0 %2298 }
 0xf5a   :  { %v2944_v9 = vpop.eup %2943 }
 0xf5b   :  { %v2142_v55 = vsel %vm392_vm2, %v2944_v9, 0.0 }
 0xf5c   :  { %2143 = vadd.xlane.f32.xlu1 %v2142_v55 }
 0xf6d   :  { %2300 = vrot.lane.b32.xlu1 %v3519_v63, %s3151_s26 }
 0xfe9   :  { %v2144_v13 = vpop.xlane.xlu1 %2143 }
 0xfea   :  { %2945 = vrcp.f32 %v2144_v13 }
 0xfed   :  { %v2301_v56 = vpop.permute.xlu1 %2300 }
 0xff4   :  { %v2946_v19 = vpop.eup %2945 }
 0xff5   :  { %v2146_v21 = vmul.f32 %v2946_v19, %v2944_v9 }
 0xff7   :  { %2845 = vmatmul.mubr.msk.f32.vlgmr.msra.gmra.mrb[26].mxu1 %vm392_vm2, %v2146_v21 }
 0xff8   :  { %2853 = vmatpush3.xpose.msk.msra.mxu1 %vm392_vm2, %v2301_v56  ;;  %2854 = vmatprep.mubr.msk.f32.mxu1 %vm3147_vm0, %v3148_v1 }
 0xff9   :  { %2862 = vmatprep.subr.mxu1 %v3148_v1 }
 0xffb   :  { %2855 = vmatmul.mubr.msk.f32.vlgmr.msra.gmra.mrb[28].mxu1 %vm392_vm2, %v2299_v5 }
 0xffc   :  { %2863 = vmatpush3.msra.mxu1 %v3478_v47  ;;  %2864 = vmatprep.mubr.msk.f32.mxu1 %vm3147_vm0, %v3148_v1 }
0x10ca   :  { %v2219_v12 = vpop.f32.mrb[26].mxu1 }
0x10cb   :  { %v2846_v58 = vpop.f32.mrb[27].mxu1  ;;  %2850 = vmatmul.mubr.msk.f32.vlgmr.msra.gmra.mrb[24].mxu0 %vm392_vm2, %v2219_v12 }
0x10cc   :  { %2859 = vmatprep.mubr.msk.f32.mxu0 %vm3147_vm0, %v3148_v1 }
0x10ce   :  { %v2372_v59 = vpop.f32.mrb[28].mxu1 }
0x10cf   :  { %v2856_v60 = vpop.f32.mrb[29].mxu1  ;;  %v2376_v61 = vsel %vm392_vm2, %v2372_v59, -inf }
0x10d0   :  { %2377 = vmax.xlane.f32.xlu0 %v2376_v61 }
0x10e6   :  { %2387 = vrot.lane.b32.xlu0 %v3535_v24, %s3151_s26 }
0x115d   :  { %v2378_v63 = vpop.xlane.xlu0 %2377 }
0x115e   :  { %v2379_v47 = vsub.f32 %v2372_v59, %v2378_v63 }
0x1160   :  { %v2380_v2 = vmul.f32 1.442695, %v2379_v47 }
0x1161   :  { %v2388_v3 = vpop.permute.xlu0 %2387 }
0x1162   :  { %2947 = vpow2.f32 %v2380_v2  ;;  %2858 = vmatpush3.msra.mxu0 %v2388_v3 }
0x116c   :  { %v2948_v23 = vpop.eup %2947 }
0x116d   :  { %v2382_v4 = vsel %vm392_vm2, %v2948_v23, 0.0 }
0x116e   :  { %2383 = vadd.xlane.f32.xlu1 %v2382_v4 }
0x119e   :  { %v2293_v6 = vpop.f32.mrb[24].mxu0 }
0x119f   :  { %v2297_v1 = vadd.f32 %v2293_v6, %v2055_v48  ;;  %v2851_v7 = vpop.f32.mrb[25].mxu0 }
0x11fb   :  { %v2384_v34 = vpop.xlane.xlu1 %2383 }
0x11fc   :  { %2949 = vrcp.f32 %v2384_v34 }
0x1206   :  { %v2950_v8 = vpop.eup %2949 }
0x1207   :  { %v2386_v10 = vmul.f32 %v2950_v8, %v2948_v23 }
0x1209   :  { %2860 = vmatmul.mubr.msk.f32.vlgmr.msra.gmra.mrb[26].mxu0 %vm392_vm2, %v2386_v10 }
0x12dc   :  { %v2459_v24 = vpop.f32.mrb[26].mxu0 }
0x12dd   :  { %v2861_v11 = vpop.f32.mrb[27].mxu0  ;;  %2865 = vmatmul.mubr.msk.f32.vlgmr.msra.gmra.mrb[30].mxu1 %vm392_vm2, %v2459_v24 }
0x13b0   :  { %v2533_v14 = vpop.f32.mrb[30].mxu1 }
0x13b1   :  { %v2537_v15 = vadd.f32 %v2533_v14, %v2297_v1  ;;  %v2866_v16 = vpop.f32.mrb[31].mxu1 }
0x13b3   :  { %v2538_v57 = vadd.f32 %v3513_v0, %v2537_v15 }
0x13b5   :  { %2540 = vst.msk [vmem:[#allocation14 + $0x8] sm:$0xff] %vm159_vm1, %v2538_v57 }
0x13b6   :  { %3116 = shalt.err (!%p3113_p4)
}
0x13b7   :  { %s3117_s14 = scalar_lea.hbm %s3633_s11, 256 }
0x13b8   :  { %p3118_p5 = scmp.ne.s32.totalorder %s3633_s11, %s3117_s14  ;;  %p3121_p6 = scmp.lt.u32.totalorder %s3117_s14, %s3633_s11 }
0x13ba   :  { %p3123_p7 = pnand %p3121_p6, %p3118_p5 }
0x13bc   :  { %3126 = shalt.err (!%p3123_p7)
}
0x13bd   :  { %2552 = dma.vmem_to_hbm [thread:$0]  %s2547_s25, 256, %s3633_s11, [#allocation4], %s3139_s29, %s3139_s29, %s3140_s30  }
0x13be   :  { %3135 = dma.done.wait [#allocation4], 256  }
0x13bf   :  { %3136 = vsyncadd [#allocation4], 4294967040 }
0x13c0   :  { %2556 = vsyncpa [#allocation3], 1 }
0x13c1   :  { %2557 = vsyncpa [#allocation6], 1 }
0x13c2   :  { %2558 = vsyncpa [#allocation9], 1 }
0x13c3   :  { %2559 = vsyncpa [#allocation12], 1 }
0x13c4   :  { %2560 = vsyncpa [#allocation4], 1 }

</bundles_post_ra>
